<compile_context>
chip_gen: v6e
topology: v6e:2x2x1
jax: 0.10.0
libtpu: 0.0.40
codegen_flags: <defaults>
</compile_context>

<pallas_src>
import jax
import jax.numpy as jnp
from jax.experimental import pallas as pl
from jax.experimental.pallas import tpu as pltpu

H = 768           # BERT hidden size
H_MID = 256       # intermediate size of linear_without_tag
OUT = 50          # output embedding size
OUT_PAD = 128     # lane-dense padded output width
TAG = 8           # x_assist feature size
TAG_PAD = 128     # lane-aligned padded x_assist width


def _cdiv(a, b):
    return -(-a // b)


def _round_up(x, m):
    return _cdiv(x, m) * m


def _bf16(x):
    return x.astype(jnp.bfloat16)


# ----------------------------------------------------------------------------
# Kernel 1: x_assist is None
#   pooled = tanh(cls @ Wp + bp)        (BERT pooler)
#   out    = relu(pooled @ W1 + b1) -> relu(. @ W2 + b2) -> . @ W3 + b3
# bf16 MXU operands, f32 accumulation; bias adds / relu in f32; tanh in bf16.
# ----------------------------------------------------------------------------
def _no_tag_kernel(cls_ref, wp_ref, bp_ref, w1_ref, b1_ref, w2_ref, b2_ref,
                   w3_ref, b3_ref, out_ref):
    pooled = jnp.tanh(
        (jnp.dot(cls_ref[...], wp_ref[...], preferred_element_type=jnp.float32)
         + bp_ref[...]).astype(jnp.bfloat16))                       # (TB, 768) bf16
    h1 = jnp.maximum(
        jnp.dot(pooled, w1_ref[...],
                preferred_element_type=jnp.float32) + b1_ref[...], 0.0)
    h2 = jnp.maximum(
        jnp.dot(_bf16(h1), w2_ref[...],
                preferred_element_type=jnp.float32) + b2_ref[...], 0.0)
    out_ref[...] = (
        jnp.dot(_bf16(h2), w3_ref[...],
                preferred_element_type=jnp.float32) + b3_ref[...])   # (TB, 128) f32


# ----------------------------------------------------------------------------
# Kernel 2: x_assist provided
#   pooled = tanh(cls @ Wp + bp)
#   out    = pooled @ W_main + assist @ W_tag + bt      (concat folded away)
# W_main: (768, 128), W_tag: (128, 128); padded rows/cols are zero so the two
# accumulated dots equal concat([pooled, x_assist]) @ W with zero data movement.
# ----------------------------------------------------------------------------
def _with_tag_kernel(cls_ref, assist_ref, wp_ref, bp_ref, wm_ref, wt_ref,
                     bt_ref, out_ref):
    pooled = jnp.tanh(
        (jnp.dot(cls_ref[...], wp_ref[...], preferred_element_type=jnp.float32)
         + bp_ref[...]).astype(jnp.bfloat16))                       # (TB, 768) bf16
    out_ref[...] = (
        jnp.dot(pooled, wm_ref[...], preferred_element_type=jnp.float32)
        + jnp.dot(assist_ref[...], wt_ref[...],
                  preferred_element_type=jnp.float32)
        + bt_ref[...])                                              # (TB, 128) f32


def _weight_spec(shape):
    # Full-array block; same block index every grid step -> stays VMEM-resident.
    return pl.BlockSpec(shape, lambda i: (0,) * len(shape))


def prepare_head_params(params):
    """One-time bf16 cast + lane padding of the head weights (cache the result)."""
    w3p = jnp.pad(params["w3"], ((0, 0), (0, OUT_PAD - OUT)))
    b3p = jnp.pad(params["b3"], ((0, 0), (0, OUT_PAD - OUT)))
    wt_main = jnp.pad(params["wt_main"], ((0, 0), (0, OUT_PAD - OUT)))
    wt_tag = jnp.pad(params["wt_tag"],
                     ((0, TAG_PAD - TAG), (0, OUT_PAD - OUT)))
    btp = jnp.pad(params["bt"], ((0, 0), (0, OUT_PAD - OUT)))
    return {
        "wp": _bf16(params["wp"]), "bp": params["bp"],
        "w1": _bf16(params["w1"]), "b1": params["b1"],
        "w2": _bf16(params["w2"]), "b2": params["b2"],
        "w3p": _bf16(w3p), "b3p": b3p,
        "wt_main": _bf16(wt_main), "wt_tag": _bf16(wt_tag), "btp": btp,
    }


def triplet_forward(hidden, prep, x_assist=None, *, tb=512, min_tiles=1):
    """Pallas forward pass.

    hidden:   (B, S, 768) f32 encoder output (only the CLS token is used).
    prep:     output of prepare_head_params (bf16/padded weights, cached).
    tb:       nominal batch tile (512 suits v6e/v7x; 256 is fine on v5e).
    min_tiles: set >= 2 on v7x (for B >= 32ish) so both TensorCores get work.
    """
    B = hidden.shape[0]
    # Only the CLS token feeds the head; slice + bf16 cast in one wrapper pass
    # so the kernel DMAs (B, 768) bf16, not (B, S, 768) f32.
    cls = hidden[:, 0, :].astype(jnp.bfloat16)

    # Pick the batch tile to minimize padding (last tile isn't mostly zeros),
    # rounded to 16 rows (bf16 sublane packing).
    n_tiles = max(min_tiles, _cdiv(B, tb))
    TB = _round_up(_cdiv(B, n_tiles), 16)
    B_pad = n_tiles * TB
    if B_pad != B:
        cls = jnp.pad(cls, ((0, B_pad - B), (0, 0)))
    grid = (n_tiles,)

    compiler_params = pltpu.CompilerParams(
        dimension_semantics=("parallel",),
        vmem_limit_bytes=32 * 1024 * 1024,   # resident bf16 weights ~3 MB; safe on v5e/v6e/v7x
    )
    act_spec = pl.BlockSpec((TB, H), lambda i: (i, 0))
    out_spec = pl.BlockSpec((TB, OUT_PAD), lambda i: (i, 0))
    out_shape = jax.ShapeDtypeStruct((B_pad, OUT_PAD), jnp.float32)

    if x_assist is None:
        args = (cls,
                prep["wp"], prep["bp"],
                prep["w1"], prep["b1"],
                prep["w2"], prep["b2"],
                prep["w3p"], prep["b3p"])
        in_specs = [act_spec,
                    _weight_spec((H, H)), _weight_spec((1, H)),
                    _weight_spec((H, H)), _weight_spec((1, H)),
                    _weight_spec((H, H_MID)), _weight_spec((1, H_MID)),
                    _weight_spec((H_MID, OUT_PAD)), _weight_spec((1, OUT_PAD))]
        kernel = _no_tag_kernel
    else:
        assist = jnp.pad(x_assist.astype(jnp.bfloat16),
                         ((0, B_pad - B), (0, TAG_PAD - TAG)))
        args = (cls, assist,
                prep["wp"], prep["bp"],
                prep["wt_main"], prep["wt_tag"], prep["btp"])
        in_specs = [act_spec,
                    pl.BlockSpec((TB, TAG_PAD), lambda i: (i, 0)),
                    _weight_spec((H, H)), _weight_spec((1, H)),
                    _weight_spec((H, OUT_PAD)),
                    _weight_spec((TAG_PAD, OUT_PAD)),
                    _weight_spec((1, OUT_PAD))]
        kernel = _with_tag_kernel

    out = pl.pallas_call(
        kernel,
        out_shape=out_shape,
        grid=grid,
        in_specs=in_specs,
        out_specs=out_spec,
        compiler_params=compiler_params,
    )(*args)

    return out[:B, :OUT]


def init_params(key):
    ks = jax.random.split(key, 8)

    def lin(k, fan_in, fan_out):
        # deterministic small-scale init; weight stored (in, out), bias (1, out)
        w = jax.random.normal(k, (fan_in, fan_out), jnp.float32) / jnp.sqrt(fan_in)
        b = jnp.zeros((1, fan_out), jnp.float32) + 0.01
        return w, b

    wp, bp = lin(ks[0], H, H)          # BERT pooler dense
    w1, b1 = lin(ks[1], H, H)          # linear_without_tag[0]
    w2, b2 = lin(ks[2], H, H_MID)      # linear_without_tag[2]
    w3, b3 = lin(ks[3], H_MID, OUT)    # linear_without_tag[4]
    wt, bt = lin(ks[4], H + TAG, OUT)  # linear_layer_with_tag
    return {
        "wp": wp, "bp": bp,
        "w1": w1, "b1": b1,
        "w2": w2, "b2": b2,
        "w3": w3, "b3": b3,
        "wt_main": wt[:H, :], "wt_tag": wt[H:, :], "bt": bt,
    }


def reference_forward(hidden, params, x_assist=None, matmul_dtype=jnp.float32):
    """Pure-JAX reference. matmul_dtype=bf16 emulates the kernel's MXU/tanh path."""
    def mm(a, w):
        return jnp.dot(a.astype(matmul_dtype), w.astype(matmul_dtype),
                       preferred_element_type=jnp.float32)

    cls = hidden[:, 0, :]
    pre = mm(cls, params["wp"]) + params["bp"]
    pooled = jnp.tanh(pre.astype(matmul_dtype)).astype(jnp.float32)
    if x_assist is None:
        h1 = jax.nn.relu(mm(pooled, params["w1"]) + params["b1"])
        h2 = jax.nn.relu(mm(h1, params["w2"]) + params["b2"])
        return mm(h2, params["w3"]) + params["b3"]
    cat = jnp.concatenate([pooled, x_assist], axis=-1)
    w_full = jnp.concatenate([params["wt_main"], params["wt_tag"]], axis=0)
    return mm(cat, w_full) + params["bt"]


if __name__ == "__main__":
    key = jax.random.PRNGKey(0)
    k_param, k_hidden, k_assist = jax.random.split(key, 3)

    B, S = 2, 8
    params = init_params(k_param)
    prep = prepare_head_params(params)          # cached kernel-ready weights
    hidden = jax.random.normal(k_hidden, (B, S, H), jnp.float32)   # encoder output
    x_assist = jax.random.normal(k_assist, (B, TAG), jnp.float32)

    # Path 1: x_assist is None -> linear_without_tag MLP head
    out_no_tag = jax.block_until_ready(triplet_forward(hidden, prep, None))
    assert out_no_tag.shape == (B, OUT)
    ref_bf16 = reference_forward(hidden, params, None, matmul_dtype=jnp.bfloat16)
    ref_f32 = reference_forward(hidden, params, None)
    assert jnp.allclose(out_no_tag, ref_bf16, atol=1e-2, rtol=1e-2)
    assert jnp.allclose(out_no_tag, ref_f32, atol=5e-2, rtol=5e-2)

    # Path 2: x_assist given -> concat + linear_layer_with_tag
    out_tag = jax.block_until_ready(triplet_forward(hidden, prep, x_assist))
    assert out_tag.shape == (B, OUT)
    ref_bf16_t = reference_forward(hidden, params, x_assist, matmul_dtype=jnp.bfloat16)
    ref_f32_t = reference_forward(hidden, params, x_assist)
    assert jnp.allclose(out_tag, ref_bf16_t, atol=1e-2, rtol=1e-2)
    assert jnp.allclose(out_tag, ref_f32_t, atol=5e-2, rtol=5e-2)

    print("KERNEL_OK")
</pallas_src>

<mosaic_0001>
module attributes {stable_mosaic.version = 11 : i64} {
  func.func @_no_tag_kernel(%arg0: i32, %arg1: memref<16x768xbf16, #tpu.memory_space<vmem>>, %arg2: memref<768x768xbf16, #tpu.memory_space<vmem>>, %arg3: memref<1x768xf32, #tpu.memory_space<vmem>>, %arg4: memref<768x768xbf16, #tpu.memory_space<vmem>>, %arg5: memref<1x768xf32, #tpu.memory_space<vmem>>, %arg6: memref<768x256xbf16, #tpu.memory_space<vmem>>, %arg7: memref<1x256xf32, #tpu.memory_space<vmem>>, %arg8: memref<256x128xbf16, #tpu.memory_space<vmem>>, %arg9: memref<1x128xf32, #tpu.memory_space<vmem>>, %arg10: memref<16x128xf32, #tpu.memory_space<vmem>>) attributes {dimension_semantics = [#tpu.dimension_semantics<parallel>], iteration_bounds = array<i64: 1>, scalar_prefetch = 0 : i64, scratch_operands = 0 : i64, tpu.core_type = #tpu.core_type<tc>, window_params = [{transform_indices = @transform_0, window_bounds = array<i64: 16, 768>}, {pipeline_mode = #tpu.pipeline_mode<synchronous>, transform_indices = @transform_1, window_bounds = array<i64: 768, 768>}, {pipeline_mode = #tpu.pipeline_mode<synchronous>, transform_indices = @transform_2, window_bounds = array<i64: 1, 768>}, {pipeline_mode = #tpu.pipeline_mode<synchronous>, transform_indices = @transform_3, window_bounds = array<i64: 768, 768>}, {pipeline_mode = #tpu.pipeline_mode<synchronous>, transform_indices = @transform_4, window_bounds = array<i64: 1, 768>}, {pipeline_mode = #tpu.pipeline_mode<synchronous>, transform_indices = @transform_5, window_bounds = array<i64: 768, 256>}, {pipeline_mode = #tpu.pipeline_mode<synchronous>, transform_indices = @transform_6, window_bounds = array<i64: 1, 256>}, {pipeline_mode = #tpu.pipeline_mode<synchronous>, transform_indices = @transform_7, window_bounds = array<i64: 256, 128>}, {pipeline_mode = #tpu.pipeline_mode<synchronous>, transform_indices = @transform_8, window_bounds = array<i64: 1, 128>}, {transform_indices = @transform_9, window_bounds = array<i64: 16, 128>}]} {
    %c0 = arith.constant 0 : index
    %c0_0 = arith.constant 0 : index
    %0 = vector.load %arg1[%c0, %c0_0] : memref<16x768xbf16, #tpu.memory_space<vmem>>, vector<16x768xbf16>
    %c0_1 = arith.constant 0 : index
    %c0_2 = arith.constant 0 : index
    %1 = vector.load %arg2[%c0_1, %c0_2] : memref<768x768xbf16, #tpu.memory_space<vmem>>, vector<768x768xbf16>
    %cst = arith.constant dense<0.000000e+00> : vector<16x768xf32>
    %2 = tpu.matmul %0, %1, %cst {dimension_numbers = #tpu.dot_dimension_numbers<[1], [0], [0], [1], [0, 0, 1, 1], [], []>} : vector<16x768xbf16>, vector<768x768xbf16>, vector<16x768xf32> -> vector<16x768xf32>
    %c0_3 = arith.constant 0 : index
    %c0_4 = arith.constant 0 : index
    %3 = vector.load %arg3[%c0_3, %c0_4] : memref<1x768xf32, #tpu.memory_space<vmem>>, vector<1x768xf32>
    %4 = vector.broadcast %3 : vector<1x768xf32> to vector<16x768xf32>
    %5 = arith.addf %2, %4 : vector<16x768xf32>
    %6 = arith.truncf %5 : vector<16x768xf32> to vector<16x768xbf16>
    %7 = math.tanh %6 : vector<16x768xbf16>
    %c0_5 = arith.constant 0 : index
    %c0_6 = arith.constant 0 : index
    %8 = vector.load %arg4[%c0_5, %c0_6] : memref<768x768xbf16, #tpu.memory_space<vmem>>, vector<768x768xbf16>
    %cst_7 = arith.constant dense<0.000000e+00> : vector<16x768xf32>
    %9 = tpu.matmul %7, %8, %cst_7 {dimension_numbers = #tpu.dot_dimension_numbers<[1], [0], [0], [1], [0, 0, 1, 1], [], []>} : vector<16x768xbf16>, vector<768x768xbf16>, vector<16x768xf32> -> vector<16x768xf32>
    %c0_8 = arith.constant 0 : index
    %c0_9 = arith.constant 0 : index
    %10 = vector.load %arg5[%c0_8, %c0_9] : memref<1x768xf32, #tpu.memory_space<vmem>>, vector<1x768xf32>
    %11 = vector.broadcast %10 : vector<1x768xf32> to vector<16x768xf32>
    %12 = arith.addf %9, %11 : vector<16x768xf32>
    %cst_10 = arith.constant 0.000000e+00 : f32
    %13 = vector.broadcast %cst_10 : f32 to vector<16x768xf32>
    %14 = arith.maximumf %12, %13 : vector<16x768xf32>
    %15 = arith.truncf %14 : vector<16x768xf32> to vector<16x768xbf16>
    %c0_11 = arith.constant 0 : index
    %c0_12 = arith.constant 0 : index
    %16 = vector.load %arg6[%c0_11, %c0_12] : memref<768x256xbf16, #tpu.memory_space<vmem>>, vector<768x256xbf16>
    %cst_13 = arith.constant dense<0.000000e+00> : vector<16x256xf32>
    %17 = tpu.matmul %15, %16, %cst_13 {dimension_numbers = #tpu.dot_dimension_numbers<[1], [0], [0], [1], [0, 0, 1, 1], [], []>} : vector<16x768xbf16>, vector<768x256xbf16>, vector<16x256xf32> -> vector<16x256xf32>
    %c0_14 = arith.constant 0 : index
    %c0_15 = arith.constant 0 : index
    %18 = vector.load %arg7[%c0_14, %c0_15] : memref<1x256xf32, #tpu.memory_space<vmem>>, vector<1x256xf32>
    %19 = vector.broadcast %18 : vector<1x256xf32> to vector<16x256xf32>
    %20 = arith.addf %17, %19 : vector<16x256xf32>
    %cst_16 = arith.constant 0.000000e+00 : f32
    %21 = vector.broadcast %cst_16 : f32 to vector<16x256xf32>
    %22 = arith.maximumf %20, %21 : vector<16x256xf32>
    %23 = arith.truncf %22 : vector<16x256xf32> to vector<16x256xbf16>
    %c0_17 = arith.constant 0 : index
    %c0_18 = arith.constant 0 : index
    %24 = vector.load %arg8[%c0_17, %c0_18] : memref<256x128xbf16, #tpu.memory_space<vmem>>, vector<256x128xbf16>
    %cst_19 = arith.constant dense<0.000000e+00> : vector<16x128xf32>
    %25 = tpu.matmul %23, %24, %cst_19 {dimension_numbers = #tpu.dot_dimension_numbers<[1], [0], [0], [1], [0, 0, 1, 1], [], []>} : vector<16x256xbf16>, vector<256x128xbf16>, vector<16x128xf32> -> vector<16x128xf32>
    %c0_20 = arith.constant 0 : index
    %c0_21 = arith.constant 0 : index
    %26 = vector.load %arg9[%c0_20, %c0_21] : memref<1x128xf32, #tpu.memory_space<vmem>>, vector<1x128xf32>
    %27 = vector.broadcast %26 : vector<1x128xf32> to vector<16x128xf32>
    %28 = arith.addf %25, %27 : vector<16x128xf32>
    %c0_22 = arith.constant 0 : index
    %c0_23 = arith.constant 0 : index
    %29 = vector.load %arg10[%c0_22, %c0_23] : memref<16x128xf32, #tpu.memory_space<vmem>>, vector<16x128xf32>
    tpu.vector_store %arg10[%c0_22, %c0_23], %28 {strides = array<i32>} : memref<16x128xf32, #tpu.memory_space<vmem>>, vector<16x128xf32>,
    return
  }
  func.func @transform_0(%arg0: i32) -> (i32, i32) {
    %c0_i32 = arith.constant 0 : i32
    %c0_i32_0 = arith.constant 0 : i32
    return %arg0, %c0_i32 : i32, i32
  }
  func.func @transform_1(%arg0: i32) -> (i32, i32) {
    %c0_i32 = arith.constant 0 : i32
    %c0_i32_0 = arith.constant 0 : i32
    %c0_i32_1 = arith.constant 0 : i32
    return %c0_i32, %c0_i32_0 : i32, i32
  }
  func.func @transform_2(%arg0: i32) -> (i32, i32) {
    %c0_i32 = arith.constant 0 : i32
    %c0_i32_0 = arith.constant 0 : i32
    %c0_i32_1 = arith.constant 0 : i32
    return %c0_i32, %c0_i32_0 : i32, i32
  }
  func.func @transform_3(%arg0: i32) -> (i32, i32) {
    %c0_i32 = arith.constant 0 : i32
    %c0_i32_0 = arith.constant 0 : i32
    %c0_i32_1 = arith.constant 0 : i32
    return %c0_i32, %c0_i32_0 : i32, i32
  }
  func.func @transform_4(%arg0: i32) -> (i32, i32) {
    %c0_i32 = arith.constant 0 : i32
    %c0_i32_0 = arith.constant 0 : i32
    %c0_i32_1 = arith.constant 0 : i32
    return %c0_i32, %c0_i32_0 : i32, i32
  }
  func.func @transform_5(%arg0: i32) -> (i32, i32) {
    %c0_i32 = arith.constant 0 : i32
    %c0_i32_0 = arith.constant 0 : i32
    %c0_i32_1 = arith.constant 0 : i32
    return %c0_i32, %c0_i32_0 : i32, i32
  }
  func.func @transform_6(%arg0: i32) -> (i32, i32) {
    %c0_i32 = arith.constant 0 : i32
    %c0_i32_0 = arith.constant 0 : i32
    %c0_i32_1 = arith.constant 0 : i32
    return %c0_i32, %c0_i32_0 : i32, i32
  }
  func.func @transform_7(%arg0: i32) -> (i32, i32) {
    %c0_i32 = arith.constant 0 : i32
    %c0_i32_0 = arith.constant 0 : i32
    %c0_i32_1 = arith.constant 0 : i32
    return %c0_i32, %c0_i32_0 : i32, i32
  }
  func.func @transform_8(%arg0: i32) -> (i32, i32) {
    %c0_i32 = arith.constant 0 : i32
    %c0_i32_0 = arith.constant 0 : i32
    %c0_i32_1 = arith.constant 0 : i32
    return %c0_i32, %c0_i32_0 : i32, i32
  }
  func.func @transform_9(%arg0: i32) -> (i32, i32) {
    %c0_i32 = arith.constant 0 : i32
    %c0_i32_0 = arith.constant 0 : i32
    return %arg0, %c0_i32 : i32, i32
  }
}

</mosaic_0001>

<bundles_post_ra>
// kernel: tpu_custom_call.1
= control target key start
LH: loop header
LB: loop body
LE: loop exit
PB: predicated region body
PF: predicated region fallthrough
CT: control target
= control target key end

     0   :  { %14 = vsyncpa [#allocation3], 0  ;;  %s7637_s0 = inlined_call_operand.hbm [shape: bf16[16,768], index: 0, kind: input, shape index: {}]   ;;  %s7638_s1 = inlined_call_operand.hbm [shape: bf16[768,768], index: 1, kind: input, shape index: {}]   ;;  %s7639_s2 = inlined_call_operand.hbm [shape: f32[1,768], index: 2, kind: input, shape index: {}]   ;;  %s7640_s3 = inlined_call_operand.hbm [shape: bf16[768,768], index: 3, kind: input, shape index: {}]   ;;  %s7641_s4 = inlined_call_operand.hbm [shape: f32[1,768], index: 4, kind: input, shape index: {}]   ;;  %s7642_s5 = inlined_call_operand.hbm [shape: bf16[768,256], index: 5, kind: input, shape index: {}]   ;;  %s7643_s6 = inlined_call_operand.hbm [shape: f32[1,256], index: 6, kind: input, shape index: {}]   ;;  %s7644_s7 = inlined_call_operand.hbm [shape: bf16[256,128], index: 7, kind: input, shape index: {}]   ;;  %s7645_s8 = inlined_call_operand.hbm [shape: f32[1,128], index: 8, kind: input, shape index: {}]   ;;  %s7646_s9 = inlined_call_operand.hbm [shape: f32[16,128], index: 9, kind: output, shape index: {}]  }
   0x1   :  { %15 = vsyncpa [#allocation6], 0 }
   0x2   :  { %16 = vsyncpa [#allocation9], 0 }
   0x3   :  { %17 = vsyncpa [#allocation12], 0 }
   0x4   :  { %18 = vsyncpa [#allocation15], 0 }
   0x5   :  { %19 = vsyncpa [#allocation4], 0  ;;  %s7426_s30 = smov [#allocation5]   ;;  %s7427_s11 = smov [#allocation8]  }
   0x6   :  { %s37_s10 = sshll.u32 %s7426_s30, 4  ;;  %s59_s12 = sshll.u32 %s7427_s11, 4  ;;  %s38_s10 = int_to_ptr.vmem [resolvable:$true] %s37_s10  ;;  %s60_s12 = int_to_ptr.vmem [resolvable:$true] %s59_s12 }
   0x7   :  { %s7222_s13 = scalar_lea.vmem %s38_s10, 36864  ;;  %p7227_p1 = scmp.lt.s32.totalorder %s38_s10, %s38_s10 }
   0x8   :  { %p7223_p0 = scmp.ne.s32.totalorder %s38_s10, %s7222_s13  ;;  %p7228_p2 = scmp.lt.s32.totalorder %s7222_s13, %s7222_s13 }
   0xa   :  { %p7229_p3 = por %p7228_p2, %p7227_p1 }
   0xc   :  { %p7230_p4 = pnand %p7229_p3, %p7223_p0 }
   0xe   :  { %7233 = shalt.err (!%p7230_p4)
}
   0xf   :  { %s7428_s14 = smov 384   ;;  %s7429_s15 = smov 24  }
  0x10   :  { %43 = dma.hbm_to_vmem [thread:$0]  %s7638_s1, 36864, %s38_s10, [#allocation6], %s7428_s14, %s7428_s14, %s7429_s15  }
  0x11   :  { %s7242_s18 = scalar_lea.vmem %s60_s12, 36864  ;;  %p7247_p6 = scmp.lt.s32.totalorder %s60_s12, %s60_s12 }
  0x12   :  { %p7243_p5 = scmp.ne.s32.totalorder %s60_s12, %s7242_s18  ;;  %p7248_p7 = scmp.lt.s32.totalorder %s7242_s18, %s7242_s18 }
  0x14   :  { %p7249_p8 = por %p7248_p7, %p7247_p6 }
  0x16   :  { %p7250_p9 = pnand %p7249_p8, %p7243_p5 }
  0x18   :  { %7253 = shalt.err (!%p7250_p9)
}
  0x19   :  { %65 = dma.hbm_to_vmem [thread:$0]  %s7640_s3, 36864, %s60_s12, [#allocation9], %s7428_s14, %s7428_s14, %s7429_s15  }
  0x1a   :  { %s7430_s21 = smov [#allocation11]  }
  0x1b   :  { %s81_s22 = sshll.u32 %s7430_s21, 4  ;;  %s82_s22 = int_to_ptr.vmem [resolvable:$true] %s81_s22 }
  0x1c   :  { %s7262_s23 = scalar_lea.vmem %s82_s22, 12288  ;;  %p7267_p11 = scmp.lt.s32.totalorder %s82_s22, %s82_s22 }
  0x1d   :  { %p7263_p10 = scmp.ne.s32.totalorder %s82_s22, %s7262_s23  ;;  %p7268_p12 = scmp.lt.s32.totalorder %s7262_s23, %s7262_s23 }
  0x1f   :  { %p7269_p13 = por %p7268_p12, %p7267_p11 }
  0x21   :  { %p7270_p0 = pnand %p7269_p13, %p7263_p10 }
  0x23   :  { %7273 = shalt.err (!%p7270_p0)
}
  0x24   :  { %s7431_s1 = smov 128   ;;  %s7432_s24 = smov 8  }
  0x25   :  { %87 = dma.hbm_to_vmem [thread:$0]  %s7642_s5, 12288, %s82_s22, [#allocation12], %s7431_s1, %s7431_s1, %s7432_s24  }
  0x26   :  { %s7433_s3 = smov [#allocation14]  }
  0x27   :  { %s103_s27 = sshll.u32 %s7433_s3, 4  ;;  %s104_s27 = int_to_ptr.vmem [resolvable:$true] %s103_s27 }
  0x28   :  { %s7282_s28 = scalar_lea.vmem %s104_s27, 2048  ;;  %p7287_p2 = scmp.lt.s32.totalorder %s104_s27, %s104_s27 }
  0x29   :  { %p7283_p1 = scmp.ne.s32.totalorder %s104_s27, %s7282_s28  ;;  %p7288_p3 = scmp.lt.s32.totalorder %s7282_s28, %s7282_s28 }
  0x2b   :  { %p7289_p4 = por %p7288_p3, %p7287_p2 }
  0x2d   :  { %p7290_p5 = pnand %p7289_p4, %p7283_p1 }
  0x2f   :  { %7293 = shalt.err (!%p7290_p5)
}
  0x30   :  { %s7434_s29 = smov 64   ;;  %s7435_s30 = smov 4  }
  0x31   :  { %109 = dma.hbm_to_vmem [thread:$0]  %s7644_s7, 2048, %s104_s27, [#allocation15], %s7434_s29, %s7434_s29, %s7435_s30  }
  0x32   :  { %s7436_s12 = smov [#allocation2]   ;;  %s7437_s16 = smov [#allocation7]  }
  0x33   :  { %s25_s13 = sshll.u32 %s7436_s12, 4  ;;  %s50_s5 = sshll.u32 %s7437_s16, 4  ;;  %s26_s13 = int_to_ptr.vmem [resolvable:$true] %s25_s13  ;;  %s51_s5 = int_to_ptr.vmem [resolvable:$true] %s50_s5 }
  0x34   :  { %s7302_s17 = scalar_lea.vmem %s26_s13, 768  ;;  %p7307_p7 = scmp.lt.s32.totalorder %s26_s13, %s26_s13 }
  0x35   :  { %p7303_p6 = scmp.ne.s32.totalorder %s26_s13, %s7302_s17  ;;  %p7308_p8 = scmp.lt.s32.totalorder %s7302_s17, %s7302_s17 }
  0x37   :  { %p7309_p9 = por %p7308_p8, %p7307_p7 }
  0x39   :  { %p7310_p10 = pnand %p7309_p9, %p7303_p6 }
  0x3b   :  { %7313 = shalt.err (!%p7310_p10)
}
  0x3c   :  { %31 = dma.hbm_to_vmem [thread:$0]  %s7637_s0, 768, %s26_s13, [#allocation3], %s7428_s14, %s7428_s14, %s7429_s15  }
  0x3d   :  { %s7322_s7 = scalar_lea.vmem %s51_s5, 96  ;;  %p7327_p12 = scmp.lt.s32.totalorder %s51_s5, %s51_s5 }
  0x3e   :  { %p7323_p11 = scmp.ne.s32.totalorder %s51_s5, %s7322_s7  ;;  %p7328_p13 = scmp.lt.s32.totalorder %s7322_s7, %s7322_s7 }
  0x40   :  { %p7329_p0 = por %p7328_p13, %p7327_p12 }
  0x42   :  { %p7330_p1 = pnand %p7329_p0, %p7323_p11 }
  0x44   :  { %7333 = shalt.err (!%p7330_p1)
}
  0x45   :  { %53 = dma.hbm_to_vmem [thread:$0]  %s7639_s2, 96, %s51_s5, [#allocation6]  }
  0x46   :  { %s7438_s22 = smov [#allocation10]   ;;  %s7439_s25 = smov [#allocation13]  }
  0x47   :  { %s72_s23 = sshll.u32 %s7438_s22, 4  ;;  %s94_s26 = sshll.u32 %s7439_s25, 4  ;;  %s73_s23 = int_to_ptr.vmem [resolvable:$true] %s72_s23  ;;  %s95_s26 = int_to_ptr.vmem [resolvable:$true] %s94_s26 }
  0x48   :  { %s7342_s3 = scalar_lea.vmem %s73_s23, 96  ;;  %p7347_p3 = scmp.lt.s32.totalorder %s73_s23, %s73_s23 }
  0x49   :  { %p7343_p2 = scmp.ne.s32.totalorder %s73_s23, %s7342_s3  ;;  %p7348_p4 = scmp.lt.s32.totalorder %s7342_s3, %s7342_s3 }
  0x4b   :  { %p7349_p5 = por %p7348_p4, %p7347_p3 }
  0x4d   :  { %p7350_p6 = pnand %p7349_p5, %p7343_p2 }
  0x4f   :  { %7353 = shalt.err (!%p7350_p6)
}
  0x50   :  { %75 = dma.hbm_to_vmem [thread:$0]  %s7641_s4, 96, %s73_s23, [#allocation9]  }
  0x51   :  { %s7362_s15 = scalar_lea.vmem %s95_s26, 32  ;;  %p7367_p8 = scmp.lt.s32.totalorder %s95_s26, %s95_s26 }
  0x52   :  { %p7363_p7 = scmp.ne.s32.totalorder %s95_s26, %s7362_s15  ;;  %p7368_p9 = scmp.lt.s32.totalorder %s7362_s15, %s7362_s15 }
  0x54   :  { %p7369_p10 = por %p7368_p9, %p7367_p8 }
  0x56   :  { %p7370_p11 = pnand %p7369_p10, %p7363_p7 }
  0x58   :  { %7373 = shalt.err (!%p7370_p11)
}
  0x59   :  { %97 = dma.hbm_to_vmem [thread:$0]  %s7643_s6, 32, %s95_s26, [#allocation12]  }
  0x5a   :  { %s7440_s28 = smov [#allocation16]  }
  0x5b   :  { %s116_s29 = sshll.u32 %s7440_s28, 4  ;;  %s117_s29 = int_to_ptr.vmem [resolvable:$true] %s116_s29 }
  0x5c   :  { %s7382_s30 = scalar_lea.vmem %s117_s29, 16  ;;  %s7386_s10 = scalar_lea.vmem %s117_s29, 32 }
  0x5d   :  { %p7383_p12 = scmp.ne.s32.totalorder %s117_s29, %s7382_s30  ;;  %p7387_p13 = scmp.lt.s32.totalorder %s117_s29, %s117_s29 }
  0x5e   :  { %p7388_p0 = scmp.lt.s32.totalorder %s7386_s10, %s7382_s30 }
  0x60   :  { %p7389_p1 = por %p7388_p0, %p7387_p13 }
  0x62   :  { %p7390_p2 = pnand %p7389_p1, %p7383_p12 }
  0x64   :  { %7393 = shalt.err (!%p7390_p2)
}
  0x65   :  { %119 = dma.hbm_to_vmem [thread:$0]  %s7645_s8, 16, %s117_s29, [#allocation15]  }
  0x66   :  { %7414 = dma.done.wait [#allocation3], 768  }
  0x67   :  { %7415 = vsyncadd [#allocation3], 4294966528 }
  0x68   :  { %7416 = dma.done.wait [#allocation6], 36960  }
  0x69   :  { %7417 = vsyncadd [#allocation6], 4294930336 }
  0x6a   :  { %7418 = dma.done.wait [#allocation9], 36960  }
  0x6b   :  { %7419 = vsyncadd [#allocation9], 4294930336 }
  0x6c   :  { %7420 = dma.done.wait [#allocation12], 12320  }
  0x6d   :  { %7421 = vsyncadd [#allocation12], 4294954976 }
  0x6e   :  { %7422 = dma.done.wait [#allocation15], 2064  }
  0x6f   :  { %7423 = vsyncadd [#allocation15], 4294965232  ;;  %v6163_v0 = vld [vmem:[#allocation5 + $0x154] ss:$24 sps:$4 sm:$0xff]   ;;  %v6165_v1 = vld [vmem:[#allocation5 + $0x150] ss:$24 sps:$4 sm:$0xff]  }
  0x70   :  { %1944 = vmatprep.subr.bf16.mxu0 %v6163_v0  ;;  %v6166_v2 = vld [vmem:[#allocation5 + $0x454] ss:$24 sps:$4 sm:$0xff]   ;;  %v6168_v3 = vld [vmem:[#allocation5 + $0x450] ss:$24 sps:$4 sm:$0xff]   ;;  %v6169_v4 = vld [vmem:[#allocation5 + $0x124] ss:$24 sps:$4 sm:$0xff]  }
  0x71   :  { %1945 = vmatpush1.bf16.msra.mxu0 %v6165_v1  ;;  %v6171_v5 = vld [vmem:[#allocation5 + $0x120] ss:$24 sps:$4 sm:$0xff]   ;;  %1987 = vmatprep.subr.bf16.mxu1 %v6166_v2  ;;  %v6172_v6 = vld [vmem:[#allocation5 + $0x424] ss:$24 sps:$4 sm:$0xff]   ;;  %v6175_v8 = vld [vmem:[#allocation5 + $0xf4] ss:$24 sps:$4 sm:$0xff]  }
  0x72   :  { %1988 = vmatpush1.bf16.msra.mxu1 %v6168_v3  ;;  %1946 = vmatprep.subr.bf16.mxu0 %v6169_v4  ;;  %v6174_v7 = vld [vmem:[#allocation5 + $0x420] ss:$24 sps:$4 sm:$0xff]   ;;  %v6177_v9 = vld [vmem:[#allocation5 + $0xf0] ss:$24 sps:$4 sm:$0xff]   ;;  %v6178_v10 = vld [vmem:[#allocation5 + $0x3f4] ss:$24 sps:$4 sm:$0xff]  }
  0x73   :  { %1989 = vmatprep.subr.bf16.mxu1 %v6172_v6  ;;  %v6181_v11 = vld [vmem:[#allocation5 + $0xc4] ss:$24 sps:$4 sm:$0xff]   ;;  %v6180_v12 = vld [vmem:[#allocation5 + $0x3f0] ss:$24 sps:$4 sm:$0xff]   ;;  %v6183_v14 = vld [vmem:[#allocation5 + $0xc0] ss:$24 sps:$4 sm:$0xff]  }
  0x74   :  { %v6184_v13 = vld [vmem:[#allocation5 + $0x3c4] ss:$24 sps:$4 sm:$0xff]   ;;  %v6187_v15 = vld [vmem:[#allocation5 + $0x94] ss:$24 sps:$4 sm:$0xff]   ;;  %v6186_v16 = vld [vmem:[#allocation5 + $0x3c0] ss:$24 sps:$4 sm:$0xff]  }
  0x75   :  { %1947 = vmatpush1.bf16.msra.mxu0 %v6171_v5  ;;  %v6190_v17 = vld [vmem:[#allocation5 + $0x394] ss:$24 sps:$4 sm:$0xff]   ;;  %v6189_v18 = vld [vmem:[#allocation5 + $0x90] ss:$24 sps:$4 sm:$0xff]   ;;  %v6193_v19 = vld [vmem:[#allocation5 + $0x64] ss:$24 sps:$4 sm:$0xff]  }
  0x76   :  { %1948 = vmatprep.subr.bf16.mxu0 %v6175_v8  ;;  %1990 = vmatpush1.bf16.msra.mxu1 %v6174_v7  ;;  %v6192_v20 = vld [vmem:[#allocation5 + $0x390] ss:$24 sps:$4 sm:$0xff]   ;;  %v6196_v21 = vld [vmem:[#allocation5 + $0x364] ss:$24 sps:$4 sm:$0xff]   ;;  %v6195_v22 = vld [vmem:[#allocation5 + $0x60] ss:$24 sps:$4 sm:$0xff]  }
  0x77   :  { %1991 = vmatprep.subr.bf16.mxu1 %v6178_v10  ;;  %v6199_v23 = vld [vmem:[#allocation5 + $0x34] ss:$24 sps:$4 sm:$0xff]   ;;  %v6198_v24 = vld [vmem:[#allocation5 + $0x360] ss:$24 sps:$4 sm:$0xff]   ;;  %v6201_v26 = vld [vmem:[#allocation5 + $0x30] ss:$24 sps:$4 sm:$0xff]  }
  0x78   :  { %v6202_v25 = vld [vmem:[#allocation5 + $0x334] ss:$24 sps:$4 sm:$0xff]   ;;  %v6205_v27 = vld [vmem:[#allocation5 + $0x4] ss:$24 sps:$4 sm:$0xff]   ;;  %v6204_v28 = vld [vmem:[#allocation5 + $0x330] ss:$24 sps:$4 sm:$0xff]  }
  0x79   :  { %1949 = vmatpush1.bf16.msra.mxu0 %v6177_v9  ;;  %v6208_v29 = vld [vmem:[#allocation5 + $0x304] ss:$24 sps:$4 sm:$0xff]   ;;  %v6207_v30 = vld [vmem:[#allocation5] ss:$24 sps:$4 sm:$0xff]   ;;  %v6211_v31 = vld [vmem:[#allocation5 + $0x2d4] ss:$24 sps:$4 sm:$0xff]  }
  0x7a   :  { %1950 = vmatprep.subr.bf16.mxu0 %v6181_v11  ;;  %1992 = vmatpush1.bf16.msra.mxu1 %v6180_v12  ;;  %v6210_v32 = vld [vmem:[#allocation5 + $0x300] ss:$24 sps:$4 sm:$0xff]   ;;  %v6214_v33 = vld [vmem:[#allocation5 + $0x5d4] ss:$24 sps:$4 sm:$0xff]   ;;  %v6213_v34 = vld [vmem:[#allocation5 + $0x2d0] ss:$24 sps:$4 sm:$0xff]  }
  0x7b   :  { %1993 = vmatprep.subr.bf16.mxu1 %v6184_v13  ;;  %v6217_v35 = vld [vmem:[#allocation5 + $0x2a4] ss:$24 sps:$4 sm:$0xff]   ;;  %v6216_v36 = vld [vmem:[#allocation5 + $0x5d0] ss:$24 sps:$4 sm:$0xff]   ;;  %v6219_v38 = vld [vmem:[#allocation5 + $0x2a0] ss:$24 sps:$4 sm:$0xff]  }
  0x7c   :  { %v6220_v37 = vld [vmem:[#allocation5 + $0x5a4] ss:$24 sps:$4 sm:$0xff]   ;;  %v6223_v39 = vld [vmem:[#allocation5 + $0x274] ss:$24 sps:$4 sm:$0xff]   ;;  %v6222_v40 = vld [vmem:[#allocation5 + $0x5a0] ss:$24 sps:$4 sm:$0xff]  }
  0x7d   :  { %1951 = vmatpush1.bf16.msra.mxu0 %v6183_v14  ;;  %v6226_v41 = vld [vmem:[#allocation5 + $0x574] ss:$24 sps:$4 sm:$0xff]   ;;  %v6225_v42 = vld [vmem:[#allocation5 + $0x270] ss:$24 sps:$4 sm:$0xff]   ;;  %v6229_v43 = vld [vmem:[#allocation5 + $0x244] ss:$24 sps:$4 sm:$0xff]  }
  0x7e   :  { %1952 = vmatprep.subr.bf16.mxu0 %v6187_v15  ;;  %1994 = vmatpush1.bf16.msra.mxu1 %v6186_v16  ;;  %v6228_v44 = vld [vmem:[#allocation5 + $0x570] ss:$24 sps:$4 sm:$0xff]   ;;  %v6232_v45 = vld [vmem:[#allocation5 + $0x544] ss:$24 sps:$4 sm:$0xff]   ;;  %v6231_v46 = vld [vmem:[#allocation5 + $0x240] ss:$24 sps:$4 sm:$0xff]  }
  0x7f   :  { %1995 = vmatprep.subr.bf16.mxu1 %v6190_v17  ;;  %v6258_v47 = vld [vmem:[#allocation2 + $0x4] ss:$24 sps:$4 sm:$0xff]   ;;  %v6234_v49 = vld [vmem:[#allocation5 + $0x540] ss:$24 sps:$4 sm:$0xff]   ;;  %v6237_v52 = vld [vmem:[#allocation5 + $0x210] ss:$24 sps:$4 sm:$0xff]  }
  0x80   :  { %v6235_v48 = vld [vmem:[#allocation5 + $0x214] ss:$24 sps:$4 sm:$0xff]   ;;  %1976 = vmatprep.mubr.bf16.mxu0 %v6258_v47  ;;  %v6241_v53 = vld [vmem:[#allocation5 + $0x1e4] ss:$24 sps:$4 sm:$0xff]   ;;  %v6240_v54 = vld [vmem:[#allocation5 + $0x510] ss:$24 sps:$4 sm:$0xff]  }
  0x81   :  { %1953 = vmatpush1.bf16.msra.mxu0 %v6189_v18  ;;  %v6238_v50 = vld [vmem:[#allocation5 + $0x514] ss:$24 sps:$4 sm:$0xff]   ;;  %v6244_v55 = vld [vmem:[#allocation5 + $0x4e4] ss:$24 sps:$4 sm:$0xff]   ;;  %v6243_v56 = vld [vmem:[#allocation5 + $0x1e0] ss:$24 sps:$4 sm:$0xff]  }
  0x82   :  { %1954 = vmatprep.subr.bf16.mxu0 %v6193_v19  ;;  %1996 = vmatpush1.bf16.msra.mxu1 %v6192_v20  ;;  %v7531_v51 = vld [vmem:[#allocation2 + $0xc] ss:$24 sps:$4 sm:$0xff]   ;;  %v6246_v58 = vld [vmem:[#allocation5 + $0x4e0] ss:$24 sps:$4 sm:$0xff]   ;;  %v6249_v60 = vld [vmem:[#allocation5 + $0x1b0] ss:$24 sps:$4 sm:$0xff]  }
  0x83   :  { %1997 = vmatprep.subr.bf16.mxu1 %v6196_v21  ;;  %2019 = vmatprep.mubr.bf16.mxu1 %v7531_v51  ;;  %v6247_v57 = vld [vmem:[#allocation5 + $0x1b4] ss:$24 sps:$4 sm:$0xff]   ;;  %v6253_v61 = vld [vmem:[#allocation5 + $0x184] ss:$24 sps:$4 sm:$0xff]   ;;  %v6252_v62 = vld [vmem:[#allocation5 + $0x4b0] ss:$24 sps:$4 sm:$0xff]  }
  0x84   :  { %v6250_v59 = vld [vmem:[#allocation5 + $0x4b4] ss:$24 sps:$4 sm:$0xff]   ;;  %v6256_v63 = vld [vmem:[#allocation5 + $0x484] ss:$24 sps:$4 sm:$0xff]   ;;  %v6255_v0 = vld [vmem:[#allocation5 + $0x180] ss:$24 sps:$4 sm:$0xff]  }
  0x85   :  { %1955 = vmatpush1.bf16.msra.mxu0 %v6195_v22  ;;  %v6264_v1 = vld [vmem:[#allocation5 + $0x754] ss:$24 sps:$4 sm:$0xff]   ;;  %v6260_v2 = vld [vmem:[#allocation5 + $0x480] ss:$24 sps:$4 sm:$0xff]   ;;  %v7534_v3 = vld [vmem:[#allocation2] ss:$24 sps:$4 sm:$0xff]  }
  0x86   :  { %1956 = vmatprep.subr.bf16.mxu0 %v6199_v23  ;;  %1998 = vmatpush1.bf16.msra.mxu1 %v6198_v24  ;;  %v6270_v4 = vld [vmem:[#allocation5 + $0x15c] ss:$24 sps:$4 sm:$0xff]   ;;  %v6262_v5 = vld [vmem:[#allocation5 + $0x750] ss:$24 sps:$4 sm:$0xff]   ;;  %v6276_v9 = vld [vmem:[#allocation5 + $0x12c] ss:$24 sps:$4 sm:$0xff]  }
  0x87   :  { %1999 = vmatprep.subr.bf16.mxu1 %v6202_v25  ;;  %v7536_v6 = vld [vmem:[#allocation2 + $0x8] ss:$24 sps:$4 sm:$0xff]   ;;  %v6273_v7 = vld [vmem:[#allocation5 + $0x724] ss:$24 sps:$4 sm:$0xff]   ;;  %v6279_v11 = vld [vmem:[#allocation5 + $0x6f4] ss:$24 sps:$4 sm:$0xff]  }
  0x88   :  { %v6268_v8 = vld [vmem:[#allocation5 + $0x158] ss:$24 sps:$4 sm:$0xff]   ;;  %v6274_v12 = vld [vmem:[#allocation5 + $0x128] ss:$24 sps:$4 sm:$0xff]   ;;  %v6282_v13 = vld [vmem:[#allocation5 + $0xfc] ss:$24 sps:$4 sm:$0xff]  }
  0x89   :  { %1957 = vmatpush1.bf16.msra.mxu0 %v6201_v26  ;;  %v6271_v10 = vld [vmem:[#allocation5 + $0x720] ss:$24 sps:$4 sm:$0xff]   ;;  %v6277_v14 = vld [vmem:[#allocation5 + $0x6f0] ss:$24 sps:$4 sm:$0xff]   ;;  %v6285_v15 = vld [vmem:[#allocation5 + $0x6c4] ss:$24 sps:$4 sm:$0xff]  }
  0x8a   :  { %1958 = vmatprep.subr.bf16.mxu0 %v6205_v27  ;;  %2000 = vmatpush1.bf16.msra.mxu1 %v6204_v28  ;;  %v6280_v16 = vld [vmem:[#allocation5 + $0xf8] ss:$24 sps:$4 sm:$0xff]   ;;  %v6288_v17 = vld [vmem:[#allocation5 + $0xcc] ss:$24 sps:$4 sm:$0xff]   ;;  %v6286_v20 = vld [vmem:[#allocation5 + $0xc8] ss:$24 sps:$4 sm:$0xff]  }
  0x8b   :  { %2001 = vmatprep.subr.bf16.mxu1 %v6208_v29  ;;  %v6283_v18 = vld [vmem:[#allocation5 + $0x6c0] ss:$24 sps:$4 sm:$0xff]   ;;  %v6291_v19 = vld [vmem:[#allocation5 + $0x694] ss:$24 sps:$4 sm:$0xff]   ;;  %v6289_v22 = vld [vmem:[#allocation5 + $0x690] ss:$24 sps:$4 sm:$0xff]  }
  0x8c   :  { %v6294_v21 = vld [vmem:[#allocation5 + $0x9c] ss:$24 sps:$4 sm:$0xff]   ;;  %v6292_v24 = vld [vmem:[#allocation5 + $0x98] ss:$24 sps:$4 sm:$0xff]   ;;  %v6300_v25 = vld [vmem:[#allocation5 + $0x6c] ss:$24 sps:$4 sm:$0xff]  }
  0x8d   :  { %1959 = vmatpush1.bf16.msra.mxu0 %v6207_v30  ;;  %v6297_v23 = vld [vmem:[#allocation5 + $0x664] ss:$24 sps:$4 sm:$0xff]   ;;  %v6295_v26 = vld [vmem:[#allocation5 + $0x660] ss:$24 sps:$4 sm:$0xff]   ;;  %v6303_v27 = vld [vmem:[#allocation5 + $0x634] ss:$24 sps:$4 sm:$0xff]  }
  0x8e   :  { %1960 = vmatprep.subr.bf16.mxu0 %v6211_v31  ;;  %2002 = vmatpush1.bf16.msra.mxu1 %v6210_v32  ;;  %v6298_v28 = vld [vmem:[#allocation5 + $0x68] ss:$24 sps:$4 sm:$0xff]   ;;  %v6306_v29 = vld [vmem:[#allocation5 + $0x3c] ss:$24 sps:$4 sm:$0xff]   ;;  %v6304_v31 = vld [vmem:[#allocation5 + $0x38] ss:$24 sps:$4 sm:$0xff]  }
  0x8f   :  { %2003 = vmatprep.subr.bf16.mxu1 %v6214_v33  ;;  %v6301_v30 = vld [vmem:[#allocation5 + $0x630] ss:$24 sps:$4 sm:$0xff]   ;;  %v6309_v32 = vld [vmem:[#allocation5 + $0x604] ss:$24 sps:$4 sm:$0xff]   ;;  %s7441_s6 = smov [#allocation17]  }
  0x90   :  { %v7540_v33 = vld [vmem:[#allocation2 + $0x14] ss:$24 sps:$4 sm:$0xff]   ;;  %s5414_s8 = sshll.u32 %s7441_s6, 4  ;;  %s5415_s8 = int_to_ptr.vmem [resolvable:$true] %s5414_s8 }
  0x91   :  { %1961 = vmatpush2.bf16.msra.mxu0 %v6213_v34  ;;  %v6312_v34 = vld [vmem:[#allocation5 + $0xc] ss:$24 sps:$4 sm:$0xff]   ;;  %s7394_s12 = scalar_lea.vmem %s5415_s8, 256  ;;  %p7399_p4 = scmp.lt.s32.totalorder %s5415_s8, %s5415_s8 }
  0x92   :  { %1962 = vmatprep.subr.bf16.mxu0 %v6217_v35  ;;  %2004 = vmatpush2.bf16.msra.mxu1 %v6216_v36  ;;  %v6307_v35 = vld [vmem:[#allocation5 + $0x600] ss:$24 sps:$4 sm:$0xff]   ;;  %v6315_v36 = vld [vmem:[#allocation5 + $0x8d4] ss:$24 sps:$4 sm:$0xff]   ;;  %p7395_p3 = scmp.ne.s32.totalorder %s5415_s8, %s7394_s12  ;;  %p7400_p5 = scmp.lt.s32.totalorder %s7394_s12, %s7394_s12 }
  0x93   :  { %2005 = vmatprep.subr.bf16.mxu1 %v6220_v37  ;;  %v6310_v37 = vld [vmem:[#allocation5 + $0x8] ss:$24 sps:$4 sm:$0xff]  }
  0x94   :  { %p7401_p6 = por %p7400_p5, %p7399_p4 }
  0x95   :  { %1963 = vmatpush2.bf16.msra.mxu0 %v6219_v38  ;;  %v6318_v38 = vld [vmem:[#allocation5 + $0x2dc] ss:$24 sps:$4 sm:$0xff]  }
  0x96   :  { %1964 = vmatprep.subr.bf16.mxu0 %v6223_v39  ;;  %2006 = vmatpush2.bf16.msra.mxu1 %v6222_v40  ;;  %v6313_v39 = vld [vmem:[#allocation5 + $0x8d0] ss:$24 sps:$4 sm:$0xff]   ;;  %v6321_v40 = vld [vmem:[#allocation5 + $0x8a4] ss:$24 sps:$4 sm:$0xff]   ;;  %p7402_p7 = pnand %p7401_p6, %p7395_p3 }
  0x97   :  { %2007 = vmatprep.subr.bf16.mxu1 %v6226_v41  ;;  %v6316_v41 = vld [vmem:[#allocation5 + $0x2d8] ss:$24 sps:$4 sm:$0xff]  }
  0x99   :  { %1965 = vmatpush2.bf16.msra.mxu0 %v6225_v42  ;;  %v6324_v42 = vld [vmem:[#allocation5 + $0x2ac] ss:$24 sps:$4 sm:$0xff]  }
  0x9a   :  { %1966 = vmatprep.subr.bf16.mxu0 %v6229_v43  ;;  %2008 = vmatpush2.bf16.msra.mxu1 %v6228_v44  ;;  %v6319_v43 = vld [vmem:[#allocation5 + $0x8a0] ss:$24 sps:$4 sm:$0xff]   ;;  %v6327_v44 = vld [vmem:[#allocation5 + $0x874] ss:$24 sps:$4 sm:$0xff]  }
  0x9b   :  { %2009 = vmatprep.subr.bf16.mxu1 %v6232_v45  ;;  %v6322_v45 = vld [vmem:[#allocation5 + $0x2a8] ss:$24 sps:$4 sm:$0xff]  }
  0x9d   :  { %1967 = vmatpush2.bf16.msra.mxu0 %v6231_v46  ;;  %v6330_v46 = vld [vmem:[#allocation5 + $0x27c] ss:$24 sps:$4 sm:$0xff]  }
  0x9e   :  { %1968 = vmatprep.subr.bf16.mxu0 %v6235_v48  ;;  %2010 = vmatpush2.bf16.msra.mxu1 %v6234_v49  ;;  %v6333_v48 = vld [vmem:[#allocation5 + $0x844] ss:$24 sps:$4 sm:$0xff]   ;;  %v6328_v49 = vld [vmem:[#allocation5 + $0x278] ss:$24 sps:$4 sm:$0xff]  }
  0x9f   :  { %2011 = vmatprep.subr.bf16.mxu1 %v6238_v50  ;;  %v6336_v50 = vld [vmem:[#allocation5 + $0x24c] ss:$24 sps:$4 sm:$0xff]  }
  0xa1   :  { %1969 = vmatpush2.bf16.msra.mxu0 %v6237_v52  ;;  %v6331_v52 = vld [vmem:[#allocation5 + $0x840] ss:$24 sps:$4 sm:$0xff]  }
  0xa2   :  { %1970 = vmatprep.subr.bf16.mxu0 %v6241_v53  ;;  %2012 = vmatpush2.bf16.msra.mxu1 %v6240_v54  ;;  %v6339_v53 = vld [vmem:[#allocation5 + $0x814] ss:$24 sps:$4 sm:$0xff]   ;;  %v6334_v54 = vld [vmem:[#allocation5 + $0x248] ss:$24 sps:$4 sm:$0xff]  }
  0xa3   :  { %2013 = vmatprep.subr.bf16.mxu1 %v6244_v55  ;;  %v6342_v55 = vld [vmem:[#allocation5 + $0x21c] ss:$24 sps:$4 sm:$0xff]  }
  0xa5   :  { %1971 = vmatpush2.bf16.msra.mxu0 %v6243_v56  ;;  %v6337_v56 = vld [vmem:[#allocation5 + $0x810] ss:$24 sps:$4 sm:$0xff]  }
  0xa6   :  { %1972 = vmatprep.subr.bf16.mxu0 %v6247_v57  ;;  %2014 = vmatpush2.bf16.msra.mxu1 %v6246_v58  ;;  %v6345_v57 = vld [vmem:[#allocation5 + $0x7e4] ss:$24 sps:$4 sm:$0xff]   ;;  %v6340_v58 = vld [vmem:[#allocation5 + $0x218] ss:$24 sps:$4 sm:$0xff]  }
  0xa7   :  { %2015 = vmatprep.subr.bf16.mxu1 %v6250_v59  ;;  %v6348_v59 = vld [vmem:[#allocation5 + $0x1ec] ss:$24 sps:$4 sm:$0xff]  }
  0xa9   :  { %1973 = vmatpush2.bf16.msra.mxu0 %v6249_v60  ;;  %v6343_v60 = vld [vmem:[#allocation5 + $0x7e0] ss:$24 sps:$4 sm:$0xff]  }
  0xaa   :  { %1974 = vmatprep.subr.bf16.mxu0 %v6253_v61  ;;  %2016 = vmatpush2.bf16.msra.mxu1 %v6252_v62  ;;  %v6351_v61 = vld [vmem:[#allocation5 + $0x7b4] ss:$24 sps:$4 sm:$0xff]   ;;  %v6346_v62 = vld [vmem:[#allocation5 + $0x1e8] ss:$24 sps:$4 sm:$0xff]  }
  0xab   :  { %2017 = vmatprep.subr.bf16.mxu1 %v6256_v63  ;;  %v6354_v63 = vld [vmem:[#allocation5 + $0x1bc] ss:$24 sps:$4 sm:$0xff]  }
  0xad   :  { %1975 = vmatpush2.bf16.msra.mxu0 %v6255_v0  ;;  %v6349_v0 = vld [vmem:[#allocation5 + $0x7b0] ss:$24 sps:$4 sm:$0xff]  }
  0xae   :  { %2030 = vmatprep.subr.bf16.mxu0 %v6264_v1  ;;  %2018 = vmatpush2.bf16.msra.mxu1 %v6260_v2  ;;  %v6357_v1 = vld [vmem:[#allocation5 + $0x784] ss:$24 sps:$4 sm:$0xff]   ;;  %v6352_v2 = vld [vmem:[#allocation5 + $0x1b8] ss:$24 sps:$4 sm:$0xff]  }
  0xaf   :  { %2073 = vmatprep.subr.bf16.mxu1 %v6270_v4  ;;  %v6360_v4 = vld [vmem:[#allocation5 + $0x18c] ss:$24 sps:$4 sm:$0xff]  }
  0xb0   :  { %1977 = vmatmul.mubr.bf16.vlgmr.msra.gmra.mxu0 %v7534_v3 }
  0xb1   :  { %2031 = vmatpush1.bf16.msra.mxu0 %v6262_v5  ;;  %2020 = vmatmul.mubr.bf16.vlgmr.msra.gmra.mxu1 %v7536_v6  ;;  %v6355_v5 = vld [vmem:[#allocation5 + $0x780] ss:$24 sps:$4 sm:$0xff]  }
  0xb2   :  { %2032 = vmatprep.subr.bf16.mxu0 %v6273_v7  ;;  %2074 = vmatpush1.bf16.msra.mxu1 %v6268_v8  ;;  %v6366_v7 = vld [vmem:[#allocation5 + $0x45c] ss:$24 sps:$4 sm:$0xff]   ;;  %v6358_v8 = vld [vmem:[#allocation5 + $0x188] ss:$24 sps:$4 sm:$0xff]  }
  0xb3   :  { %2105 = vmatprep.mubr.bf16.mxu1 %v6258_v47  ;;  %2075 = vmatprep.subr.bf16.mxu1 %v6276_v9  ;;  %v6325_v47 = vld [vmem:[#allocation5 + $0x870] ss:$24 sps:$4 sm:$0xff]   ;;  %v7543_v9 = vld [vmem:[#allocation2 + $0x10] ss:$24 sps:$4 sm:$0xff]  }
  0xb4   :  { %2062 = vmatprep.mubr.bf16.mxu0 %v7540_v33 }
  0xb5   :  { %2033 = vmatpush1.bf16.msra.mxu0 %v6271_v10  ;;  %v6369_v10 = vld [vmem:[#allocation5 + $0x75c] ss:$24 sps:$4 sm:$0xff]  }
  0xb6   :  { %2034 = vmatprep.subr.bf16.mxu0 %v6279_v11  ;;  %2076 = vmatpush1.bf16.msra.mxu1 %v6274_v12  ;;  %v6364_v11 = vld [vmem:[#allocation5 + $0x458] ss:$24 sps:$4 sm:$0xff]   ;;  %v6372_v12 = vld [vmem:[#allocation5 + $0x42c] ss:$24 sps:$4 sm:$0xff]  }
  0xb7   :  { %2077 = vmatprep.subr.bf16.mxu1 %v6282_v13  ;;  %v6367_v13 = vld [vmem:[#allocation5 + $0x758] ss:$24 sps:$4 sm:$0xff]  }
  0xb9   :  { %2035 = vmatpush1.bf16.msra.mxu0 %v6277_v14  ;;  %v6375_v14 = vld [vmem:[#allocation5 + $0x72c] ss:$24 sps:$4 sm:$0xff]  }
  0xba   :  { %2036 = vmatprep.subr.bf16.mxu0 %v6285_v15  ;;  %2078 = vmatpush1.bf16.msra.mxu1 %v6280_v16  ;;  %v6370_v15 = vld [vmem:[#allocation5 + $0x428] ss:$24 sps:$4 sm:$0xff]   ;;  %v6378_v16 = vld [vmem:[#allocation5 + $0x3fc] ss:$24 sps:$4 sm:$0xff]  }
  0xbb   :  { %2079 = vmatprep.subr.bf16.mxu1 %v6288_v17  ;;  %v6373_v17 = vld [vmem:[#allocation5 + $0x728] ss:$24 sps:$4 sm:$0xff]  }
  0xbd   :  { %2037 = vmatpush1.bf16.msra.mxu0 %v6283_v18  ;;  %v6381_v18 = vld [vmem:[#allocation5 + $0x6fc] ss:$24 sps:$4 sm:$0xff]  }
  0xbe   :  { %2038 = vmatprep.subr.bf16.mxu0 %v6291_v19  ;;  %2080 = vmatpush1.bf16.msra.mxu1 %v6286_v20  ;;  %v6376_v19 = vld [vmem:[#allocation5 + $0x3f8] ss:$24 sps:$4 sm:$0xff]   ;;  %v6384_v20 = vld [vmem:[#allocation5 + $0x3cc] ss:$24 sps:$4 sm:$0xff]  }
  0xbf   :  { %2081 = vmatprep.subr.bf16.mxu1 %v6294_v21  ;;  %v6379_v21 = vld [vmem:[#allocation5 + $0x6f8] ss:$24 sps:$4 sm:$0xff]  }
  0xc1   :  { %2039 = vmatpush1.bf16.msra.mxu0 %v6289_v22  ;;  %v6387_v22 = vld [vmem:[#allocation5 + $0x6cc] ss:$24 sps:$4 sm:$0xff]  }
  0xc2   :  { %2040 = vmatprep.subr.bf16.mxu0 %v6297_v23  ;;  %2082 = vmatpush1.bf16.msra.mxu1 %v6292_v24  ;;  %v6385_v23 = vld [vmem:[#allocation5 + $0x6c8] ss:$24 sps:$4 sm:$0xff]   ;;  %v6393_v24 = vld [vmem:[#allocation5 + $0x69c] ss:$24 sps:$4 sm:$0xff]  }
  0xc3   :  { %2083 = vmatprep.subr.bf16.mxu1 %v6300_v25  ;;  %v6388_v25 = vld [vmem:[#allocation5 + $0x398] ss:$24 sps:$4 sm:$0xff]  }
  0xc5   :  { %2041 = vmatpush1.bf16.msra.mxu0 %v6295_v26  ;;  %v6396_v26 = vld [vmem:[#allocation5 + $0x36c] ss:$24 sps:$4 sm:$0xff]  }
  0xc6   :  { %2042 = vmatprep.subr.bf16.mxu0 %v6303_v27  ;;  %2084 = vmatpush1.bf16.msra.mxu1 %v6298_v28  ;;  %v6391_v27 = vld [vmem:[#allocation5 + $0x698] ss:$24 sps:$4 sm:$0xff]   ;;  %v6399_v28 = vld [vmem:[#allocation5 + $0x66c] ss:$24 sps:$4 sm:$0xff]  }
  0xc7   :  { %2085 = vmatprep.subr.bf16.mxu1 %v6306_v29  ;;  %v6394_v29 = vld [vmem:[#allocation5 + $0x368] ss:$24 sps:$4 sm:$0xff]  }
  0xc9   :  { %2043 = vmatpush1.bf16.msra.mxu0 %v6301_v30  ;;  %v6402_v30 = vld [vmem:[#allocation5 + $0x33c] ss:$24 sps:$4 sm:$0xff]  }
  0xca   :  { %2044 = vmatprep.subr.bf16.mxu0 %v6309_v32  ;;  %2086 = vmatpush1.bf16.msra.mxu1 %v6304_v31  ;;  %v6397_v31 = vld [vmem:[#allocation5 + $0x668] ss:$24 sps:$4 sm:$0xff]   ;;  %v6405_v32 = vld [vmem:[#allocation5 + $0x63c] ss:$24 sps:$4 sm:$0xff]  }
  0xcb   :  { %2087 = vmatprep.subr.bf16.mxu1 %v6312_v34  ;;  %v6408_v34 = vld [vmem:[#allocation5 + $0x30c] ss:$24 sps:$4 sm:$0xff]  }
  0xcd   :  { %2045 = vmatpush1.bf16.msra.mxu0 %v6307_v35  ;;  %v6403_v35 = vld [vmem:[#allocation5 + $0x638] ss:$24 sps:$4 sm:$0xff]  }
  0xce   :  { %2046 = vmatprep.subr.bf16.mxu0 %v6315_v36  ;;  %2088 = vmatpush1.bf16.msra.mxu1 %v6310_v37  ;;  %v6411_v36 = vld [vmem:[#allocation5 + $0x60c] ss:$24 sps:$4 sm:$0xff]   ;;  %v6406_v37 = vld [vmem:[#allocation5 + $0x308] ss:$24 sps:$4 sm:$0xff]  }
  0xcf   :  { %2089 = vmatprep.subr.bf16.mxu1 %v6318_v38  ;;  %v6414_v38 = vld [vmem:[#allocation5 + $0x5dc] ss:$24 sps:$4 sm:$0xff]  }
  0xd1   :  { %2047 = vmatpush2.bf16.msra.mxu0 %v6313_v39  ;;  %v6409_v39 = vld [vmem:[#allocation5 + $0x608] ss:$24 sps:$4 sm:$0xff]  }
  0xd2   :  { %2048 = vmatprep.subr.bf16.mxu0 %v6321_v40  ;;  %2090 = vmatpush2.bf16.msra.mxu1 %v6316_v41  ;;  %v6417_v40 = vld [vmem:[#allocation5 + $0x8dc] ss:$24 sps:$4 sm:$0xff]   ;;  %v6412_v41 = vld [vmem:[#allocation5 + $0x5d8] ss:$24 sps:$4 sm:$0xff]  }
  0xd3   :  { %2091 = vmatprep.subr.bf16.mxu1 %v6324_v42  ;;  %v6420_v42 = vld [vmem:[#allocation5 + $0x5ac] ss:$24 sps:$4 sm:$0xff]  }
  0xd5   :  { %2049 = vmatpush2.bf16.msra.mxu0 %v6319_v43  ;;  %v6415_v43 = vld [vmem:[#allocation5 + $0x8d8] ss:$24 sps:$4 sm:$0xff]  }
  0xd6   :  { %2050 = vmatprep.subr.bf16.mxu0 %v6327_v44  ;;  %2092 = vmatpush2.bf16.msra.mxu1 %v6322_v45  ;;  %v6423_v44 = vld [vmem:[#allocation5 + $0x8ac] ss:$24 sps:$4 sm:$0xff]   ;;  %v6418_v45 = vld [vmem:[#allocation5 + $0x5a8] ss:$24 sps:$4 sm:$0xff]  }
  0xd7   :  { %2093 = vmatprep.subr.bf16.mxu1 %v6330_v46  ;;  %v6426_v46 = vld [vmem:[#allocation5 + $0x57c] ss:$24 sps:$4 sm:$0xff]  }
  0xd9   :  { %2051 = vmatpush2.bf16.msra.mxu0 %v6325_v47  ;;  %v6421_v47 = vld [vmem:[#allocation5 + $0x8a8] ss:$24 sps:$4 sm:$0xff]  }
  0xda   :  { %2052 = vmatprep.subr.bf16.mxu0 %v6333_v48  ;;  %2094 = vmatpush2.bf16.msra.mxu1 %v6328_v49  ;;  %v6429_v48 = vld [vmem:[#allocation5 + $0x87c] ss:$24 sps:$4 sm:$0xff]   ;;  %v6424_v49 = vld [vmem:[#allocation5 + $0x578] ss:$24 sps:$4 sm:$0xff]  }
  0xdb   :  { %2095 = vmatprep.subr.bf16.mxu1 %v6336_v50  ;;  %v6432_v50 = vld [vmem:[#allocation5 + $0x54c] ss:$24 sps:$4 sm:$0xff]  }
  0xdd   :  { %2053 = vmatpush2.bf16.msra.mxu0 %v6331_v52  ;;  %v6427_v52 = vld [vmem:[#allocation5 + $0x878] ss:$24 sps:$4 sm:$0xff]  }
  0xde   :  { %2054 = vmatprep.subr.bf16.mxu0 %v6339_v53  ;;  %2096 = vmatpush2.bf16.msra.mxu1 %v6334_v54  ;;  %v6435_v53 = vld [vmem:[#allocation5 + $0x84c] ss:$24 sps:$4 sm:$0xff]   ;;  %v6430_v54 = vld [vmem:[#allocation5 + $0x548] ss:$24 sps:$4 sm:$0xff]  }
  0xdf   :  { %2097 = vmatprep.subr.bf16.mxu1 %v6342_v55  ;;  %v6438_v55 = vld [vmem:[#allocation5 + $0x51c] ss:$24 sps:$4 sm:$0xff]  }
  0xe1   :  { %2055 = vmatpush2.bf16.msra.mxu0 %v6337_v56  ;;  %v6433_v56 = vld [vmem:[#allocation5 + $0x848] ss:$24 sps:$4 sm:$0xff]  }
  0xe2   :  { %2056 = vmatprep.subr.bf16.mxu0 %v6345_v57  ;;  %2098 = vmatpush2.bf16.msra.mxu1 %v6340_v58  ;;  %v6441_v57 = vld [vmem:[#allocation5 + $0x81c] ss:$24 sps:$4 sm:$0xff]   ;;  %v6436_v58 = vld [vmem:[#allocation5 + $0x518] ss:$24 sps:$4 sm:$0xff]  }
  0xe3   :  { %2099 = vmatprep.subr.bf16.mxu1 %v6348_v59  ;;  %v6444_v59 = vld [vmem:[#allocation5 + $0x4ec] ss:$24 sps:$4 sm:$0xff]  }
  0xe5   :  { %2057 = vmatpush2.bf16.msra.mxu0 %v6343_v60  ;;  %v6439_v60 = vld [vmem:[#allocation5 + $0x818] ss:$24 sps:$4 sm:$0xff]  }
  0xe6   :  { %2058 = vmatprep.subr.bf16.mxu0 %v6351_v61  ;;  %2100 = vmatpush2.bf16.msra.mxu1 %v6346_v62  ;;  %v6447_v61 = vld [vmem:[#allocation5 + $0x7ec] ss:$24 sps:$4 sm:$0xff]   ;;  %v6442_v62 = vld [vmem:[#allocation5 + $0x4e8] ss:$24 sps:$4 sm:$0xff]  }
  0xe7   :  { %2101 = vmatprep.subr.bf16.mxu1 %v6354_v63  ;;  %v6450_v63 = vld [vmem:[#allocation5 + $0x4bc] ss:$24 sps:$4 sm:$0xff]  }
  0xe9   :  { %2059 = vmatpush2.bf16.msra.mxu0 %v6349_v0  ;;  %v6445_v0 = vld [vmem:[#allocation5 + $0x7e8] ss:$24 sps:$4 sm:$0xff]  }
  0xea   :  { %2060 = vmatprep.subr.bf16.mxu0 %v6357_v1  ;;  %2102 = vmatpush2.bf16.msra.mxu1 %v6352_v2  ;;  %v6453_v1 = vld [vmem:[#allocation5 + $0x7bc] ss:$24 sps:$4 sm:$0xff]   ;;  %v6448_v2 = vld [vmem:[#allocation5 + $0x4b8] ss:$24 sps:$4 sm:$0xff]  }
  0xeb   :  { %2103 = vmatprep.subr.bf16.mxu1 %v6360_v4  ;;  %v6456_v4 = vld [vmem:[#allocation5 + $0x48c] ss:$24 sps:$4 sm:$0xff]  }
  0xed   :  { %2061 = vmatpush2.bf16.msra.mxu0 %v6355_v5  ;;  %v6451_v5 = vld [vmem:[#allocation5 + $0x7b8] ss:$24 sps:$4 sm:$0xff]  }
  0xee   :  { %2116 = vmatprep.subr.bf16.mxu0 %v6366_v7  ;;  %2104 = vmatpush2.bf16.msra.mxu1 %v6358_v8  ;;  %v6459_v7 = vld [vmem:[#allocation5 + $0x78c] ss:$24 sps:$4 sm:$0xff]   ;;  %v6454_v8 = vld [vmem:[#allocation5 + $0x488] ss:$24 sps:$4 sm:$0xff]  }
  0xef   :  { %2159 = vmatprep.subr.bf16.mxu1 %v6369_v10  ;;  %v6462_v10 = vld [vmem:[#allocation5 + $0x164] ss:$24 sps:$4 sm:$0xff]  }
  0xf0   :  { %2063 = vmatmul.mubr.bf16.vlgmr.msra.gmra.mxu0 %v7543_v9 }
  0xf1   :  { %2117 = vmatpush1.bf16.msra.mxu0 %v6364_v11  ;;  %2148 = vmatprep.mubr.bf16.mxu0 %v7531_v51  ;;  %v6382_v51 = vld [vmem:[#allocation5 + $0x3c8] ss:$24 sps:$4 sm:$0xff]  }
  0xf2   :  { %2106 = vmatmul.mubr.bf16.vlgmr.msra.gmra.mxu1 %v7534_v3  ;;  %2118 = vmatprep.subr.bf16.mxu0 %v6372_v12  ;;  %v6390_v3 = vld [vmem:[#allocation5 + $0x39c] ss:$24 sps:$4 sm:$0xff]   ;;  %v6457_v11 = vld [vmem:[#allocation5 + $0x788] ss:$24 sps:$4 sm:$0xff]  }
  0xf3   :  { %2160 = vmatpush1.bf16.msra.mxu1 %v6367_v13  ;;  %2191 = vmatprep.mubr.bf16.mxu1 %v7540_v33  ;;  %v6400_v33 = vld [vmem:[#allocation5 + $0x338] ss:$24 sps:$4 sm:$0xff]   ;;  %v6465_v12 = vld [vmem:[#allocation5 + $0x464] ss:$24 sps:$4 sm:$0xff]  }
  0xf4   :  { %2161 = vmatprep.subr.bf16.mxu1 %v6375_v14  ;;  %v6460_v13 = vld [vmem:[#allocation5 + $0x160] ss:$24 sps:$4 sm:$0xff]   ;;  %v6468_v14 = vld [vmem:[#allocation5 + $0x134] ss:$24 sps:$4 sm:$0xff]  }
  0xf5   :  { %2119 = vmatpush1.bf16.msra.mxu0 %v6370_v15  ;;  %v6463_v15 = vld [vmem:[#allocation5 + $0x460] ss:$24 sps:$4 sm:$0xff]  }
  0xf6   :  { %2120 = vmatprep.subr.bf16.mxu0 %v6378_v16  ;;  %v6471_v16 = vld [vmem:[#allocation5 + $0x434] ss:$24 sps:$4 sm:$0xff]  }
  0xf7   :  { %2162 = vmatpush1.bf16.msra.mxu1 %v6373_v17  ;;  %v6466_v17 = vld [vmem:[#allocation5 + $0x130] ss:$24 sps:$4 sm:$0xff]  }
  0xf8   :  { %2163 = vmatprep.subr.bf16.mxu1 %v6381_v18  ;;  %v7208_v18 = vld [vmem:[#allocation2 + $0x4] ss:$24 sps:$4 sm:$0xff]  }
  0xf9   :  { %2121 = vmatpush1.bf16.msra.mxu0 %v6376_v19  ;;  %v6474_v19 = vld [vmem:[#allocation5 + $0x104] ss:$24 sps:$4 sm:$0xff]  }
  0xfa   :  { %2122 = vmatprep.subr.bf16.mxu0 %v6384_v20  ;;  %v6469_v20 = vld [vmem:[#allocation5 + $0x430] ss:$24 sps:$4 sm:$0xff]  }
  0xfb   :  { %2164 = vmatpush1.bf16.msra.mxu1 %v6379_v21  ;;  %v7209_v21 = vld [vmem:[#allocation2 + $0xc] ss:$24 sps:$4 sm:$0xff]  }
  0xfc   :  { %2165 = vmatprep.subr.bf16.mxu1 %v6387_v22  ;;  %v6477_v22 = vld [vmem:[#allocation5 + $0x404] ss:$24 sps:$4 sm:$0xff]  }
  0xfd   :  { %2123 = vmatpush1.bf16.msra.mxu0 %v6382_v51  ;;  %v6472_v51 = vld [vmem:[#allocation5 + $0x100] ss:$24 sps:$4 sm:$0xff]  }
  0xfe   :  { %2124 = vmatprep.subr.bf16.mxu0 %v6390_v3  ;;  %v6475_v3 = vld [vmem:[#allocation5 + $0x400] ss:$24 sps:$4 sm:$0xff]  }
  0xff   :  { %2166 = vmatpush1.bf16.msra.mxu1 %v6385_v23  ;;  %v6483_v23 = vld [vmem:[#allocation5 + $0x3d4] ss:$24 sps:$4 sm:$0xff]  }
 0x100   :  { %2167 = vmatprep.subr.bf16.mxu1 %v6393_v24  ;;  %v6478_v24 = vld [vmem:[#allocation5 + $0xd0] ss:$24 sps:$4 sm:$0xff]  }
 0x101   :  { %2125 = vmatpush1.bf16.msra.mxu0 %v6388_v25  ;;  %v6481_v25 = vld [vmem:[#allocation5 + $0x3d0] ss:$24 sps:$4 sm:$0xff]  }
 0x102   :  { %2126 = vmatprep.subr.bf16.mxu0 %v6396_v26  ;;  %v6489_v26 = vld [vmem:[#allocation5 + $0x3a4] ss:$24 sps:$4 sm:$0xff]  }
 0x103   :  { %2168 = vmatpush1.bf16.msra.mxu1 %v6391_v27  ;;  %v6484_v27 = vld [vmem:[#allocation5 + $0xa0] ss:$24 sps:$4 sm:$0xff]  }
 0x104   :  { %2169 = vmatprep.subr.bf16.mxu1 %v6399_v28  ;;  %v6492_v28 = vld [vmem:[#allocation5 + $0x74] ss:$24 sps:$4 sm:$0xff]  }
 0x105   :  { %2127 = vmatpush1.bf16.msra.mxu0 %v6394_v29  ;;  %v6487_v29 = vld [vmem:[#allocation5 + $0x3a0] ss:$24 sps:$4 sm:$0xff]  }
 0x106   :  { %2128 = vmatprep.subr.bf16.mxu0 %v6402_v30  ;;  %v6495_v30 = vld [vmem:[#allocation5 + $0x374] ss:$24 sps:$4 sm:$0xff]  }
 0x107   :  { %2170 = vmatpush1.bf16.msra.mxu1 %v6397_v31  ;;  %v6490_v31 = vld [vmem:[#allocation5 + $0x70] ss:$24 sps:$4 sm:$0xff]  }
 0x108   :  { %2171 = vmatprep.subr.bf16.mxu1 %v6405_v32  ;;  %v6498_v32 = vld [vmem:[#allocation5 + $0x44] ss:$24 sps:$4 sm:$0xff]  }
 0x109   :  { %2129 = vmatpush1.bf16.msra.mxu0 %v6400_v33  ;;  %v6493_v33 = vld [vmem:[#allocation5 + $0x370] ss:$24 sps:$4 sm:$0xff]  }
 0x10a   :  { %2130 = vmatprep.subr.bf16.mxu0 %v6408_v34  ;;  %v6496_v34 = vld [vmem:[#allocation5 + $0x40] ss:$24 sps:$4 sm:$0xff]  }
 0x10b   :  { %2172 = vmatpush1.bf16.msra.mxu1 %v6403_v35  ;;  %v6501_v35 = vld [vmem:[#allocation5 + $0x344] ss:$24 sps:$4 sm:$0xff]  }
 0x10c   :  { %2173 = vmatprep.subr.bf16.mxu1 %v6411_v36  ;;  %v6499_v36 = vld [vmem:[#allocation5 + $0x340] ss:$24 sps:$4 sm:$0xff]  }
 0x10d   :  { %2131 = vmatpush1.bf16.msra.mxu0 %v6406_v37  ;;  %v6504_v37 = vld [vmem:[#allocation5 + $0x14] ss:$24 sps:$4 sm:$0xff]  }
 0x10e   :  { %2132 = vmatprep.subr.bf16.mxu0 %v6414_v38  ;;  %v6502_v38 = vld [vmem:[#allocation5 + $0x10] ss:$24 sps:$4 sm:$0xff]  }
 0x10f   :  { %2174 = vmatpush1.bf16.msra.mxu1 %v6409_v39  ;;  %v6507_v39 = vld [vmem:[#allocation5 + $0x314] ss:$24 sps:$4 sm:$0xff]  }
 0x110   :  { %2175 = vmatprep.subr.bf16.mxu1 %v6417_v40  ;;  %v6510_v40 = vld [vmem:[#allocation5 + $0x2e4] ss:$24 sps:$4 sm:$0xff]  }
 0x111   :  { %2133 = vmatpush2.bf16.msra.mxu0 %v6412_v41  ;;  %v6505_v41 = vld [vmem:[#allocation5 + $0x310] ss:$24 sps:$4 sm:$0xff]  }
 0x112   :  { %2134 = vmatprep.subr.bf16.mxu0 %v6420_v42  ;;  %v6513_v42 = vld [vmem:[#allocation5 + $0x5e4] ss:$24 sps:$4 sm:$0xff]  }
 0x113   :  { %2176 = vmatpush2.bf16.msra.mxu1 %v6415_v43  ;;  %v6508_v43 = vld [vmem:[#allocation5 + $0x2e0] ss:$24 sps:$4 sm:$0xff]  }
 0x114   :  { %2177 = vmatprep.subr.bf16.mxu1 %v6423_v44  ;;  %v6516_v44 = vld [vmem:[#allocation5 + $0x2b4] ss:$24 sps:$4 sm:$0xff]  }
 0x115   :  { %2135 = vmatpush2.bf16.msra.mxu0 %v6418_v45  ;;  %v6511_v45 = vld [vmem:[#allocation5 + $0x5e0] ss:$24 sps:$4 sm:$0xff]  }
 0x116   :  { %2136 = vmatprep.subr.bf16.mxu0 %v6426_v46  ;;  %v6514_v46 = vld [vmem:[#allocation5 + $0x2b0] ss:$24 sps:$4 sm:$0xff]  }
 0x117   :  { %2178 = vmatpush2.bf16.msra.mxu1 %v6421_v47  ;;  %v6519_v47 = vld [vmem:[#allocation5 + $0x5b4] ss:$24 sps:$4 sm:$0xff]  }
 0x118   :  { %2179 = vmatprep.subr.bf16.mxu1 %v6429_v48  ;;  %v6517_v48 = vld [vmem:[#allocation5 + $0x5b0] ss:$24 sps:$4 sm:$0xff]  }
 0x119   :  { %2137 = vmatpush2.bf16.msra.mxu0 %v6424_v49  ;;  %v6522_v49 = vld [vmem:[#allocation5 + $0x284] ss:$24 sps:$4 sm:$0xff]  }
 0x11a   :  { %2138 = vmatprep.subr.bf16.mxu0 %v6432_v50  ;;  %v6520_v50 = vld [vmem:[#allocation5 + $0x280] ss:$24 sps:$4 sm:$0xff]  }
 0x11b   :  { %2180 = vmatpush2.bf16.msra.mxu1 %v6427_v52  ;;  %v6525_v52 = vld [vmem:[#allocation5 + $0x584] ss:$24 sps:$4 sm:$0xff]  }
 0x11c   :  { %2181 = vmatprep.subr.bf16.mxu1 %v6435_v53  ;;  %v6528_v53 = vld [vmem:[#allocation5 + $0x254] ss:$24 sps:$4 sm:$0xff]  }
 0x11d   :  { %2139 = vmatpush2.bf16.msra.mxu0 %v6430_v54  ;;  %v6523_v54 = vld [vmem:[#allocation5 + $0x580] ss:$24 sps:$4 sm:$0xff]  }
 0x11e   :  { %2140 = vmatprep.subr.bf16.mxu0 %v6438_v55  ;;  %v6531_v55 = vld [vmem:[#allocation5 + $0x554] ss:$24 sps:$4 sm:$0xff]  }
 0x11f   :  { %2182 = vmatpush2.bf16.msra.mxu1 %v6433_v56  ;;  %v6526_v56 = vld [vmem:[#allocation5 + $0x250] ss:$24 sps:$4 sm:$0xff]  }
 0x120   :  { %2183 = vmatprep.subr.bf16.mxu1 %v6441_v57  ;;  %v6534_v57 = vld [vmem:[#allocation5 + $0x224] ss:$24 sps:$4 sm:$0xff]  }
 0x121   :  { %2141 = vmatpush2.bf16.msra.mxu0 %v6436_v58  ;;  %v6529_v58 = vld [vmem:[#allocation5 + $0x550] ss:$24 sps:$4 sm:$0xff]  }
 0x122   :  { %2142 = vmatprep.subr.bf16.mxu0 %v6444_v59  ;;  %v6537_v59 = vld [vmem:[#allocation5 + $0x524] ss:$24 sps:$4 sm:$0xff]  }
 0x123   :  { %2184 = vmatpush2.bf16.msra.mxu1 %v6439_v60  ;;  %v6532_v60 = vld [vmem:[#allocation5 + $0x220] ss:$24 sps:$4 sm:$0xff]  }
 0x124   :  { %2185 = vmatprep.subr.bf16.mxu1 %v6447_v61  ;;  %v6540_v61 = vld [vmem:[#allocation5 + $0x1f4] ss:$24 sps:$4 sm:$0xff]  }
 0x125   :  { %2143 = vmatpush2.bf16.msra.mxu0 %v6442_v62  ;;  %v6535_v62 = vld [vmem:[#allocation5 + $0x520] ss:$24 sps:$4 sm:$0xff]  }
 0x126   :  { %2144 = vmatprep.subr.bf16.mxu0 %v6450_v63  ;;  %v6543_v63 = vld [vmem:[#allocation5 + $0x4f4] ss:$24 sps:$4 sm:$0xff]  }
 0x127   :  { %2186 = vmatpush2.bf16.msra.mxu1 %v6445_v0  ;;  %v6538_v0 = vld [vmem:[#allocation5 + $0x1f0] ss:$24 sps:$4 sm:$0xff]  }
 0x128   :  { %2187 = vmatprep.subr.bf16.mxu1 %v6453_v1  ;;  %v6546_v1 = vld [vmem:[#allocation5 + $0x1c4] ss:$24 sps:$4 sm:$0xff]  }
 0x129   :  { %2145 = vmatpush2.bf16.msra.mxu0 %v6448_v2  ;;  %v6541_v2 = vld [vmem:[#allocation5 + $0x4f0] ss:$24 sps:$4 sm:$0xff]  }
 0x12a   :  { %2146 = vmatprep.subr.bf16.mxu0 %v6456_v4  ;;  %v6549_v4 = vld [vmem:[#allocation5 + $0x4c4] ss:$24 sps:$4 sm:$0xff]  }
 0x12b   :  { %2188 = vmatpush2.bf16.msra.mxu1 %v6451_v5  ;;  %v6544_v5 = vld [vmem:[#allocation5 + $0x1c0] ss:$24 sps:$4 sm:$0xff]  }
 0x12c   :  { %2189 = vmatprep.subr.bf16.mxu1 %v6459_v7  ;;  %v6552_v7 = vld [vmem:[#allocation5 + $0x194] ss:$24 sps:$4 sm:$0xff]  }
 0x12d   :  { %2147 = vmatpush2.bf16.msra.mxu0 %v6454_v8  ;;  %v6547_v8 = vld [vmem:[#allocation5 + $0x4c0] ss:$24 sps:$4 sm:$0xff]  }
 0x12e   :  { %2202 = vmatprep.subr.bf16.mxu0 %v6462_v10  ;;  %v6555_v10 = vld [vmem:[#allocation5 + $0x494] ss:$24 sps:$4 sm:$0xff]  }
 0x12f   :  { %2190 = vmatpush2.bf16.msra.mxu1 %v6457_v11  ;;  %v6550_v11 = vld [vmem:[#allocation5 + $0x190] ss:$24 sps:$4 sm:$0xff]  }
 0x130   :  { %2149 = vmatmul.mubr.bf16.vlgmr.msra.gmra.mxu0 %v7536_v6  ;;  %2245 = vmatprep.subr.bf16.mxu1 %v6465_v12  ;;  %v6480_v6 = vld [vmem:[#allocation5 + $0xd4] ss:$24 sps:$4 sm:$0xff]   ;;  %v6558_v12 = vld [vmem:[#allocation5 + $0x764] ss:$24 sps:$4 sm:$0xff]  }
 0x131   :  { %2203 = vmatpush1.bf16.msra.mxu0 %v6460_v13  ;;  %2234 = vmatprep.mubr.bf16.mxu0 %v7208_v18  ;;  %v6553_v13 = vld [vmem:[#allocation5 + $0x490] ss:$24 sps:$4 sm:$0xff]  }
 0x132   :  { %2192 = vmatmul.mubr.bf16.vlgmr.msra.gmra.mxu1 %v7543_v9  ;;  %2204 = vmatprep.subr.bf16.mxu0 %v6468_v14  ;;  %v6486_v9 = vld [vmem:[#allocation5 + $0xa4] ss:$24 sps:$4 sm:$0xff]   ;;  %v6559_v18 = vld [vmem:[#allocation5 + $0x730] ss:$24 sps:$4 sm:$0xff]  }
 0x133   :  { %2246 = vmatpush1.bf16.msra.mxu1 %v6463_v15  ;;  %2277 = vmatprep.mubr.bf16.mxu1 %v7209_v21  ;;  %v6579_v14 = vld [vmem:[#allocation8 + $0x154] ss:$24 sps:$4 sm:$0xff]  }
 0x134   :  { %2247 = vmatprep.subr.bf16.mxu1 %v6471_v16  ;;  %v6556_v15 = vld [vmem:[#allocation5 + $0x760] ss:$24 sps:$4 sm:$0xff]   ;;  %v6561_v16 = vld [vmem:[#allocation5 + $0x734] ss:$24 sps:$4 sm:$0xff]   ;;  %v6564_v21 = vld [vmem:[#allocation5 + $0x704] ss:$24 sps:$4 sm:$0xff]  }
 0x135   :  { %2205 = vmatpush1.bf16.msra.mxu0 %v6466_v17  ;;  %v6577_v17 = vld [vmem:[#allocation8 + $0x150] ss:$24 sps:$4 sm:$0xff]  }
 0x136   :  { %2206 = vmatprep.subr.bf16.mxu0 %v6474_v19  ;;  %v6585_v19 = vld [vmem:[#allocation8 + $0x124] ss:$24 sps:$4 sm:$0xff]  }
 0x137   :  { %2248 = vmatpush1.bf16.msra.mxu1 %v6469_v20  ;;  %v7210_v20 = vld [vmem:[#allocation2] ss:$24 sps:$4 sm:$0xff]  }
 0x138   :  { %2249 = vmatprep.subr.bf16.mxu1 %v6477_v22  ;;  %v7211_v22 = vld [vmem:[#allocation2 + $0x14] ss:$24 sps:$4 sm:$0xff]  }
 0x139   :  { %2207 = vmatpush1.bf16.msra.mxu0 %v6472_v51  ;;  %v7212_v51 = vld [vmem:[#allocation2 + $0x8] ss:$24 sps:$4 sm:$0xff]  }
 0x13a   :  { %2208 = vmatprep.subr.bf16.mxu0 %v6480_v6  ;;  %v6583_v6 = vld [vmem:[#allocation8 + $0x120] ss:$24 sps:$4 sm:$0xff]  }
 0x13b   :  { %2250 = vmatpush1.bf16.msra.mxu1 %v6475_v3  ;;  %v6562_v3 = vld [vmem:[#allocation5 + $0x700] ss:$24 sps:$4 sm:$0xff]  }
 0x13c   :  { %2251 = vmatprep.subr.bf16.mxu1 %v6483_v23  ;;  %v6591_v23 = vld [vmem:[#allocation8 + $0xf4] ss:$24 sps:$4 sm:$0xff]  }
 0x13d   :  { %2209 = vmatpush1.bf16.msra.mxu0 %v6478_v24  ;;  %v6567_v24 = vld [vmem:[#allocation5 + $0x6d4] ss:$24 sps:$4 sm:$0xff]  }
 0x13e   :  { %2210 = vmatprep.subr.bf16.mxu0 %v6486_v9  ;;  %v6589_v9 = vld [vmem:[#allocation8 + $0xf0] ss:$24 sps:$4 sm:$0xff]  }
 0x13f   :  { %2252 = vmatpush1.bf16.msra.mxu1 %v6481_v25  ;;  %v6565_v25 = vld [vmem:[#allocation5 + $0x6d0] ss:$24 sps:$4 sm:$0xff]  }
 0x140   :  { %2253 = vmatprep.subr.bf16.mxu1 %v6489_v26  ;;  %v6597_v26 = vld [vmem:[#allocation8 + $0xc4] ss:$24 sps:$4 sm:$0xff]  }
 0x141   :  { %2211 = vmatpush1.bf16.msra.mxu0 %v6484_v27  ;;  %v6570_v27 = vld [vmem:[#allocation5 + $0x6a4] ss:$24 sps:$4 sm:$0xff]  }
 0x142   :  { %2212 = vmatprep.subr.bf16.mxu0 %v6492_v28  ;;  %v6595_v28 = vld [vmem:[#allocation8 + $0xc0] ss:$24 sps:$4 sm:$0xff]  }
 0x143   :  { %2254 = vmatpush1.bf16.msra.mxu1 %v6487_v29  ;;  %v6603_v29 = vld [vmem:[#allocation8 + $0x94] ss:$24 sps:$4 sm:$0xff]  }
 0x144   :  { %2255 = vmatprep.subr.bf16.mxu1 %v6495_v30  ;;  %v6568_v30 = vld [vmem:[#allocation5 + $0x6a0] ss:$24 sps:$4 sm:$0xff]  }
 0x145   :  { %2213 = vmatpush1.bf16.msra.mxu0 %v6490_v31  ;;  %v6573_v31 = vld [vmem:[#allocation5 + $0x674] ss:$24 sps:$4 sm:$0xff]  }
 0x146   :  { %2214 = vmatprep.subr.bf16.mxu0 %v6498_v32  ;;  %v6601_v32 = vld [vmem:[#allocation8 + $0x90] ss:$24 sps:$4 sm:$0xff]  }
 0x147   :  { %2256 = vmatpush1.bf16.msra.mxu1 %v6493_v33  ;;  %v6609_v33 = vld [vmem:[#allocation8 + $0x64] ss:$24 sps:$4 sm:$0xff]  }
 0x148   :  { %2257 = vmatprep.subr.bf16.mxu1 %v6501_v35  ;;  %v6576_v35 = vld [vmem:[#allocation5 + $0x644] ss:$24 sps:$4 sm:$0xff]  }
 0x149   :  { %2215 = vmatpush1.bf16.msra.mxu0 %v6496_v34  ;;  %v6571_v34 = vld [vmem:[#allocation5 + $0x670] ss:$24 sps:$4 sm:$0xff]  }
 0x14a   :  { %2216 = vmatprep.subr.bf16.mxu0 %v6504_v37  ;;  %v6615_v37 = vld [vmem:[#allocation8 + $0x34] ss:$24 sps:$4 sm:$0xff]  }
 0x14b   :  { %2258 = vmatpush1.bf16.msra.mxu1 %v6499_v36  ;;  %v6607_v36 = vld [vmem:[#allocation8 + $0x60] ss:$24 sps:$4 sm:$0xff]  }
 0x14c   :  { %2259 = vmatprep.subr.bf16.mxu1 %v6507_v39  ;;  %v6582_v39 = vld [vmem:[#allocation5 + $0x614] ss:$24 sps:$4 sm:$0xff]  }
 0x14d   :  { %2217 = vmatpush1.bf16.msra.mxu0 %v6502_v38  ;;  %v6574_v38 = vld [vmem:[#allocation5 + $0x640] ss:$24 sps:$4 sm:$0xff]  }
 0x14e   :  { %2218 = vmatprep.subr.bf16.mxu0 %v6510_v40  ;;  %v6613_v40 = vld [vmem:[#allocation8 + $0x30] ss:$24 sps:$4 sm:$0xff]  }
 0x14f   :  { %2260 = vmatpush1.bf16.msra.mxu1 %v6505_v41  ;;  %v6621_v41 = vld [vmem:[#allocation8 + $0x4] ss:$24 sps:$4 sm:$0xff]  }
 0x150   :  { %2261 = vmatprep.subr.bf16.mxu1 %v6513_v42  ;;  %v6580_v42 = vld [vmem:[#allocation5 + $0x610] ss:$24 sps:$4 sm:$0xff]  }
 0x151   :  { %2219 = vmatpush2.bf16.msra.mxu0 %v6508_v43  ;;  %v6588_v43 = vld [vmem:[#allocation5 + $0x8e4] ss:$24 sps:$4 sm:$0xff]  }
 0x152   :  { %2220 = vmatprep.subr.bf16.mxu0 %v6516_v44  ;;  %v6619_v44 = vld [vmem:[#allocation8] ss:$24 sps:$4 sm:$0xff]  }
 0x153   :  { %2262 = vmatpush2.bf16.msra.mxu1 %v6511_v45  ;;  %v6586_v45 = vld [vmem:[#allocation5 + $0x8e0] ss:$24 sps:$4 sm:$0xff]  }
 0x154   :  { %2263 = vmatprep.subr.bf16.mxu1 %v6519_v47  ;;  %v6594_v47 = vld [vmem:[#allocation5 + $0x8b4] ss:$24 sps:$4 sm:$0xff]  }
 0x155   :  { %2221 = vmatpush2.bf16.msra.mxu0 %v6514_v46  ;;  %v6627_v46 = vld [vmem:[#allocation8 + $0x2d4] ss:$24 sps:$4 sm:$0xff]  }
 0x156   :  { %2222 = vmatprep.subr.bf16.mxu0 %v6522_v49  ;;  %v6633_v49 = vld [vmem:[#allocation8 + $0x2a4] ss:$24 sps:$4 sm:$0xff]  }
 0x157   :  { %2264 = vmatpush2.bf16.msra.mxu1 %v6517_v48  ;;  %v6625_v48 = vld [vmem:[#allocation8 + $0x2d0] ss:$24 sps:$4 sm:$0xff]  }
 0x158   :  { %2265 = vmatprep.subr.bf16.mxu1 %v6525_v52  ;;  %v6600_v52 = vld [vmem:[#allocation5 + $0x884] ss:$24 sps:$4 sm:$0xff]  }
 0x159   :  { %2223 = vmatpush2.bf16.msra.mxu0 %v6520_v50  ;;  %v6592_v50 = vld [vmem:[#allocation5 + $0x8b0] ss:$24 sps:$4 sm:$0xff]  }
 0x15a   :  { %2224 = vmatprep.subr.bf16.mxu0 %v6528_v53  ;;  %v6631_v53 = vld [vmem:[#allocation8 + $0x2a0] ss:$24 sps:$4 sm:$0xff]  }
 0x15b   :  { %2266 = vmatpush2.bf16.msra.mxu1 %v6523_v54  ;;  %v6636_v54 = vld [vmem:[#allocation8 + $0x274] ss:$24 sps:$4 sm:$0xff]  }
 0x15c   :  { %2267 = vmatprep.subr.bf16.mxu1 %v6531_v55  ;;  %v6598_v55 = vld [vmem:[#allocation5 + $0x880] ss:$24 sps:$4 sm:$0xff]  }
 0x15d   :  { %2225 = vmatpush2.bf16.msra.mxu0 %v6526_v56  ;;  %v6606_v56 = vld [vmem:[#allocation5 + $0x854] ss:$24 sps:$4 sm:$0xff]  }
 0x15e   :  { %2226 = vmatprep.subr.bf16.mxu0 %v6534_v57  ;;  %v6634_v57 = vld [vmem:[#allocation8 + $0x270] ss:$24 sps:$4 sm:$0xff]  }
 0x15f   :  { %2268 = vmatpush2.bf16.msra.mxu1 %v6529_v58  ;;  %v6639_v58 = vld [vmem:[#allocation8 + $0x244] ss:$24 sps:$4 sm:$0xff]  }
 0x160   :  { %2269 = vmatprep.subr.bf16.mxu1 %v6537_v59  ;;  %v6604_v59 = vld [vmem:[#allocation5 + $0x850] ss:$24 sps:$4 sm:$0xff]  }
 0x161   :  { %2227 = vmatpush2.bf16.msra.mxu0 %v6532_v60  ;;  %v6612_v60 = vld [vmem:[#allocation5 + $0x824] ss:$24 sps:$4 sm:$0xff]  }
 0x162   :  { %2228 = vmatprep.subr.bf16.mxu0 %v6540_v61  ;;  %v6637_v61 = vld [vmem:[#allocation8 + $0x240] ss:$24 sps:$4 sm:$0xff]  }
 0x163   :  { %2270 = vmatpush2.bf16.msra.mxu1 %v6535_v62  ;;  %v6642_v62 = vld [vmem:[#allocation8 + $0x214] ss:$24 sps:$4 sm:$0xff]  }
 0x164   :  { %2271 = vmatprep.subr.bf16.mxu1 %v6543_v63  ;;  %v6610_v63 = vld [vmem:[#allocation5 + $0x820] ss:$24 sps:$4 sm:$0xff]  }
 0x165   :  { %2229 = vmatpush2.bf16.msra.mxu0 %v6538_v0  ;;  %v6618_v0 = vld [vmem:[#allocation5 + $0x7f4] ss:$24 sps:$4 sm:$0xff]  }
 0x166   :  { %2230 = vmatprep.subr.bf16.mxu0 %v6546_v1  ;;  %v6640_v1 = vld [vmem:[#allocation8 + $0x210] ss:$24 sps:$4 sm:$0xff]  }
 0x167   :  { %2272 = vmatpush2.bf16.msra.mxu1 %v6541_v2  ;;  %v6645_v2 = vld [vmem:[#allocation8 + $0x1e4] ss:$24 sps:$4 sm:$0xff]  }
 0x168   :  { %2273 = vmatprep.subr.bf16.mxu1 %v6549_v4  ;;  %v6616_v4 = vld [vmem:[#allocation5 + $0x7f0] ss:$24 sps:$4 sm:$0xff]  }
 0x169   :  { %2231 = vmatpush2.bf16.msra.mxu0 %v6544_v5  ;;  %v444_v5 = vlaneseq }
 0x16a   :  { %2232 = vmatprep.subr.bf16.mxu0 %v6552_v7  ;;  %v6624_v7 = vld [vmem:[#allocation5 + $0x7c4] ss:$24 sps:$4 sm:$0xff]  }
 0x16b   :  { %2274 = vmatpush2.bf16.msra.mxu1 %v6547_v8 }
 0x16c   :  { %2275 = vmatprep.subr.bf16.mxu1 %v6555_v10  ;;  %v6643_v10 = vld [vmem:[#allocation8 + $0x1e0] ss:$24 sps:$4 sm:$0xff]  }
 0x16d   :  { %2233 = vmatpush2.bf16.msra.mxu0 %v6550_v11  ;;  %v6648_v11 = vld [vmem:[#allocation8 + $0x1b4] ss:$24 sps:$4 sm:$0xff]  }
 0x16e   :  { %2288 = vmatprep.subr.bf16.mxu0 %v6558_v12  ;;  %v6622_v12 = vld [vmem:[#allocation5 + $0x7c0] ss:$24 sps:$4 sm:$0xff]  }
 0x16f   :  { %2276 = vmatpush2.bf16.msra.mxu1 %v6553_v13  ;;  %v7551_v13 = vshrl.u32 %v444_v5, 7  ;;  %v6676_v5 = vld [vmem:[#allocation8 + $0x5d0] ss:$24 sps:$4 sm:$0xff]  }
 0x170   :  { %2235 = vmatmul.mubr.bf16.vlgmr.msra.gmra.mxu0 %v7210_v20  ;;  %4103 = vmatprep.subr.bf16.mxu1 %v6579_v14  ;;  %v1978_v8 = vpop.f32.mrf.mxu0  ;;  %v6630_v14 = vld [vmem:[#allocation5 + $0x794] ss:$24 sps:$4 sm:$0xff]   ;;  %v6628_v20 = vld [vmem:[#allocation5 + $0x790] ss:$24 sps:$4 sm:$0xff]  }
 0x171   :  { %2289 = vmatpush1.bf16.msra.mxu0 %v6556_v15  ;;  %2320 = vmatprep.mubr.bf16.mxu0 %v7211_v22  ;;  %v7559_v22 = vsub.s32 1, %v7551_v13 }
 0x172   :  { %2278 = vmatmul.mubr.bf16.vlgmr.msra.gmra.mxu1 %v7212_v51  ;;  %2290 = vmatprep.subr.bf16.mxu0 %v6561_v16  ;;  %v1980_v15 = vpop.f32.mrf.mxu0  ;;  %v2021_v16 = vpop.f32.mrf.mxu1 }
 0x173   :  { %4104 = vmatpush1.bf16.msra.mxu1 %v6577_v17  ;;  %v6646_v17 = vld [vmem:[#allocation8 + $0x1b0] ss:$24 sps:$4 sm:$0xff]  }
 0x174   :  { %4105 = vmatprep.subr.bf16.mxu1 %v6585_v19  ;;  %v7553_v19 = vld [vmem:[#allocation7] sm:$0x3f]  ;;  %v1982_v51 = vpop.f32.mrf.mxu0 }
 0x175   :  { %2291 = vmatpush1.bf16.msra.mxu0 %v6559_v18  ;;  %v6651_v18 = vld [vmem:[#allocation8 + $0x184] ss:$24 sps:$4 sm:$0xff]  }
 0x176   :  { %2292 = vmatprep.subr.bf16.mxu0 %v6564_v21  ;;  %v7556_v21 = vsub.s32 0, %v7551_v13 }
 0x177   :  { %4106 = vmatpush1.bf16.msra.mxu1 %v6583_v6  ;;  %v2023_v6 = vpop.f32.mrf.mxu1 }
 0x178   :  { %4107 = vmatprep.subr.bf16.mxu1 %v6591_v23  ;;  %v6654_v23 = vld [vmem:[#allocation8 + $0x454] ss:$24 sps:$4 sm:$0xff]  }
 0x179   :  { %2293 = vmatpush1.bf16.msra.mxu0 %v6562_v3  ;;  %v6649_v3 = vld [vmem:[#allocation8 + $0x180] ss:$24 sps:$4 sm:$0xff]  }
 0x17a   :  { %2294 = vmatprep.subr.bf16.mxu0 %v6567_v24  ;;  %v6652_v24 = vld [vmem:[#allocation8 + $0x450] ss:$24 sps:$4 sm:$0xff]  }
 0x17b   :  { %4108 = vmatpush1.bf16.msra.mxu1 %v6589_v9  ;;  %v447_v9 = vrot.slane %v7553_v19, %v7556_v21 }
 0x17c   :  { %4109 = vmatprep.subr.bf16.mxu1 %v6597_v26  ;;  %v451_v26 = vrot.slane %v7553_v19, %v7559_v22 }
 0x17d   :  { %2295 = vmatpush1.bf16.msra.mxu0 %v6565_v25  ;;  %v6657_v25 = vld [vmem:[#allocation8 + $0x424] ss:$24 sps:$4 sm:$0xff]  }
 0x17e   :  { %2296 = vmatprep.subr.bf16.mxu0 %v6570_v27  ;;  %v1984_v27 = vpop.f32.mrf.mxu0 }
 0x17f   :  { %4110 = vmatpush1.bf16.msra.mxu1 %v6595_v28  ;;  %v2025_v28 = vpop.f32.mrf.mxu1 }
 0x180   :  { %4111 = vmatprep.subr.bf16.mxu1 %v6603_v29  ;;  %v1983_v29 = vadd.f32 %v1982_v51, %v447_v9  ;;  %v6685_v51 = vld [vmem:[#allocation8 + $0x540] ss:$24 sps:$4 sm:$0xff]  }
 0x181   :  { %2297 = vmatpush1.bf16.msra.mxu0 %v6568_v30  ;;  %v6655_v30 = vld [vmem:[#allocation8 + $0x420] ss:$24 sps:$4 sm:$0xff]  }
 0x182   :  { %2298 = vmatprep.subr.bf16.mxu0 %v6573_v31  ;;  %v1979_v31 = vadd.f32 %v1978_v8, %v447_v9  ;;  %v6681_v8 = vld [vmem:[#allocation8 + $0x5a4] ss:$24 sps:$4 sm:$0xff]  }
 0x183   :  { %4112 = vmatpush1.bf16.msra.mxu1 %v6601_v32  ;;  %v6780_v9 = vld [vmem:[#allocation8 + $0x664] ss:$24 sps:$4 sm:$0xff]  }
 0x184   :  { %4113 = vmatprep.subr.bf16.mxu1 %v6609_v33  ;;  %v7213_v33 = vld [vmem:[#allocation2 + $0x10] ss:$24 sps:$4 sm:$0xff]  }
 0x185   :  { %2299 = vmatpush1.bf16.msra.mxu0 %v6571_v34  ;;  %v6660_v34 = vld [vmem:[#allocation8 + $0x3f4] ss:$24 sps:$4 sm:$0xff]  }
 0x186   :  { %2300 = vmatprep.subr.bf16.mxu0 %v6576_v35  ;;  %v1981_v35 = vadd.f32 %v1980_v15, %v451_v26  ;;  %v6760_v15 = vld [vmem:[#allocation8 + $0x6f0] ss:$24 sps:$4 sm:$0xff]  }
 0x187   :  { %4114 = vmatpush1.bf16.msra.mxu1 %v6607_v36  ;;  %v1985_v36 = vadd.f32 %v1984_v27, %v451_v26  ;;  %v6778_v26 = vld [vmem:[#allocation8 + $0x660] ss:$24 sps:$4 sm:$0xff]  }
 0x188   :  { %4115 = vmatprep.subr.bf16.mxu1 %v6615_v37  ;;  %v2027_v37 = vpop.f32.mrf.mxu1  ;;  %v6691_v27 = vld [vmem:[#allocation8 + $0x4e0] ss:$24 sps:$4 sm:$0xff]  }
 0x189   :  { %2301 = vmatpush1.bf16.msra.mxu0 %v6574_v38 }
 0x18a   :  { %2302 = vmatprep.subr.bf16.mxu0 %v6582_v39  ;;  %v2026_v39 = vadd.f32 %v2025_v28, %v1983_v29  ;;  %v6786_v28 = vld [vmem:[#allocation8 + $0x634] ss:$24 sps:$4 sm:$0xff]  }
 0x18b   :  { %4116 = vmatpush1.bf16.msra.mxu1 %v6613_v40  ;;  %v6658_v40 = vld [vmem:[#allocation8 + $0x3f0] ss:$24 sps:$4 sm:$0xff]  }
 0x18c   :  { %4117 = vmatprep.subr.bf16.mxu1 %v6621_v41  ;;  %v2022_v41 = vadd.f32 %v2021_v16, %v1979_v31  ;;  %v6682_v16 = vld [vmem:[#allocation8 + $0x570] ss:$24 sps:$4 sm:$0xff]  }
 0x18d   :  { %2303 = vmatpush1.bf16.msra.mxu0 %v6580_v42  ;;  %v6784_v31 = vld [vmem:[#allocation8 + $0x630] ss:$24 sps:$4 sm:$0xff]  }
 0x18e   :  { %2304 = vmatprep.subr.bf16.mxu0 %v6588_v43  ;;  %v6663_v43 = vld [vmem:[#allocation8 + $0x3c4] ss:$24 sps:$4 sm:$0xff]  }
 0x18f   :  { %4118 = vmatpush1.bf16.msra.mxu1 %v6619_v44  ;;  %v2024_v44 = vadd.f32 %v2023_v6, %v1981_v35  ;;  %v6774_v6 = vld [vmem:[#allocation8 + $0x694] ss:$24 sps:$4 sm:$0xff]   ;;  %v6699_v35 = vld [vmem:[#allocation8 + $0x484] ss:$24 sps:$4 sm:$0xff]  }
 0x190   :  { %4119 = vmatprep.subr.bf16.mxu1 %v6627_v46 }
 0x191   :  { %2305 = vmatpush2.bf16.msra.mxu0 %v6586_v45  ;;  %v2028_v45 = vadd.f32 %v2027_v37, %v1985_v36  ;;  %v6790_v36 = vld [vmem:[#allocation8 + $0x600] ss:$24 sps:$4 sm:$0xff]   ;;  %v454_v37 = vsub.s32 2, %v7551_v13 }
 0x192   :  { %2306 = vmatprep.subr.bf16.mxu0 %v6594_v47 }
 0x193   :  { %4120 = vmatpush2.bf16.msra.mxu1 %v6625_v48 }
 0x194   :  { %4121 = vmatprep.subr.bf16.mxu1 %v6633_v49 }
 0x195   :  { %2307 = vmatpush2.bf16.msra.mxu0 %v6592_v50 }
 0x196   :  { %2308 = vmatprep.subr.bf16.mxu0 %v6600_v52 }
 0x197   :  { %4122 = vmatpush2.bf16.msra.mxu1 %v6631_v53  ;;  %v6661_v53 = vld [vmem:[#allocation8 + $0x3c0] ss:$24 sps:$4 sm:$0xff]  }
 0x198   :  { %4123 = vmatprep.subr.bf16.mxu1 %v6636_v54 }
 0x199   :  { %2309 = vmatpush2.bf16.msra.mxu0 %v6598_v55  ;;  %v6666_v55 = vld [vmem:[#allocation8 + $0x394] ss:$24 sps:$4 sm:$0xff]  }
 0x19a   :  { %2310 = vmatprep.subr.bf16.mxu0 %v6606_v56  ;;  %v6664_v56 = vld [vmem:[#allocation8 + $0x390] ss:$24 sps:$4 sm:$0xff]  }
 0x19b   :  { %4124 = vmatpush2.bf16.msra.mxu1 %v6634_v57  ;;  %v6669_v57 = vld [vmem:[#allocation8 + $0x364] ss:$24 sps:$4 sm:$0xff]  }
 0x19c   :  { %4125 = vmatprep.subr.bf16.mxu1 %v6639_v58  ;;  %v6667_v58 = vld [vmem:[#allocation8 + $0x360] ss:$24 sps:$4 sm:$0xff]  }
 0x19d   :  { %2311 = vmatpush2.bf16.msra.mxu0 %v6604_v59  ;;  %v6672_v59 = vld [vmem:[#allocation8 + $0x334] ss:$24 sps:$4 sm:$0xff]  }
 0x19e   :  { %2312 = vmatprep.subr.bf16.mxu0 %v6612_v60  ;;  %v6670_v60 = vld [vmem:[#allocation8 + $0x330] ss:$24 sps:$4 sm:$0xff]  }
 0x19f   :  { %4126 = vmatpush2.bf16.msra.mxu1 %v6637_v61  ;;  %v6675_v61 = vld [vmem:[#allocation8 + $0x304] ss:$24 sps:$4 sm:$0xff]  }
 0x1a0   :  { %4127 = vmatprep.subr.bf16.mxu1 %v6642_v62  ;;  %v6673_v62 = vld [vmem:[#allocation8 + $0x300] ss:$24 sps:$4 sm:$0xff]  }
 0x1a1   :  { %2313 = vmatpush2.bf16.msra.mxu0 %v6610_v63  ;;  %v6678_v63 = vld [vmem:[#allocation8 + $0x5d4] ss:$24 sps:$4 sm:$0xff]  }
 0x1a2   :  { %2314 = vmatprep.subr.bf16.mxu0 %v6618_v0 }
 0x1a3   :  { %4128 = vmatpush2.bf16.msra.mxu1 %v6640_v1  ;;  %v6750_v1 = vld [vmem:[#allocation8 + $0x754] ss:$24 sps:$4 sm:$0xff]  }
 0x1a4   :  { %4129 = vmatprep.subr.bf16.mxu1 %v6645_v2 }
 0x1a5   :  { %2315 = vmatpush2.bf16.msra.mxu0 %v6616_v4  ;;  %v6748_v4 = vld [vmem:[#allocation8 + $0x750] ss:$24 sps:$4 sm:$0xff]  }
 0x1a6   :  { %2316 = vmatprep.subr.bf16.mxu0 %v6624_v7  ;;  %v6756_v7 = vld [vmem:[#allocation8 + $0x724] ss:$24 sps:$4 sm:$0xff]  }
 0x1a7   :  { %4130 = vmatpush2.bf16.msra.mxu1 %v6643_v10  ;;  %v6754_v10 = vld [vmem:[#allocation8 + $0x720] ss:$24 sps:$4 sm:$0xff]  }
 0x1a8   :  { %4131 = vmatprep.subr.bf16.mxu1 %v6648_v11  ;;  %v6679_v11 = vld [vmem:[#allocation8 + $0x5a0] ss:$24 sps:$4 sm:$0xff]  }
 0x1a9   :  { %2317 = vmatpush2.bf16.msra.mxu0 %v6622_v12  ;;  %v6762_v12 = vld [vmem:[#allocation8 + $0x6f4] ss:$24 sps:$4 sm:$0xff]  }
 0x1aa   :  { %2318 = vmatprep.subr.bf16.mxu0 %v6630_v14  ;;  %v6684_v14 = vld [vmem:[#allocation8 + $0x574] ss:$24 sps:$4 sm:$0xff]  }
 0x1ab   :  { %4132 = vmatpush2.bf16.msra.mxu1 %v6646_v17  ;;  %v6768_v17 = vld [vmem:[#allocation8 + $0x6c4] ss:$24 sps:$4 sm:$0xff]  }
 0x1ac   :  { %4133 = vmatprep.subr.bf16.mxu1 %v6651_v18  ;;  %v6687_v18 = vld [vmem:[#allocation8 + $0x544] ss:$24 sps:$4 sm:$0xff]  }
 0x1ad   :  { %2319 = vmatpush2.bf16.msra.mxu0 %v6628_v20  ;;  %v6766_v20 = vld [vmem:[#allocation8 + $0x6c0] ss:$24 sps:$4 sm:$0xff]  }
 0x1ae   :  { %4146 = vmatprep.subr.bf16.mxu0 %v6654_v23  ;;  %v6772_v23 = vld [vmem:[#allocation8 + $0x690] ss:$24 sps:$4 sm:$0xff]  }
 0x1af   :  { %4134 = vmatpush2.bf16.msra.mxu1 %v6649_v3  ;;  %v6690_v3 = vld [vmem:[#allocation8 + $0x514] ss:$24 sps:$4 sm:$0xff]  }
 0x1b0   :  { %v2064_v32 = vpop.f32.mrf.mxu0  ;;  %2321 = vmatmul.mubr.bf16.vlgmr.msra.gmra.mxu0 %v7213_v33  ;;  %4189 = vmatprep.subr.bf16.mxu1 %v6750_v1  ;;  %v6792_v33 = vld [vmem:[#allocation8 + $0x604] ss:$24 sps:$4 sm:$0xff]  }
 0x1b1   :  { %4147 = vmatpush1.bf16.msra.mxu0 %v6652_v24  ;;  %v2065_v47 = vadd.f32 %v2064_v32, %v2022_v41  ;;  %v6688_v24 = vld [vmem:[#allocation8 + $0x510] ss:$24 sps:$4 sm:$0xff]   ;;  %v6816_v1 = vld [vmem:[#allocation8 + $0x844] ss:$24 sps:$4 sm:$0xff]  }
 0x1b2   :  { %v2066_v38 = vpop.f32.mrf.mxu0  ;;  %4148 = vmatprep.subr.bf16.mxu0 %v6657_v25  ;;  %v6693_v25 = vld [vmem:[#allocation8 + $0x4e4] ss:$24 sps:$4 sm:$0xff]   ;;  %v2107_v29 = vpop.f32.mrf.mxu1  ;;  %v6694_v32 = vld [vmem:[#allocation8 + $0x4b0] ss:$24 sps:$4 sm:$0xff]  }
 0x1b3   :  { %v2067_v49 = vadd.f32 %v2066_v38, %v2024_v44  ;;  %v458_v38 = vsub.s32 3, %v7551_v13  ;;  %v455_v44 = vrot.slane %v7553_v19, %v454_v37 }
 0x1b4   :  { %v2068_v42 = vpop.f32.mrf.mxu0 }
 0x1b5   :  { %v2069_v46 = vadd.f32 %v2068_v42, %v2026_v39  ;;  %4149 = vmatpush1.bf16.msra.mxu0 %v6655_v30  ;;  %v6696_v30 = vld [vmem:[#allocation8 + $0x4b4] ss:$24 sps:$4 sm:$0xff]   ;;  %v6697_v39 = vld [vmem:[#allocation8 + $0x480] ss:$24 sps:$4 sm:$0xff]  }
 0x1b6   :  { %v2070_v48 = vpop.f32.mrf.mxu0  ;;  %4150 = vmatprep.subr.bf16.mxu0 %v6660_v34  ;;  %v2109_v34 = vpop.f32.mrf.mxu1  ;;  %v6702_v42 = vld [vmem:[#allocation8 + $0x15c] ss:$24 sps:$4 sm:$0xff]  }
 0x1b7   :  { %v2071_v50 = vadd.f32 %v2070_v48, %v2028_v45  ;;  %v2331_v52 = vpack.c.bf16 %v2069_v46, %v2065_v47  ;;  %v459_v45 = vrot.slane %v7553_v19, %v458_v38  ;;  %v6804_v46 = vld [vmem:[#allocation8 + $0x8a4] ss:$24 sps:$4 sm:$0xff]   ;;  %v6802_v48 = vld [vmem:[#allocation8 + $0x8a0] ss:$24 sps:$4 sm:$0xff]  }
 0x1b8   :  { %v2111_v41 = vpop.f32.mrf.mxu1 }
 0x1b9   :  { %v2332_v54 = vpack.c.bf16 %v2071_v50, %v2067_v49  ;;  %4151 = vmatpush1.bf16.msra.mxu0 %v6658_v40  ;;  %v6798_v40 = vld [vmem:[#allocation8 + $0x8d4] ss:$24 sps:$4 sm:$0xff]   ;;  %v2108_v49 = vadd.f32 %v2107_v29, %v455_v44 }
 0x1ba   :  { %4152 = vmatprep.subr.bf16.mxu0 %v6663_v43  ;;  %v6796_v43 = vld [vmem:[#allocation8 + $0x8d0] ss:$24 sps:$4 sm:$0xff]   ;;  %v2113_v47 = vpop.f32.mrf.mxu1 }
 0x1bb   :  { %7196 = vtanh.bf16 %v2332_v54 }
 0x1bc   :  { %7198 = vtanh.bf16 %v2331_v52  ;;  %v2110_v52 = vadd.f32 %v2109_v34, %v459_v45  ;;  %v6709_v34 = vld [vmem:[#allocation8 + $0xc8] ss:$24 sps:$4 sm:$0xff]  }
 0x1bd   :  { %4153 = vmatpush1.bf16.msra.mxu0 %v6661_v53  ;;  %v6810_v53 = vld [vmem:[#allocation8 + $0x874] ss:$24 sps:$4 sm:$0xff]  }
 0x1be   :  { %4154 = vmatprep.subr.bf16.mxu0 %v6666_v55 }
 0x1c1   :  { %4155 = vmatpush1.bf16.msra.mxu0 %v6664_v56  ;;  %v6808_v56 = vld [vmem:[#allocation8 + $0x870] ss:$24 sps:$4 sm:$0xff]  }
 0x1c2   :  { %4156 = vmatprep.subr.bf16.mxu0 %v6669_v57  ;;  %v2112_v57 = vadd.f32 %v2111_v41, %v455_v44  ;;  %v6720_v41 = vld [vmem:[#allocation8 + $0x3c] ss:$24 sps:$4 sm:$0xff]   ;;  %v6721_v44 = vld [vmem:[#allocation8 + $0x8] ss:$24 sps:$4 sm:$0xff]  }
 0x1c5   :  { %4157 = vmatpush1.bf16.msra.mxu0 %v6667_v58 }
 0x1c6   :  { %4158 = vmatprep.subr.bf16.mxu0 %v6672_v59 }
 0x1c9   :  { %v7565_v0 = vpop.eup %7196  ;;  %4159 = vmatpush1.bf16.msra.mxu0 %v6670_v60 }
 0x1ca   :  { %v7567_v2 = vpop.eup %7198  ;;  %4135 = vmatprep.mubr.bf16.mxu1 %v7565_v0  ;;  %4160 = vmatprep.subr.bf16.mxu0 %v6675_v61  ;;  %v2114_v61 = vadd.f32 %v2113_v47, %v459_v45  ;;  %v6726_v45 = vld [vmem:[#allocation8 + $0x2dc] ss:$24 sps:$4 sm:$0xff]   ;;  %v6729_v47 = vld [vmem:[#allocation8 + $0x2ac] ss:$24 sps:$4 sm:$0xff]  }
 0x1cb   :  { %4136 = vmatmul.mubr.bf16.vlgmr.msra.gmra.mxu1 %v7567_v2 }
 0x1cc   :  { %4190 = vmatpush1.bf16.msra.mxu1 %v6748_v4 }
 0x1cd   :  { %4161 = vmatpush1.bf16.msra.mxu0 %v6673_v62  ;;  %4191 = vmatprep.subr.bf16.mxu1 %v6756_v7  ;;  %v6814_v7 = vld [vmem:[#allocation8 + $0x840] ss:$24 sps:$4 sm:$0xff]  }
 0x1ce   :  { %4162 = vmatprep.subr.bf16.mxu0 %v6678_v63 }
 0x1d0   :  { %4192 = vmatpush1.bf16.msra.mxu1 %v6754_v10 }
 0x1d1   :  { %4163 = vmatpush2.bf16.msra.mxu0 %v6676_v5  ;;  %4193 = vmatprep.subr.bf16.mxu1 %v6762_v12 }
 0x1d2   :  { %4164 = vmatprep.subr.bf16.mxu0 %v6681_v8 }
 0x1d4   :  { %4194 = vmatpush1.bf16.msra.mxu1 %v6760_v15 }
 0x1d5   :  { %4165 = vmatpush2.bf16.msra.mxu0 %v6679_v11  ;;  %4195 = vmatprep.subr.bf16.mxu1 %v6768_v17 }
 0x1d6   :  { %4166 = vmatprep.subr.bf16.mxu0 %v6684_v14 }
 0x1d8   :  { %4196 = vmatpush1.bf16.msra.mxu1 %v6766_v20 }
 0x1d9   :  { %4167 = vmatpush2.bf16.msra.mxu0 %v6682_v16  ;;  %4197 = vmatprep.subr.bf16.mxu1 %v6774_v6  ;;  %v6822_v16 = vld [vmem:[#allocation8 + $0x814] ss:$24 sps:$4 sm:$0xff]   ;;  %v6826_v6 = vld [vmem:[#allocation8 + $0x7e0] ss:$24 sps:$4 sm:$0xff]  }
 0x1da   :  { %4168 = vmatprep.subr.bf16.mxu0 %v6687_v18  ;;  %v6820_v18 = vld [vmem:[#allocation8 + $0x810] ss:$24 sps:$4 sm:$0xff]  }
 0x1dc   :  { %4198 = vmatpush1.bf16.msra.mxu1 %v6772_v23  ;;  %v6832_v23 = vld [vmem:[#allocation8 + $0x7b0] ss:$24 sps:$4 sm:$0xff]  }
 0x1dd   :  { %4169 = vmatpush2.bf16.msra.mxu0 %v6685_v51  ;;  %4199 = vmatprep.subr.bf16.mxu1 %v6780_v9  ;;  %v6828_v51 = vld [vmem:[#allocation8 + $0x7e4] ss:$24 sps:$4 sm:$0xff]   ;;  %v6838_v9 = vld [vmem:[#allocation8 + $0x780] ss:$24 sps:$4 sm:$0xff]  }
 0x1de   :  { %4170 = vmatprep.subr.bf16.mxu0 %v6690_v3  ;;  %v6834_v3 = vld [vmem:[#allocation8 + $0x7b4] ss:$24 sps:$4 sm:$0xff]  }
 0x1e0   :  { %4200 = vmatpush1.bf16.msra.mxu1 %v6778_v26  ;;  %v6700_v26 = vld [vmem:[#allocation8 + $0x158] ss:$24 sps:$4 sm:$0xff]  }
 0x1e1   :  { %4171 = vmatpush2.bf16.msra.mxu0 %v6688_v24  ;;  %4201 = vmatprep.subr.bf16.mxu1 %v6786_v28  ;;  %v6840_v24 = vld [vmem:[#allocation8 + $0x784] ss:$24 sps:$4 sm:$0xff]  }
 0x1e2   :  { %4172 = vmatprep.subr.bf16.mxu0 %v6693_v25  ;;  %v6846_v25 = vld [vmem:[#allocation8 + $0x45c] ss:$24 sps:$4 sm:$0xff]   ;;  %v6705_v28 = vld [vmem:[#allocation8 + $0x12c] ss:$24 sps:$4 sm:$0xff]  }
 0x1e4   :  { %4202 = vmatpush1.bf16.msra.mxu1 %v6784_v31  ;;  %v6708_v31 = vld [vmem:[#allocation8 + $0xfc] ss:$24 sps:$4 sm:$0xff]  }
 0x1e5   :  { %4173 = vmatpush2.bf16.msra.mxu0 %v6691_v27  ;;  %4203 = vmatprep.subr.bf16.mxu1 %v6792_v33  ;;  %v6711_v33 = vld [vmem:[#allocation8 + $0xcc] ss:$24 sps:$4 sm:$0xff]  }
 0x1e6   :  { %4174 = vmatprep.subr.bf16.mxu0 %v6696_v30  ;;  %v6703_v30 = vld [vmem:[#allocation8 + $0x128] ss:$24 sps:$4 sm:$0xff]  }
 0x1e8   :  { %4204 = vmatpush1.bf16.msra.mxu1 %v6790_v36  ;;  %v6712_v36 = vld [vmem:[#allocation8 + $0x98] ss:$24 sps:$4 sm:$0xff]  }
 0x1e9   :  { %4175 = vmatpush2.bf16.msra.mxu0 %v6694_v32  ;;  %4205 = vmatprep.subr.bf16.mxu1 %v6798_v40  ;;  %v6706_v32 = vld [vmem:[#allocation8 + $0xf8] ss:$24 sps:$4 sm:$0xff]   ;;  %v6715_v40 = vld [vmem:[#allocation8 + $0x68] ss:$24 sps:$4 sm:$0xff]  }
 0x1ea   :  { %4176 = vmatprep.subr.bf16.mxu0 %v6699_v35  ;;  %v6714_v35 = vld [vmem:[#allocation8 + $0x9c] ss:$24 sps:$4 sm:$0xff]  }
 0x1ec   :  { %4206 = vmatpush2.bf16.msra.mxu1 %v6796_v43  ;;  %v6723_v43 = vld [vmem:[#allocation8 + $0xc] ss:$24 sps:$4 sm:$0xff]  }
 0x1ed   :  { %4177 = vmatpush2.bf16.msra.mxu0 %v6697_v39  ;;  %4207 = vmatprep.subr.bf16.mxu1 %v6804_v46  ;;  %v6717_v39 = vld [vmem:[#allocation8 + $0x6c] ss:$24 sps:$4 sm:$0xff]   ;;  %v6724_v46 = vld [vmem:[#allocation8 + $0x2d8] ss:$24 sps:$4 sm:$0xff]  }
 0x1ee   :  { %4232 = vmatprep.subr.bf16.mxu0 %v6702_v42  ;;  %v6718_v42 = vld [vmem:[#allocation8 + $0x38] ss:$24 sps:$4 sm:$0xff]  }
 0x1f0   :  { %v2150_v50 = vpop.f32.mrf.mxu0  ;;  %4208 = vmatpush2.bf16.msra.mxu1 %v6802_v48  ;;  %v6727_v48 = vld [vmem:[#allocation8 + $0x2a8] ss:$24 sps:$4 sm:$0xff]  }
 0x1f1   :  { %4209 = vmatprep.subr.bf16.mxu1 %v6810_v53  ;;  %v2151_v58 = vadd.f32 %v2150_v50, %v2108_v49  ;;  %v6732_v49 = vld [vmem:[#allocation8 + $0x27c] ss:$24 sps:$4 sm:$0xff]   ;;  %v6730_v50 = vld [vmem:[#allocation8 + $0x278] ss:$24 sps:$4 sm:$0xff]   ;;  %v6733_v53 = vld [vmem:[#allocation8 + $0x248] ss:$24 sps:$4 sm:$0xff]  }
 0x1f2   :  { %v2152_v54 = vpop.f32.mrf.mxu0  ;;  %v2193_v55 = vpop.f32.mrf.mxu1 }
 0x1f3   :  { %v2153_v62 = vadd.f32 %v2152_v54, %v2110_v52  ;;  %v2194_v11 = vadd.f32 %v2193_v55, %v2151_v58  ;;  %v6735_v52 = vld [vmem:[#allocation8 + $0x24c] ss:$24 sps:$4 sm:$0xff]   ;;  %v6738_v54 = vld [vmem:[#allocation8 + $0x21c] ss:$24 sps:$4 sm:$0xff]   ;;  %v6736_v55 = vld [vmem:[#allocation8 + $0x218] ss:$24 sps:$4 sm:$0xff]  }
 0x1f4   :  { %v2154_v59 = vpop.f32.mrf.mxu0  ;;  %v2195_v60 = vpop.f32.mrf.mxu1  ;;  %4210 = vmatpush2.bf16.msra.mxu1 %v6808_v56  ;;  %v6741_v56 = vld [vmem:[#allocation8 + $0x1ec] ss:$24 sps:$4 sm:$0xff]   ;;  %v6744_v58 = vld [vmem:[#allocation8 + $0x1bc] ss:$24 sps:$4 sm:$0xff]  }
 0x1f5   :  { %v2155_v63 = vadd.f32 %v2154_v59, %v2112_v57  ;;  %4211 = vmatprep.subr.bf16.mxu1 %v6816_v1  ;;  %v2196_v14 = vadd.f32 %v2195_v60, %v2153_v62  ;;  %v6739_v57 = vld [vmem:[#allocation8 + $0x1e8] ss:$24 sps:$4 sm:$0xff]   ;;  %v6742_v59 = vld [vmem:[#allocation8 + $0x1b8] ss:$24 sps:$4 sm:$0xff]   ;;  %v6747_v60 = vld [vmem:[#allocation8 + $0x18c] ss:$24 sps:$4 sm:$0xff]  }
 0x1f6   :  { %v2156_v4 = vpop.f32.mrf.mxu0  ;;  %v2197_v5 = vpop.f32.mrf.mxu1  ;;  %v6753_v62 = vld [vmem:[#allocation8 + $0x75c] ss:$24 sps:$4 sm:$0xff]   ;;  %v6759_v1 = vld [vmem:[#allocation8 + $0x72c] ss:$24 sps:$4 sm:$0xff]  }
 0x1f7   :  { %v2157_v8 = vadd.f32 %v2156_v4, %v2114_v61  ;;  %v2198_v10 = vadd.f32 %v2197_v5, %v2155_v63  ;;  %v6745_v61 = vld [vmem:[#allocation8 + $0x188] ss:$24 sps:$4 sm:$0xff]   ;;  %v6751_v63 = vld [vmem:[#allocation8 + $0x758] ss:$24 sps:$4 sm:$0xff]   ;;  %v6765_v5 = vld [vmem:[#allocation8 + $0x6fc] ss:$24 sps:$4 sm:$0xff]  }
 0x1f8   :  { %v2199_v12 = vpop.f32.mrf.mxu1  ;;  %4212 = vmatpush2.bf16.msra.mxu1 %v6814_v7  ;;  %v6757_v4 = vld [vmem:[#allocation8 + $0x728] ss:$24 sps:$4 sm:$0xff]   ;;  %v6763_v7 = vld [vmem:[#allocation8 + $0x6f8] ss:$24 sps:$4 sm:$0xff]  }
 0x1f9   :  { %v2200_v15 = vadd.f32 %v2199_v12, %v2157_v8  ;;  %v2333_v17 = vpack.c.bf16 %v2198_v10, %v2194_v11  ;;  %4213 = vmatprep.subr.bf16.mxu1 %v6822_v16  ;;  %v6771_v8 = vld [vmem:[#allocation8 + $0x6cc] ss:$24 sps:$4 sm:$0xff]   ;;  %v6769_v10 = vld [vmem:[#allocation8 + $0x6c8] ss:$24 sps:$4 sm:$0xff]   ;;  %v6777_v11 = vld [vmem:[#allocation8 + $0x69c] ss:$24 sps:$4 sm:$0xff]  }
 0x1fa   :  { %v6775_v12 = vld [vmem:[#allocation8 + $0x698] ss:$24 sps:$4 sm:$0xff]   ;;  %v6789_v16 = vld [vmem:[#allocation8 + $0x63c] ss:$24 sps:$4 sm:$0xff]  }
 0x1fb   :  { %v2334_v20 = vpack.c.bf16 %v2200_v15, %v2196_v14  ;;  %v6783_v14 = vld [vmem:[#allocation8 + $0x66c] ss:$24 sps:$4 sm:$0xff]   ;;  %v6781_v15 = vld [vmem:[#allocation8 + $0x668] ss:$24 sps:$4 sm:$0xff]  }
 0x1fc   :  { %4214 = vmatpush2.bf16.msra.mxu1 %v6820_v18  ;;  %v6787_v18 = vld [vmem:[#allocation8 + $0x638] ss:$24 sps:$4 sm:$0xff]  }
 0x1fd   :  { %7200 = vtanh.bf16 %v2334_v20  ;;  %4215 = vmatprep.subr.bf16.mxu1 %v6828_v51  ;;  %v6795_v20 = vld [vmem:[#allocation8 + $0x60c] ss:$24 sps:$4 sm:$0xff]  }
 0x1fe   :  { %7202 = vtanh.bf16 %v2333_v17 }
 0x200   :  { %4216 = vmatpush2.bf16.msra.mxu1 %v6826_v6 }
 0x201   :  { %4217 = vmatprep.subr.bf16.mxu1 %v6834_v3  ;;  %v6793_v3 = vld [vmem:[#allocation8 + $0x608] ss:$24 sps:$4 sm:$0xff]  }
 0x204   :  { %4218 = vmatpush2.bf16.msra.mxu1 %v6832_v23  ;;  %v6801_v23 = vld [vmem:[#allocation8 + $0x8dc] ss:$24 sps:$4 sm:$0xff]  }
 0x205   :  { %4219 = vmatprep.subr.bf16.mxu1 %v6840_v24  ;;  %v462_v24 = vsub.s32 4, %v7551_v13 }
 0x208   :  { %4220 = vmatpush2.bf16.msra.mxu1 %v6838_v9  ;;  %v466_v9 = vsub.s32 5, %v7551_v13 }
 0x209   :  { %4275 = vmatprep.subr.bf16.mxu1 %v6846_v25 }
 0x20b   :  { %v7579_v27 = vpop.eup %7200 }
 0x20c   :  { %v7581_v29 = vpop.eup %7202  ;;  %4178 = vmatprep.mubr.bf16.mxu0 %v7579_v27 }
 0x20d   :  { %4179 = vmatmul.mubr.bf16.vlgmr.msra.gmra.mxu0 %v7581_v29 }
 0x20e   :  { %4233 = vmatpush1.bf16.msra.mxu0 %v6700_v26  ;;  %4264 = vmatprep.mubr.bf16.mxu0 %v7565_v0 }
 0x20f   :  { %4234 = vmatprep.subr.bf16.mxu0 %v6705_v28  ;;  %v6799_v28 = vld [vmem:[#allocation8 + $0x8d8] ss:$24 sps:$4 sm:$0xff]  }
 0x212   :  { %4235 = vmatpush1.bf16.msra.mxu0 %v6703_v30  ;;  %v6807_v30 = vld [vmem:[#allocation8 + $0x8ac] ss:$24 sps:$4 sm:$0xff]  }
 0x213   :  { %4236 = vmatprep.subr.bf16.mxu0 %v6708_v31  ;;  %v463_v31 = vrot.slane %v7553_v19, %v462_v24 }
 0x216   :  { %4237 = vmatpush1.bf16.msra.mxu0 %v6706_v32  ;;  %v467_v32 = vrot.slane %v7553_v19, %v466_v9 }
 0x217   :  { %4238 = vmatprep.subr.bf16.mxu0 %v6711_v33 }
 0x21a   :  { %4239 = vmatpush1.bf16.msra.mxu0 %v6709_v34 }
 0x21b   :  { %4240 = vmatprep.subr.bf16.mxu0 %v6714_v35  ;;  %v6805_v35 = vld [vmem:[#allocation8 + $0x8a8] ss:$24 sps:$4 sm:$0xff]  }
 0x21e   :  { %4241 = vmatpush1.bf16.msra.mxu0 %v6712_v36 }
 0x21f   :  { %4242 = vmatprep.subr.bf16.mxu0 %v6717_v39  ;;  %v6813_v39 = vld [vmem:[#allocation8 + $0x87c] ss:$24 sps:$4 sm:$0xff]  }
 0x222   :  { %4243 = vmatpush1.bf16.msra.mxu0 %v6715_v40 }
 0x223   :  { %4244 = vmatprep.subr.bf16.mxu0 %v6720_v41 }
 0x226   :  { %4245 = vmatpush1.bf16.msra.mxu0 %v6718_v42 }
 0x227   :  { %4246 = vmatprep.subr.bf16.mxu0 %v6723_v43 }
 0x22a   :  { %4247 = vmatpush1.bf16.msra.mxu0 %v6721_v44 }
 0x22b   :  { %4248 = vmatprep.subr.bf16.mxu0 %v6726_v45 }
 0x22e   :  { %4249 = vmatpush2.bf16.msra.mxu0 %v6724_v46  ;;  %v6811_v46 = vld [vmem:[#allocation8 + $0x878] ss:$24 sps:$4 sm:$0xff]  }
 0x22f   :  { %4250 = vmatprep.subr.bf16.mxu0 %v6729_v47 }
 0x230   :  { %v2236_v17 = vpop.f32.mrf.mxu0 }
 0x231   :  { %v2237_v40 = vadd.f32 %v2236_v17, %v463_v31  ;;  %v6855_v17 = vld [vmem:[#allocation8 + $0x434] ss:$24 sps:$4 sm:$0xff]  }
 0x232   :  { %4251 = vmatpush2.bf16.msra.mxu0 %v6727_v48  ;;  %v2238_v51 = vpop.f32.mrf.mxu0  ;;  %v2279_v6 = vpop.f32.mrf.mxu1  ;;  %v6819_v48 = vld [vmem:[#allocation8 + $0x84c] ss:$24 sps:$4 sm:$0xff]  }
 0x233   :  { %4252 = vmatprep.subr.bf16.mxu0 %v6732_v49  ;;  %v2239_v42 = vadd.f32 %v2238_v51, %v467_v32  ;;  %v2280_v49 = vadd.f32 %v2279_v6, %v2237_v40  ;;  %v6853_v51 = vld [vmem:[#allocation8 + $0x430] ss:$24 sps:$4 sm:$0xff]   ;;  %v6861_v6 = vld [vmem:[#allocation8 + $0x404] ss:$24 sps:$4 sm:$0xff]  }
 0x234   :  { %v2240_v25 = vpop.f32.mrf.mxu0  ;;  %v2281_v26 = vpop.f32.mrf.mxu1  ;;  %v6877_v40 = vld [vmem:[#allocation8 + $0x370] ss:$24 sps:$4 sm:$0xff]  }
 0x235   :  { %v2241_v36 = vadd.f32 %v2240_v25, %v463_v31  ;;  %v6859_v25 = vld [vmem:[#allocation8 + $0x400] ss:$24 sps:$4 sm:$0xff]   ;;  %v6865_v31 = vld [vmem:[#allocation8 + $0x3d0] ss:$24 sps:$4 sm:$0xff]  }
 0x236   :  { %4253 = vmatpush2.bf16.msra.mxu0 %v6730_v50  ;;  %v2242_v33 = vpop.f32.mrf.mxu0  ;;  %v2283_v34 = vpop.f32.mrf.mxu1  ;;  %v2282_v50 = vadd.f32 %v2281_v26, %v2239_v42  ;;  %v6867_v26 = vld [vmem:[#allocation8 + $0x3d4] ss:$24 sps:$4 sm:$0xff]   ;;  %v6880_v42 = vld [vmem:[#allocation8 + $0x338] ss:$24 sps:$4 sm:$0xff]  }
 0x237   :  { %4254 = vmatprep.subr.bf16.mxu0 %v6735_v52  ;;  %v2243_v43 = vadd.f32 %v2242_v33, %v467_v32  ;;  %v2284_v47 = vadd.f32 %v2283_v34, %v2241_v36  ;;  %v6868_v32 = vld [vmem:[#allocation8 + $0x398] ss:$24 sps:$4 sm:$0xff]   ;;  %v6876_v33 = vld [vmem:[#allocation8 + $0x36c] ss:$24 sps:$4 sm:$0xff]   ;;  %v6874_v36 = vld [vmem:[#allocation8 + $0x368] ss:$24 sps:$4 sm:$0xff]  }
 0x238   :  { %v2285_v44 = vpop.f32.mrf.mxu1  ;;  %v6871_v34 = vld [vmem:[#allocation8 + $0x3a0] ss:$24 sps:$4 sm:$0xff]  }
 0x239   :  { %v2286_v52 = vadd.f32 %v2285_v44, %v2243_v43  ;;  %v6888_v43 = vld [vmem:[#allocation8 + $0x30c] ss:$24 sps:$4 sm:$0xff]   ;;  %v6883_v44 = vld [vmem:[#allocation8 + $0x340] ss:$24 sps:$4 sm:$0xff]  }
 0x23a   :  { %4255 = vmatpush2.bf16.msra.mxu0 %v6733_v53 }
 0x23b   :  { %4256 = vmatprep.subr.bf16.mxu0 %v6738_v54 }
 0x23e   :  { %4257 = vmatpush2.bf16.msra.mxu0 %v6736_v55 }
 0x23f   :  { %4258 = vmatprep.subr.bf16.mxu0 %v6741_v56  ;;  %v6817_v56 = vld [vmem:[#allocation8 + $0x848] ss:$24 sps:$4 sm:$0xff]  }
 0x242   :  { %4259 = vmatpush2.bf16.msra.mxu0 %v6739_v57 }
 0x243   :  { %4260 = vmatprep.subr.bf16.mxu0 %v6744_v58 }
 0x246   :  { %4261 = vmatpush2.bf16.msra.mxu0 %v6742_v59  ;;  %v6825_v59 = vld [vmem:[#allocation8 + $0x81c] ss:$24 sps:$4 sm:$0xff]  }
 0x247   :  { %4262 = vmatprep.subr.bf16.mxu0 %v6747_v60 }
 0x24a   :  { %4263 = vmatpush2.bf16.msra.mxu0 %v6745_v61 }
 0x24b   :  { %4318 = vmatprep.subr.bf16.mxu0 %v6753_v62  ;;  %v6823_v62 = vld [vmem:[#allocation8 + $0x818] ss:$24 sps:$4 sm:$0xff]  }
 0x24d   :  { %4265 = vmatmul.mubr.bf16.vlgmr.msra.gmra.mxu0 %v7567_v2 }
 0x24e   :  { %4319 = vmatpush1.bf16.msra.mxu0 %v6751_v63  ;;  %v6831_v63 = vld [vmem:[#allocation8 + $0x7ec] ss:$24 sps:$4 sm:$0xff]  }
 0x24f   :  { %4320 = vmatprep.subr.bf16.mxu0 %v6759_v1  ;;  %v6829_v1 = vld [vmem:[#allocation8 + $0x7e8] ss:$24 sps:$4 sm:$0xff]  }
 0x252   :  { %4321 = vmatpush1.bf16.msra.mxu0 %v6757_v4  ;;  %v6837_v4 = vld [vmem:[#allocation8 + $0x7bc] ss:$24 sps:$4 sm:$0xff]  }
 0x253   :  { %4322 = vmatprep.subr.bf16.mxu0 %v6765_v5  ;;  %v6835_v5 = vld [vmem:[#allocation8 + $0x7b8] ss:$24 sps:$4 sm:$0xff]  }
 0x256   :  { %4323 = vmatpush1.bf16.msra.mxu0 %v6763_v7  ;;  %v6843_v7 = vld [vmem:[#allocation8 + $0x78c] ss:$24 sps:$4 sm:$0xff]  }
 0x257   :  { %4324 = vmatprep.subr.bf16.mxu0 %v6771_v8  ;;  %v6841_v8 = vld [vmem:[#allocation8 + $0x788] ss:$24 sps:$4 sm:$0xff]  }
 0x25a   :  { %4325 = vmatpush1.bf16.msra.mxu0 %v6769_v10  ;;  %v6844_v10 = vld [vmem:[#allocation8 + $0x458] ss:$24 sps:$4 sm:$0xff]  }
 0x25b   :  { %4326 = vmatprep.subr.bf16.mxu0 %v6777_v11 }
 0x25e   :  { %4327 = vmatpush1.bf16.msra.mxu0 %v6775_v12  ;;  %v6849_v12 = vld [vmem:[#allocation8 + $0x464] ss:$24 sps:$4 sm:$0xff]  }
 0x25f   :  { %4328 = vmatprep.subr.bf16.mxu0 %v6783_v14 }
 0x262   :  { %4329 = vmatpush1.bf16.msra.mxu0 %v6781_v15  ;;  %v6847_v15 = vld [vmem:[#allocation8 + $0x460] ss:$24 sps:$4 sm:$0xff]  }
 0x263   :  { %4330 = vmatprep.subr.bf16.mxu0 %v6789_v16  ;;  %v6852_v16 = vld [vmem:[#allocation8 + $0x42c] ss:$24 sps:$4 sm:$0xff]  }
 0x266   :  { %4331 = vmatpush1.bf16.msra.mxu0 %v6787_v18  ;;  %v6850_v18 = vld [vmem:[#allocation8 + $0x428] ss:$24 sps:$4 sm:$0xff]  }
 0x267   :  { %4332 = vmatprep.subr.bf16.mxu0 %v6795_v20  ;;  %v6858_v20 = vld [vmem:[#allocation8 + $0x3fc] ss:$24 sps:$4 sm:$0xff]  }
 0x26a   :  { %4333 = vmatpush1.bf16.msra.mxu0 %v6793_v3  ;;  %v6856_v3 = vld [vmem:[#allocation8 + $0x3f8] ss:$24 sps:$4 sm:$0xff]  }
 0x26b   :  { %4334 = vmatprep.subr.bf16.mxu0 %v6801_v23  ;;  %v6864_v23 = vld [vmem:[#allocation8 + $0x3cc] ss:$24 sps:$4 sm:$0xff]  }
 0x26e   :  { %4335 = vmatpush2.bf16.msra.mxu0 %v6799_v28  ;;  %v6862_v28 = vld [vmem:[#allocation8 + $0x3c8] ss:$24 sps:$4 sm:$0xff]  }
 0x26f   :  { %4336 = vmatprep.subr.bf16.mxu0 %v6807_v30  ;;  %v6870_v30 = vld [vmem:[#allocation8 + $0x39c] ss:$24 sps:$4 sm:$0xff]  }
 0x270   :  { %v2322_v41 = vpop.f32.mrf.mxu0 }
 0x271   :  { %v2323_v54 = vadd.f32 %v2322_v41, %v2280_v49  ;;  %v6885_v41 = vld [vmem:[#allocation8 + $0x344] ss:$24 sps:$4 sm:$0xff]  }
 0x272   :  { %4337 = vmatpush2.bf16.msra.mxu0 %v6805_v35  ;;  %v2324_v45 = vpop.f32.mrf.mxu0  ;;  %v6879_v35 = vld [vmem:[#allocation8 + $0x374] ss:$24 sps:$4 sm:$0xff]   ;;  %v6897_v49 = vld [vmem:[#allocation8 + $0x5e4] ss:$24 sps:$4 sm:$0xff]  }
 0x273   :  { %4338 = vmatprep.subr.bf16.mxu0 %v6813_v39  ;;  %v2325_v57 = vadd.f32 %v2324_v45, %v2282_v50  ;;  %v6882_v39 = vld [vmem:[#allocation8 + $0x33c] ss:$24 sps:$4 sm:$0xff]   ;;  %v6900_v50 = vld [vmem:[#allocation8 + $0x5ac] ss:$24 sps:$4 sm:$0xff]  }
 0x274   :  { %v2326_v19 = vpop.f32.mrf.mxu0  ;;  %v6891_v45 = vld [vmem:[#allocation8 + $0x314] ss:$24 sps:$4 sm:$0xff]  }
 0x275   :  { %v2327_v53 = vadd.f32 %v2326_v19, %v2284_v47  ;;  %v6894_v47 = vld [vmem:[#allocation8 + $0x5dc] ss:$24 sps:$4 sm:$0xff]   ;;  %v6892_v19 = vld [vmem:[#allocation8 + $0x5d8] ss:$24 sps:$4 sm:$0xff]  }
 0x276   :  { %4339 = vmatpush2.bf16.msra.mxu0 %v6811_v46  ;;  %v2328_v55 = vpop.f32.mrf.mxu0  ;;  %v6886_v46 = vld [vmem:[#allocation8 + $0x308] ss:$24 sps:$4 sm:$0xff]  }
 0x277   :  { %v2329_v58 = vadd.f32 %v2328_v55, %v2286_v52  ;;  %4340 = vmatprep.subr.bf16.mxu0 %v6819_v48  ;;  %v2335_v60 = vpack.c.bf16 %v2327_v53, %v2323_v54  ;;  %v6889_v48 = vld [vmem:[#allocation8 + $0x310] ss:$24 sps:$4 sm:$0xff]   ;;  %v6895_v52 = vld [vmem:[#allocation8 + $0x5e0] ss:$24 sps:$4 sm:$0xff]   ;;  %v6903_v53 = vld [vmem:[#allocation8 + $0x5b4] ss:$24 sps:$4 sm:$0xff]  }
 0x278   :  { %v6898_v54 = vld [vmem:[#allocation8 + $0x5a8] ss:$24 sps:$4 sm:$0xff]   ;;  %v6906_v55 = vld [vmem:[#allocation8 + $0x57c] ss:$24 sps:$4 sm:$0xff]  }
 0x279   :  { %v2336_v61 = vpack.c.bf16 %v2329_v58, %v2325_v57  ;;  %v6909_v57 = vld [vmem:[#allocation8 + $0x584] ss:$24 sps:$4 sm:$0xff]   ;;  %v6904_v58 = vld [vmem:[#allocation8 + $0x578] ss:$24 sps:$4 sm:$0xff]  }
 0x27a   :  { %4341 = vmatpush2.bf16.msra.mxu0 %v6817_v56  ;;  %v6901_v56 = vld [vmem:[#allocation8 + $0x5b0] ss:$24 sps:$4 sm:$0xff]  }
 0x27b   :  { %7204 = vtanh.bf16 %v2336_v61  ;;  %4342 = vmatprep.subr.bf16.mxu0 %v6825_v59  ;;  %v6912_v59 = vld [vmem:[#allocation8 + $0x54c] ss:$24 sps:$4 sm:$0xff]  }
 0x27c   :  { %7206 = vtanh.bf16 %v2335_v60  ;;  %v6907_v60 = vld [vmem:[#allocation8 + $0x580] ss:$24 sps:$4 sm:$0xff]   ;;  %v6915_v61 = vld [vmem:[#allocation8 + $0x554] ss:$24 sps:$4 sm:$0xff]  }
 0x27e   :  { %4343 = vmatpush2.bf16.msra.mxu0 %v6823_v62  ;;  %v6910_v62 = vld [vmem:[#allocation8 + $0x548] ss:$24 sps:$4 sm:$0xff]  }
 0x27f   :  { %4344 = vmatprep.subr.bf16.mxu0 %v6831_v63  ;;  %v6918_v63 = vld [vmem:[#allocation8 + $0x51c] ss:$24 sps:$4 sm:$0xff]  }
 0x282   :  { %4345 = vmatpush2.bf16.msra.mxu0 %v6829_v1  ;;  %v6913_v1 = vld [vmem:[#allocation8 + $0x550] ss:$24 sps:$4 sm:$0xff]  }
 0x283   :  { %4346 = vmatprep.subr.bf16.mxu0 %v6837_v4  ;;  %v6921_v4 = vld [vmem:[#allocation8 + $0x524] ss:$24 sps:$4 sm:$0xff]  }
 0x286   :  { %4347 = vmatpush2.bf16.msra.mxu0 %v6835_v5  ;;  %v6916_v5 = vld [vmem:[#allocation8 + $0x518] ss:$24 sps:$4 sm:$0xff]  }
 0x287   :  { %4348 = vmatprep.subr.bf16.mxu0 %v6843_v7  ;;  %v6924_v7 = vld [vmem:[#allocation8 + $0x4ec] ss:$24 sps:$4 sm:$0xff]  }
 0x289   :  { %v7595_v11 = vpop.eup %7204 }
 0x28a   :  { %v7597_v14 = vpop.eup %7206  ;;  %4349 = vmatpush2.bf16.msra.mxu0 %v6841_v8  ;;  %4221 = vmatprep.mubr.bf16.mxu1 %v7595_v11  ;;  %v6919_v8 = vld [vmem:[#allocation8 + $0x520] ss:$24 sps:$4 sm:$0xff]  }
 0x28b   :  { %4350 = vmatprep.mubr.bf16.mxu0 %v7595_v11  ;;  %4222 = vmatmul.mubr.bf16.vlgmr.msra.gmra.mxu1 %v7597_v14 }
 0x28c   :  { %4276 = vmatpush1.bf16.msra.mxu1 %v6844_v10  ;;  %4307 = vmatprep.mubr.bf16.mxu1 %v7579_v27  ;;  %v6927_v10 = vld [vmem:[#allocation8 + $0x4f4] ss:$24 sps:$4 sm:$0xff]  }
 0x28d   :  { %4351 = vmatmul.mubr.bf16.vlgmr.msra.gmra.mxu0 %v7597_v14  ;;  %4404 = vmatprep.subr.bf16.mxu0 %v6849_v12  ;;  %v6922_v12 = vld [vmem:[#allocation8 + $0x4e8] ss:$24 sps:$4 sm:$0xff]  }
 0x28e   :  { %4405 = vmatpush1.bf16.msra.mxu0 %v6847_v15  ;;  %4436 = vmatprep.mubr.bf16.mxu0 %v7579_v27  ;;  %v6873_v27 = vld [vmem:[#allocation8 + $0x3a4] ss:$24 sps:$4 sm:$0xff]  }
 0x28f   :  { %4277 = vmatprep.subr.bf16.mxu1 %v6852_v16  ;;  %4406 = vmatprep.subr.bf16.mxu0 %v6855_v17  ;;  %v6930_v15 = vld [vmem:[#allocation8 + $0x4bc] ss:$24 sps:$4 sm:$0xff]   ;;  %v6925_v16 = vld [vmem:[#allocation8 + $0x4f0] ss:$24 sps:$4 sm:$0xff]  }
 0x290   :  { %4278 = vmatpush1.bf16.msra.mxu1 %v6850_v18  ;;  %v6933_v17 = vld [vmem:[#allocation8 + $0x4c4] ss:$24 sps:$4 sm:$0xff]   ;;  %v6928_v18 = vld [vmem:[#allocation8 + $0x4b8] ss:$24 sps:$4 sm:$0xff]  }
 0x291   :  { %4279 = vmatprep.subr.bf16.mxu1 %v6858_v20  ;;  %v6936_v20 = vld [vmem:[#allocation8 + $0x48c] ss:$24 sps:$4 sm:$0xff]  }
 0x292   :  { %4407 = vmatpush1.bf16.msra.mxu0 %v6853_v51  ;;  %v6931_v51 = vld [vmem:[#allocation8 + $0x4c0] ss:$24 sps:$4 sm:$0xff]  }
 0x293   :  { %4408 = vmatprep.subr.bf16.mxu0 %v6861_v6  ;;  %v6939_v6 = vld [vmem:[#allocation8 + $0x494] ss:$24 sps:$4 sm:$0xff]  }
 0x294   :  { %4280 = vmatpush1.bf16.msra.mxu1 %v6856_v3  ;;  %v6934_v3 = vld [vmem:[#allocation8 + $0x488] ss:$24 sps:$4 sm:$0xff]  }
 0x295   :  { %4281 = vmatprep.subr.bf16.mxu1 %v6864_v23  ;;  %v6942_v23 = vld [vmem:[#allocation8 + $0x164] ss:$24 sps:$4 sm:$0xff]  }
 0x296   :  { %4409 = vmatpush1.bf16.msra.mxu0 %v6859_v25  ;;  %v6937_v25 = vld [vmem:[#allocation8 + $0x490] ss:$24 sps:$4 sm:$0xff]  }
 0x297   :  { %4410 = vmatprep.subr.bf16.mxu0 %v6867_v26  ;;  %v7002_v26 = vld [vmem:[#allocation11 + $0x74] ss:$8 sps:$4 sm:$0xff]  }
 0x298   :  { %4282 = vmatpush1.bf16.msra.mxu1 %v6862_v28  ;;  %v6940_v28 = vld [vmem:[#allocation8 + $0x160] ss:$24 sps:$4 sm:$0xff]  }
 0x299   :  { %4283 = vmatprep.subr.bf16.mxu1 %v6870_v30  ;;  %v6945_v30 = vld [vmem:[#allocation8 + $0x134] ss:$24 sps:$4 sm:$0xff]  }
 0x29a   :  { %4411 = vmatpush1.bf16.msra.mxu0 %v6865_v31  ;;  %v7000_v31 = vld [vmem:[#allocation11 + $0x70] ss:$8 sps:$4 sm:$0xff]  }
 0x29b   :  { %4412 = vmatprep.subr.bf16.mxu0 %v6873_v27  ;;  %v7008_v27 = vld [vmem:[#allocation11 + $0x64] ss:$8 sps:$4 sm:$0xff]  }
 0x29c   :  { %4284 = vmatpush1.bf16.msra.mxu1 %v6868_v32  ;;  %v6943_v32 = vld [vmem:[#allocation8 + $0x130] ss:$24 sps:$4 sm:$0xff]  }
 0x29d   :  { %4285 = vmatprep.subr.bf16.mxu1 %v6876_v33  ;;  %v6948_v33 = vld [vmem:[#allocation8 + $0x104] ss:$24 sps:$4 sm:$0xff]  }
 0x29e   :  { %4413 = vmatpush1.bf16.msra.mxu0 %v6871_v34  ;;  %v7006_v34 = vld [vmem:[#allocation11 + $0x60] ss:$8 sps:$4 sm:$0xff]  }
 0x29f   :  { %4414 = vmatprep.subr.bf16.mxu0 %v6879_v35  ;;  %v7014_v35 = vld [vmem:[#allocation11 + $0x54] ss:$8 sps:$4 sm:$0xff]  }
 0x2a0   :  { %4286 = vmatpush1.bf16.msra.mxu1 %v6874_v36  ;;  %v6946_v36 = vld [vmem:[#allocation8 + $0x100] ss:$24 sps:$4 sm:$0xff]  }
 0x2a1   :  { %4287 = vmatprep.subr.bf16.mxu1 %v6882_v39  ;;  %v6951_v39 = vld [vmem:[#allocation8 + $0xd4] ss:$24 sps:$4 sm:$0xff]  }
 0x2a2   :  { %4415 = vmatpush1.bf16.msra.mxu0 %v6877_v40  ;;  %v7012_v40 = vld [vmem:[#allocation11 + $0x50] ss:$8 sps:$4 sm:$0xff]  }
 0x2a3   :  { %4416 = vmatprep.subr.bf16.mxu0 %v6885_v41  ;;  %v7020_v41 = vld [vmem:[#allocation11 + $0x44] ss:$8 sps:$4 sm:$0xff]  }
 0x2a4   :  { %4288 = vmatpush1.bf16.msra.mxu1 %v6880_v42  ;;  %v6949_v42 = vld [vmem:[#allocation8 + $0xd0] ss:$24 sps:$4 sm:$0xff]  }
 0x2a5   :  { %4289 = vmatprep.subr.bf16.mxu1 %v6888_v43  ;;  %v7026_v43 = vld [vmem:[#allocation11 + $0x34] ss:$8 sps:$4 sm:$0xff]  }
 0x2a6   :  { %4417 = vmatpush1.bf16.msra.mxu0 %v6883_v44  ;;  %v6952_v44 = vld [vmem:[#allocation8 + $0xa0] ss:$24 sps:$4 sm:$0xff]  }
 0x2a7   :  { %4418 = vmatprep.subr.bf16.mxu0 %v6891_v45  ;;  %v6957_v45 = vld [vmem:[#allocation8 + $0x74] ss:$24 sps:$4 sm:$0xff]  }
 0x2a8   :  { %4290 = vmatpush1.bf16.msra.mxu1 %v6886_v46  ;;  %v7024_v46 = vld [vmem:[#allocation11 + $0x30] ss:$8 sps:$4 sm:$0xff]  }
 0x2a9   :  { %4291 = vmatprep.subr.bf16.mxu1 %v6894_v47  ;;  %v7032_v47 = vld [vmem:[#allocation11 + $0x24] ss:$8 sps:$4 sm:$0xff]  }
 0x2aa   :  { %4419 = vmatpush1.bf16.msra.mxu0 %v6889_v48  ;;  %v6955_v48 = vld [vmem:[#allocation8 + $0x70] ss:$24 sps:$4 sm:$0xff]  }
 0x2ab   :  { %4420 = vmatprep.subr.bf16.mxu0 %v6897_v49  ;;  %v6960_v49 = vld [vmem:[#allocation8 + $0x44] ss:$24 sps:$4 sm:$0xff]  }
 0x2ac   :  { %4292 = vmatpush2.bf16.msra.mxu1 %v6892_v19  ;;  %v7030_v19 = vld [vmem:[#allocation11 + $0x20] ss:$8 sps:$4 sm:$0xff]  }
 0x2ad   :  { %4293 = vmatprep.subr.bf16.mxu1 %v6900_v50  ;;  %v7038_v50 = vld [vmem:[#allocation11 + $0x14] ss:$8 sps:$4 sm:$0xff]  }
 0x2ae   :  { %4421 = vmatpush2.bf16.msra.mxu0 %v6895_v52  ;;  %v6958_v52 = vld [vmem:[#allocation8 + $0x40] ss:$24 sps:$4 sm:$0xff]  }
 0x2af   :  { %4422 = vmatprep.subr.bf16.mxu0 %v6903_v53  ;;  %v6963_v53 = vld [vmem:[#allocation8 + $0x14] ss:$24 sps:$4 sm:$0xff]  }
 0x2b0   :  { %4294 = vmatpush2.bf16.msra.mxu1 %v6898_v54  ;;  %v7036_v54 = vld [vmem:[#allocation11 + $0x10] ss:$8 sps:$4 sm:$0xff]  }
 0x2b1   :  { %4295 = vmatprep.subr.bf16.mxu1 %v6906_v55  ;;  %v7044_v55 = vld [vmem:[#allocation11 + $0x4] ss:$8 sps:$4 sm:$0xff]  }
 0x2b2   :  { %4423 = vmatpush2.bf16.msra.mxu0 %v6901_v56  ;;  %v6961_v56 = vld [vmem:[#allocation8 + $0x10] ss:$24 sps:$4 sm:$0xff]  }
 0x2b3   :  { %4424 = vmatprep.subr.bf16.mxu0 %v6909_v57  ;;  %v6966_v57 = vld [vmem:[#allocation8 + $0x2e4] ss:$24 sps:$4 sm:$0xff]  }
 0x2b4   :  { %4296 = vmatpush2.bf16.msra.mxu1 %v6904_v58  ;;  %v7042_v58 = vld [vmem:[#allocation11] ss:$8 sps:$4 sm:$0xff]  }
 0x2b5   :  { %4297 = vmatprep.subr.bf16.mxu1 %v6912_v59  ;;  %v7050_v59 = vld [vmem:[#allocation11 + $0xf4] ss:$8 sps:$4 sm:$0xff]  }
 0x2b6   :  { %4425 = vmatpush2.bf16.msra.mxu0 %v6907_v60  ;;  %v6964_v60 = vld [vmem:[#allocation8 + $0x2e0] ss:$24 sps:$4 sm:$0xff]  }
 0x2b7   :  { %4426 = vmatprep.subr.bf16.mxu0 %v6915_v61  ;;  %v6969_v61 = vld [vmem:[#allocation8 + $0x2b4] ss:$24 sps:$4 sm:$0xff]  }
 0x2b8   :  { %4298 = vmatpush2.bf16.msra.mxu1 %v6910_v62  ;;  %v7048_v62 = vld [vmem:[#allocation11 + $0xf0] ss:$8 sps:$4 sm:$0xff]  }
 0x2b9   :  { %4299 = vmatprep.subr.bf16.mxu1 %v6918_v63  ;;  %v7056_v63 = vld [vmem:[#allocation11 + $0xe4] ss:$8 sps:$4 sm:$0xff]  }
 0x2ba   :  { %4427 = vmatpush2.bf16.msra.mxu0 %v6913_v1  ;;  %v6967_v1 = vld [vmem:[#allocation8 + $0x2b0] ss:$24 sps:$4 sm:$0xff]  }
 0x2bb   :  { %4428 = vmatprep.subr.bf16.mxu0 %v6921_v4  ;;  %v6972_v4 = vld [vmem:[#allocation8 + $0x284] ss:$24 sps:$4 sm:$0xff]  }
 0x2bc   :  { %4300 = vmatpush2.bf16.msra.mxu1 %v6916_v5  ;;  %v7054_v5 = vld [vmem:[#allocation11 + $0xe0] ss:$8 sps:$4 sm:$0xff]  }
 0x2bd   :  { %4301 = vmatprep.subr.bf16.mxu1 %v6924_v7  ;;  %v7062_v7 = vld [vmem:[#allocation11 + $0xd4] ss:$8 sps:$4 sm:$0xff]  }
 0x2be   :  { %4429 = vmatpush2.bf16.msra.mxu0 %v6919_v8  ;;  %v6970_v8 = vld [vmem:[#allocation8 + $0x280] ss:$24 sps:$4 sm:$0xff]  }
 0x2bf   :  { %4430 = vmatprep.subr.bf16.mxu0 %v6927_v10  ;;  %v6975_v10 = vld [vmem:[#allocation8 + $0x254] ss:$24 sps:$4 sm:$0xff]  }
 0x2c0   :  { %4302 = vmatpush2.bf16.msra.mxu1 %v6922_v12  ;;  %v7060_v12 = vld [vmem:[#allocation11 + $0xd0] ss:$8 sps:$4 sm:$0xff]  }
 0x2c1   :  { %4303 = vmatprep.subr.bf16.mxu1 %v6930_v15  ;;  %v7068_v15 = vld [vmem:[#allocation11 + $0xc4] ss:$8 sps:$4 sm:$0xff]  }
 0x2c2   :  { %4431 = vmatpush2.bf16.msra.mxu0 %v6925_v16  ;;  %v6973_v16 = vld [vmem:[#allocation8 + $0x250] ss:$24 sps:$4 sm:$0xff]  }
 0x2c3   :  { %4432 = vmatprep.subr.bf16.mxu0 %v6933_v17  ;;  %v6978_v17 = vld [vmem:[#allocation8 + $0x224] ss:$24 sps:$4 sm:$0xff]  }
 0x2c4   :  { %4304 = vmatpush2.bf16.msra.mxu1 %v6928_v18  ;;  %v7066_v18 = vld [vmem:[#allocation11 + $0xc0] ss:$8 sps:$4 sm:$0xff]  }
 0x2c5   :  { %4305 = vmatprep.subr.bf16.mxu1 %v6936_v20  ;;  %v7074_v20 = vld [vmem:[#allocation11 + $0xb4] ss:$8 sps:$4 sm:$0xff]  }
 0x2c6   :  { %4433 = vmatpush2.bf16.msra.mxu0 %v6931_v51  ;;  %v6976_v51 = vld [vmem:[#allocation8 + $0x220] ss:$24 sps:$4 sm:$0xff]  }
 0x2c7   :  { %4434 = vmatprep.subr.bf16.mxu0 %v6939_v6  ;;  %v6981_v6 = vld [vmem:[#allocation8 + $0x1f4] ss:$24 sps:$4 sm:$0xff]  }
 0x2c8   :  { %4306 = vmatpush2.bf16.msra.mxu1 %v6934_v3  ;;  %v7072_v3 = vld [vmem:[#allocation11 + $0xb0] ss:$8 sps:$4 sm:$0xff]  }
 0x2c9   :  { %4361 = vmatprep.subr.bf16.mxu1 %v6942_v23  ;;  %v7077_v23 = vld [vmem:[#allocation11 + $0xa4] ss:$8 sps:$4 sm:$0xff]  }
 0x2ca   :  { %4435 = vmatpush2.bf16.msra.mxu0 %v6937_v25  ;;  %v6979_v25 = vld [vmem:[#allocation8 + $0x1f0] ss:$24 sps:$4 sm:$0xff]  }
 0x2cb   :  { %4308 = vmatmul.mubr.bf16.vlgmr.msra.gmra.mxu1 %v7581_v29  ;;  %5096 = vmatprep.subr.bf16.mxu0 %v7002_v26  ;;  %v6984_v26 = vld [vmem:[#allocation8 + $0x1c4] ss:$24 sps:$4 sm:$0xff]  }
 0x2cc   :  { %4362 = vmatpush1.bf16.msra.mxu1 %v6940_v28  ;;  %4393 = vmatprep.mubr.bf16.mxu1 %v7565_v0  ;;  %v6954_v0 = vld [vmem:[#allocation8 + $0xa4] ss:$24 sps:$4 sm:$0xff]  }
 0x2cd   :  { %4437 = vmatmul.mubr.bf16.vlgmr.msra.gmra.mxu0 %v7581_v29  ;;  %4363 = vmatprep.subr.bf16.mxu1 %v6945_v30  ;;  %v7018_v29 = vld [vmem:[#allocation11 + $0x40] ss:$8 sps:$4 sm:$0xff]   ;;  %v7080_v30 = vld [vmem:[#allocation11 + $0x94] ss:$8 sps:$4 sm:$0xff]  }
 0x2ce   :  { %5097 = vmatpush1.bf16.msra.mxu0 %v7000_v31  ;;  %v7075_v28 = vld [vmem:[#allocation11 + $0xa0] ss:$8 sps:$4 sm:$0xff]   ;;  %v6982_v31 = vld [vmem:[#allocation8 + $0x1c0] ss:$24 sps:$4 sm:$0xff]  }
 0x2cf   :  { %5098 = vmatprep.subr.bf16.mxu0 %v7008_v27  ;;  %v6987_v27 = vld [vmem:[#allocation8 + $0x194] ss:$24 sps:$4 sm:$0xff]  }
 0x2d0   :  { %4364 = vmatpush1.bf16.msra.mxu1 %v6943_v32  ;;  %v7078_v32 = vld [vmem:[#allocation11 + $0x90] ss:$8 sps:$4 sm:$0xff]  }
 0x2d1   :  { %4365 = vmatprep.subr.bf16.mxu1 %v6948_v33  ;;  %v7083_v33 = vld [vmem:[#allocation11 + $0x84] ss:$8 sps:$4 sm:$0xff]  }
 0x2d2   :  { %5099 = vmatpush1.bf16.msra.mxu0 %v7006_v34  ;;  %v6985_v34 = vld [vmem:[#allocation8 + $0x190] ss:$24 sps:$4 sm:$0xff]  }
 0x2d3   :  { %5100 = vmatprep.subr.bf16.mxu0 %v7014_v35  ;;  %v6990_v35 = vld [vmem:[#allocation8 + $0x764] ss:$24 sps:$4 sm:$0xff]  }
 0x2d4   :  { %4366 = vmatpush1.bf16.msra.mxu1 %v6946_v36  ;;  %v7081_v36 = vld [vmem:[#allocation11 + $0x80] ss:$8 sps:$4 sm:$0xff]  }
 0x2d5   :  { %4367 = vmatprep.subr.bf16.mxu1 %v6951_v39  ;;  %v6988_v39 = vld [vmem:[#allocation8 + $0x760] ss:$24 sps:$4 sm:$0xff]  }
 0x2d6   :  { %5101 = vmatpush1.bf16.msra.mxu0 %v7012_v40  ;;  %v6993_v40 = vld [vmem:[#allocation8 + $0x734] ss:$24 sps:$4 sm:$0xff]  }
 0x2d7   :  { %5102 = vmatprep.subr.bf16.mxu0 %v7020_v41  ;;  %v6991_v41 = vld [vmem:[#allocation8 + $0x730] ss:$24 sps:$4 sm:$0xff]  }
 0x2d8   :  { %4368 = vmatpush1.bf16.msra.mxu1 %v6949_v42  ;;  %v6996_v42 = vld [vmem:[#allocation8 + $0x704] ss:$24 sps:$4 sm:$0xff]  }
 0x2d9   :  { %4369 = vmatprep.subr.bf16.mxu1 %v6954_v0  ;;  %v6994_v0 = vld [vmem:[#allocation8 + $0x700] ss:$24 sps:$4 sm:$0xff]  }
 0x2da   :  { %5103 = vmatpush1.bf16.msra.mxu0 %v7018_v29  ;;  %v6999_v29 = vld [vmem:[#allocation8 + $0x6d4] ss:$24 sps:$4 sm:$0xff]  }
 0x2db   :  { %5104 = vmatprep.subr.bf16.mxu0 %v7026_v43  ;;  %v6997_v43 = vld [vmem:[#allocation8 + $0x6d0] ss:$24 sps:$4 sm:$0xff]  }
 0x2dc   :  { %4370 = vmatpush1.bf16.msra.mxu1 %v6952_v44  ;;  %v7005_v44 = vld [vmem:[#allocation8 + $0x6a4] ss:$24 sps:$4 sm:$0xff]  }
 0x2dd   :  { %4371 = vmatprep.subr.bf16.mxu1 %v6957_v45  ;;  %v7003_v45 = vld [vmem:[#allocation8 + $0x6a0] ss:$24 sps:$4 sm:$0xff]  }
 0x2de   :  { %5105 = vmatpush1.bf16.msra.mxu0 %v7024_v46  ;;  %v7011_v46 = vld [vmem:[#allocation8 + $0x674] ss:$24 sps:$4 sm:$0xff]  }
 0x2df   :  { %5106 = vmatprep.subr.bf16.mxu0 %v7032_v47  ;;  %v7017_v47 = vld [vmem:[#allocation8 + $0x644] ss:$24 sps:$4 sm:$0xff]  }
 0x2e0   :  { %4372 = vmatpush1.bf16.msra.mxu1 %v6955_v48  ;;  %v7023_v48 = vld [vmem:[#allocation8 + $0x614] ss:$24 sps:$4 sm:$0xff]  }
 0x2e1   :  { %4373 = vmatprep.subr.bf16.mxu1 %v6960_v49  ;;  %v7021_v49 = vld [vmem:[#allocation8 + $0x610] ss:$24 sps:$4 sm:$0xff]  }
 0x2e2   :  { %5107 = vmatpush1.bf16.msra.mxu0 %v7030_v19  ;;  %v7029_v19 = vld [vmem:[#allocation8 + $0x8e4] ss:$24 sps:$4 sm:$0xff]  }
 0x2e3   :  { %5108 = vmatprep.subr.bf16.mxu0 %v7038_v50  ;;  %v7027_v50 = vld [vmem:[#allocation8 + $0x8e0] ss:$24 sps:$4 sm:$0xff]  }
 0x2e4   :  { %4374 = vmatpush1.bf16.msra.mxu1 %v6958_v52  ;;  %v7035_v52 = vld [vmem:[#allocation8 + $0x8b4] ss:$24 sps:$4 sm:$0xff]  }
 0x2e5   :  { %4375 = vmatprep.subr.bf16.mxu1 %v6963_v53  ;;  %v7033_v53 = vld [vmem:[#allocation8 + $0x8b0] ss:$24 sps:$4 sm:$0xff]  }
 0x2e6   :  { %5109 = vmatpush1.bf16.msra.mxu0 %v7036_v54  ;;  %v7041_v54 = vld [vmem:[#allocation8 + $0x884] ss:$24 sps:$4 sm:$0xff]  }
 0x2e7   :  { %5110 = vmatprep.subr.bf16.mxu0 %v7044_v55  ;;  %v7039_v55 = vld [vmem:[#allocation8 + $0x880] ss:$24 sps:$4 sm:$0xff]  }
 0x2e8   :  { %4376 = vmatpush1.bf16.msra.mxu1 %v6961_v56  ;;  %v7047_v56 = vld [vmem:[#allocation8 + $0x854] ss:$24 sps:$4 sm:$0xff]  }
 0x2e9   :  { %4377 = vmatprep.subr.bf16.mxu1 %v6966_v57  ;;  %v7045_v57 = vld [vmem:[#allocation8 + $0x850] ss:$24 sps:$4 sm:$0xff]  }
 0x2ea   :  { %5111 = vmatpush1.bf16.msra.mxu0 %v7042_v58  ;;  %v7053_v58 = vld [vmem:[#allocation8 + $0x824] ss:$24 sps:$4 sm:$0xff]  }
 0x2eb   :  { %5112 = vmatprep.subr.bf16.mxu0 %v7050_v59  ;;  %v7051_v59 = vld [vmem:[#allocation8 + $0x820] ss:$24 sps:$4 sm:$0xff]  }
 0x2ec   :  { %4378 = vmatpush2.bf16.msra.mxu1 %v6964_v60  ;;  %v7059_v60 = vld [vmem:[#allocation8 + $0x7f4] ss:$24 sps:$4 sm:$0xff]  }
 0x2ed   :  { %4379 = vmatprep.subr.bf16.mxu1 %v6969_v61  ;;  %v7057_v61 = vld [vmem:[#allocation8 + $0x7f0] ss:$24 sps:$4 sm:$0xff]  }
 0x2ee   :  { %5113 = vmatpush2.bf16.msra.mxu0 %v7048_v62  ;;  %v4137_v62 = vpop.f32.mrf.mxu1 }
 0x2ef   :  { %5114 = vmatprep.subr.bf16.mxu0 %v7056_v63  ;;  %v7065_v63 = vld [vmem:[#allocation8 + $0x7c4] ss:$24 sps:$4 sm:$0xff]  }
 0x2f0   :  { %4380 = vmatpush2.bf16.msra.mxu1 %v6967_v1  ;;  %v7063_v1 = vld [vmem:[#allocation8 + $0x7c0] ss:$24 sps:$4 sm:$0xff]  }
 0x2f1   :  { %4381 = vmatprep.subr.bf16.mxu1 %v6972_v4  ;;  %v4139_v4 = vpop.f32.mrf.mxu1 }
 0x2f2   :  { %5115 = vmatpush2.bf16.msra.mxu0 %v7054_v5  ;;  %v4180_v5 = vpop.f32.mrf.mxu0 }
 0x2f3   :  { %5116 = vmatprep.subr.bf16.mxu0 %v7062_v7  ;;  %v7071_v7 = vld [vmem:[#allocation8 + $0x794] ss:$24 sps:$4 sm:$0xff]  }
 0x2f4   :  { %4382 = vmatpush2.bf16.msra.mxu1 %v6970_v8  ;;  %v7069_v8 = vld [vmem:[#allocation8 + $0x790] ss:$24 sps:$4 sm:$0xff]  }
 0x2f5   :  { %4383 = vmatprep.subr.bf16.mxu1 %v6975_v10  ;;  %v4141_v10 = vpop.f32.mrf.mxu1 }
 0x2f6   :  { %5117 = vmatpush2.bf16.msra.mxu0 %v7060_v12  ;;  %v4182_v12 = vpop.f32.mrf.mxu0 }
 0x2f7   :  { %5118 = vmatprep.subr.bf16.mxu0 %v7068_v15  ;;  %v7086_v15 = vld [vmem:[#allocation11 + $0x174] ss:$8 sps:$4 sm:$0xff]  }
 0x2f8   :  { %4384 = vmatpush2.bf16.msra.mxu1 %v6973_v16  ;;  %v7610_v16 = vld [vmem:[#allocation10] sm:$0x3f] }
 0x2f9   :  { %4385 = vmatprep.subr.bf16.mxu1 %v6978_v17  ;;  %v2640_v17 = vrot.slane %v7610_v16, %v7559_v22 }
 0x2fa   :  { %5119 = vmatpush2.bf16.msra.mxu0 %v7066_v18  ;;  %v7084_v18 = vld [vmem:[#allocation11 + $0x170] ss:$8 sps:$4 sm:$0xff]  }
 0x2fb   :  { %5120 = vmatprep.subr.bf16.mxu0 %v7074_v20  ;;  %v2636_v20 = vrot.slane %v7610_v16, %v7556_v21 }
 0x2fc   :  { %4386 = vmatpush2.bf16.msra.mxu1 %v6976_v51  ;;  %v4143_v51 = vpop.f32.mrf.mxu1 }
 0x2fd   :  { %4387 = vmatprep.subr.bf16.mxu1 %v6981_v6  ;;  %v4184_v6 = vpop.f32.mrf.mxu0 }
 0x2fe   :  { %5121 = vmatpush2.bf16.msra.mxu0 %v7072_v3  ;;  %v7089_v3 = vld [vmem:[#allocation11 + $0x164] ss:$8 sps:$4 sm:$0xff]  }
 0x2ff   :  { %5122 = vmatprep.subr.bf16.mxu0 %v7077_v23 }
 0x300   :  { %4388 = vmatpush2.bf16.msra.mxu1 %v6979_v25  ;;  %v4140_v25 = vadd.f32 %v4139_v4, %v2640_v17  ;;  %v7146_v4 = vld [vmem:[#allocation11 + $0x234] ss:$8 sps:$4 sm:$0xff]  }
 0x301   :  { %4389 = vmatprep.subr.bf16.mxu1 %v6984_v26  ;;  %v4142_v26 = vadd.f32 %v4141_v10, %v2636_v20  ;;  %v7149_v10 = vld [vmem:[#allocation11 + $0x224] ss:$8 sps:$4 sm:$0xff]  }
 0x302   :  { %5123 = vmatpush2.bf16.msra.mxu0 %v7075_v28  ;;  %v7087_v28 = vld [vmem:[#allocation11 + $0x160] ss:$8 sps:$4 sm:$0xff]  }
 0x303   :  { %5124 = vmatprep.subr.bf16.mxu0 %v7080_v30  ;;  %v4138_v30 = vadd.f32 %v4137_v62, %v2636_v20  ;;  %v7102_v62 = vld [vmem:[#allocation11 + $0x110] ss:$8 sps:$4 sm:$0xff]   ;;  %v7111_v20 = vld [vmem:[#allocation11 + $0x1e0] ss:$8 sps:$4 sm:$0xff]  }
 0x304   :  { %4390 = vmatpush2.bf16.msra.mxu1 %v6982_v31  ;;  %v4186_v31 = vpop.f32.mrf.mxu0 }
 0x305   :  { %4391 = vmatprep.subr.bf16.mxu1 %v6987_v27 }
 0x306   :  { %5125 = vmatpush2.bf16.msra.mxu0 %v7078_v32  ;;  %v7092_v32 = vld [vmem:[#allocation11 + $0x154] ss:$8 sps:$4 sm:$0xff]  }
 0x307   :  { %5126 = vmatprep.subr.bf16.mxu0 %v7083_v33  ;;  %v4144_v33 = vadd.f32 %v4143_v51, %v2640_v17  ;;  %v7147_v17 = vld [vmem:[#allocation11 + $0x220] ss:$8 sps:$4 sm:$0xff]   ;;  %v7116_v51 = vld [vmem:[#allocation11 + $0x1d4] ss:$8 sps:$4 sm:$0xff]  }
 0x308   :  { %4392 = vmatpush2.bf16.msra.mxu1 %v6985_v34  ;;  %v4183_v34 = vadd.f32 %v4182_v12, %v4140_v25  ;;  %v7108_v12 = vld [vmem:[#allocation11 + $0x1f0] ss:$8 sps:$4 sm:$0xff]   ;;  %v7119_v25 = vld [vmem:[#allocation11 + $0x1c4] ss:$8 sps:$4 sm:$0xff]  }
 0x309   :  { %4447 = vmatprep.subr.bf16.mxu1 %v6990_v35  ;;  %v4185_v35 = vadd.f32 %v4184_v6, %v4142_v26  ;;  %v7150_v6 = vld [vmem:[#allocation11 + $0x210] ss:$8 sps:$4 sm:$0xff]   ;;  %v7153_v26 = vld [vmem:[#allocation11 + $0x200] ss:$8 sps:$4 sm:$0xff]  }
 0x30a   :  { %5127 = vmatpush2.bf16.msra.mxu0 %v7081_v36  ;;  %v4181_v36 = vadd.f32 %v4180_v5, %v4138_v30  ;;  %v7105_v5 = vld [vmem:[#allocation11 + $0x100] ss:$8 sps:$4 sm:$0xff]  }
 0x30b   :  { %4394 = vmatmul.mubr.bf16.vlgmr.msra.gmra.mxu1 %v7567_v2  ;;  %v7009_v2 = vld [vmem:[#allocation8 + $0x670] ss:$24 sps:$4 sm:$0xff]  }
 0x30c   :  { %4448 = vmatpush1.bf16.msra.mxu1 %v6988_v39  ;;  %4479 = vmatprep.mubr.bf16.mxu1 %v7595_v11  ;;  %v7015_v11 = vld [vmem:[#allocation8 + $0x640] ss:$24 sps:$4 sm:$0xff]   ;;  %v7117_v30 = vld [vmem:[#allocation11 + $0x1c0] ss:$8 sps:$4 sm:$0xff]  }
 0x30d   :  { %4449 = vmatprep.subr.bf16.mxu1 %v6993_v40  ;;  %v4187_v40 = vadd.f32 %v4186_v31, %v4144_v33  ;;  %v7122_v31 = vld [vmem:[#allocation11 + $0x1b4] ss:$8 sps:$4 sm:$0xff]   ;;  %v7120_v33 = vld [vmem:[#allocation11 + $0x1b0] ss:$8 sps:$4 sm:$0xff]  }
 0x310   :  { %4450 = vmatpush1.bf16.msra.mxu1 %v6991_v41 }
 0x311   :  { %4451 = vmatprep.subr.bf16.mxu1 %v6996_v42 }
 0x314   :  { %4452 = vmatpush1.bf16.msra.mxu1 %v6994_v0 }
 0x315   :  { %4453 = vmatprep.subr.bf16.mxu1 %v6999_v29 }
 0x318   :  { %4454 = vmatpush1.bf16.msra.mxu1 %v6997_v43  ;;  %v7095_v43 = vld [vmem:[#allocation11 + $0x144] ss:$8 sps:$4 sm:$0xff]  }
 0x319   :  { %4455 = vmatprep.subr.bf16.mxu1 %v7005_v44 }
 0x31c   :  { %4456 = vmatpush1.bf16.msra.mxu1 %v7003_v45  ;;  %v7134_v45 = vld [vmem:[#allocation11 + $0x274] ss:$8 sps:$4 sm:$0xff]  }
 0x31d   :  { %4457 = vmatprep.subr.bf16.mxu1 %v7011_v46  ;;  %5182 = vmatprep.subr.bf16.mxu0 %v7134_v45  ;;  %v7165_v45 = vld [vmem:[#allocation11 + $0x2c0] ss:$8 sps:$4 sm:$0xff]  }
 0x320   :  { %4458 = vmatpush1.bf16.msra.mxu1 %v7009_v2 }
 0x321   :  { %4459 = vmatprep.subr.bf16.mxu1 %v7017_v47 }
 0x324   :  { %4460 = vmatpush1.bf16.msra.mxu1 %v7015_v11  ;;  %v7093_v11 = vld [vmem:[#allocation11 + $0x140] ss:$8 sps:$4 sm:$0xff]  }
 0x325   :  { %4461 = vmatprep.subr.bf16.mxu1 %v7023_v48 }
 0x328   :  { %4462 = vmatpush1.bf16.msra.mxu1 %v7021_v49  ;;  %v7098_v49 = vld [vmem:[#allocation11 + $0x134] ss:$8 sps:$4 sm:$0xff]  }
 0x329   :  { %4463 = vmatprep.subr.bf16.mxu1 %v7029_v19 }
 0x32c   :  { %4464 = vmatpush2.bf16.msra.mxu1 %v7027_v50  ;;  %v7132_v50 = vld [vmem:[#allocation11 + $0x270] ss:$8 sps:$4 sm:$0xff]  }
 0x32d   :  { %4465 = vmatprep.subr.bf16.mxu1 %v7035_v52 }
 0x330   :  { %4466 = vmatpush2.bf16.msra.mxu1 %v7033_v53  ;;  %v7137_v53 = vld [vmem:[#allocation11 + $0x264] ss:$8 sps:$4 sm:$0xff]  }
 0x331   :  { %4467 = vmatprep.subr.bf16.mxu1 %v7041_v54  ;;  %v7096_v54 = vld [vmem:[#allocation11 + $0x130] ss:$8 sps:$4 sm:$0xff]  }
 0x334   :  { %4468 = vmatpush2.bf16.msra.mxu1 %v7039_v55  ;;  %v7101_v55 = vld [vmem:[#allocation11 + $0x124] ss:$8 sps:$4 sm:$0xff]  }
 0x335   :  { %4469 = vmatprep.subr.bf16.mxu1 %v7047_v56  ;;  %v7135_v56 = vld [vmem:[#allocation11 + $0x260] ss:$8 sps:$4 sm:$0xff]  }
 0x338   :  { %4470 = vmatpush2.bf16.msra.mxu1 %v7045_v57  ;;  %v7140_v57 = vld [vmem:[#allocation11 + $0x254] ss:$8 sps:$4 sm:$0xff]  }
 0x339   :  { %4471 = vmatprep.subr.bf16.mxu1 %v7053_v58  ;;  %v7099_v58 = vld [vmem:[#allocation11 + $0x120] ss:$8 sps:$4 sm:$0xff]  }
 0x33c   :  { %4472 = vmatpush2.bf16.msra.mxu1 %v7051_v59  ;;  %v7104_v59 = vld [vmem:[#allocation11 + $0x114] ss:$8 sps:$4 sm:$0xff]  }
 0x33d   :  { %4473 = vmatprep.subr.bf16.mxu1 %v7059_v60  ;;  %v7138_v60 = vld [vmem:[#allocation11 + $0x250] ss:$8 sps:$4 sm:$0xff]  }
 0x340   :  { %4474 = vmatpush2.bf16.msra.mxu1 %v7057_v61  ;;  %v7143_v61 = vld [vmem:[#allocation11 + $0x244] ss:$8 sps:$4 sm:$0xff]  }
 0x341   :  { %4475 = vmatprep.subr.bf16.mxu1 %v7065_v63  ;;  %v7107_v63 = vld [vmem:[#allocation11 + $0x104] ss:$8 sps:$4 sm:$0xff]  }
 0x344   :  { %4476 = vmatpush2.bf16.msra.mxu1 %v7063_v1  ;;  %v7141_v1 = vld [vmem:[#allocation11 + $0x240] ss:$8 sps:$4 sm:$0xff]  }
 0x345   :  { %4477 = vmatprep.subr.bf16.mxu1 %v7071_v7  ;;  %v7110_v7 = vld [vmem:[#allocation11 + $0x1f4] ss:$8 sps:$4 sm:$0xff]  }
 0x348   :  { %4478 = vmatpush2.bf16.msra.mxu1 %v7069_v8  ;;  %v7144_v8 = vld [vmem:[#allocation11 + $0x230] ss:$8 sps:$4 sm:$0xff]  }
 0x349   :  { %5139 = vmatprep.subr.bf16.mxu1 %v7086_v15  ;;  %v7113_v15 = vld [vmem:[#allocation11 + $0x1e4] ss:$8 sps:$4 sm:$0xff]  }
 0x34b   :  { %4480 = vmatmul.mubr.bf16.vlgmr.msra.gmra.mxu1 %v7597_v14  ;;  %v4223_v23 = vpop.f32.mrf.mxu1  ;;  %v7090_v14 = vld [vmem:[#allocation11 + $0x150] ss:$8 sps:$4 sm:$0xff]  }
 0x34c   :  { %5140 = vmatpush1.bf16.msra.mxu1 %v7084_v18  ;;  %v4224_v0 = vadd.f32 %v4223_v23, %v4181_v36  ;;  %v7152_v18 = vld [vmem:[#allocation11 + $0x214] ss:$8 sps:$4 sm:$0xff]   ;;  %v7114_v23 = vld [vmem:[#allocation11 + $0x1d0] ss:$8 sps:$4 sm:$0xff]   ;;  %v7159_v36 = vld [vmem:[#allocation11 + $0x2e0] ss:$8 sps:$4 sm:$0xff]  }
 0x34d   :  { %v4225_v27 = vpop.f32.mrf.mxu1  ;;  %5141 = vmatprep.subr.bf16.mxu1 %v7089_v3  ;;  %v7155_v3 = vld [vmem:[#allocation11 + $0x204] ss:$8 sps:$4 sm:$0xff]  }
 0x34e   :  { %v4226_v41 = vadd.f32 %v4225_v27, %v4183_v34  ;;  %v4490_v48 = vmax.f32 %v4224_v0, 0.0  ;;  %v7156_v27 = vld [vmem:[#allocation11 + $0x2f0] ss:$8 sps:$4 sm:$0xff]   ;;  %v4266_v34 = vpop.f32.mrf.mxu0  ;;  %v7167_v0 = vld [vmem:[#allocation11 + $0x2c4] ss:$8 sps:$4 sm:$0xff]  }
 0x34f   :  { %v4227_v39 = vpop.f32.mrf.mxu1 }
 0x350   :  { %v4228_v42 = vadd.f32 %v4227_v39, %v4185_v35  ;;  %5142 = vmatpush1.bf16.msra.mxu1 %v7087_v28  ;;  %v4491_v2 = vmax.f32 %v4226_v41, 0.0  ;;  %v7158_v28 = vld [vmem:[#allocation11 + $0x2f4] ss:$8 sps:$4 sm:$0xff]   ;;  %v7125_v35 = vld [vmem:[#allocation11 + $0x1a4] ss:$8 sps:$4 sm:$0xff]   ;;  %v4268_v41 = vpop.f32.mrf.mxu0 }
 0x351   :  { %v4229_v29 = vpop.f32.mrf.mxu1  ;;  %5143 = vmatprep.subr.bf16.mxu1 %v7092_v32  ;;  %v7161_v32 = vld [vmem:[#allocation11 + $0x2e4] ss:$8 sps:$4 sm:$0xff]   ;;  %v7164_v39 = vld [vmem:[#allocation11 + $0x2d4] ss:$8 sps:$4 sm:$0xff]  }
 0x352   :  { %v4230_v44 = vadd.f32 %v4229_v29, %v4187_v40  ;;  %v4496_v46 = vmax.f32 %v4228_v42, 0.0  ;;  %v7123_v40 = vld [vmem:[#allocation11 + $0x1a0] ss:$8 sps:$4 sm:$0xff]   ;;  %v7128_v42 = vld [vmem:[#allocation11 + $0x194] ss:$8 sps:$4 sm:$0xff]  }
 0x353   :  { %v7126_v29 = vld [vmem:[#allocation11 + $0x190] ss:$8 sps:$4 sm:$0xff]  }
 0x354   :  { %v4497_v47 = vmax.f32 %v4230_v44, 0.0  ;;  %5144 = vmatpush1.bf16.msra.mxu1 %v7090_v14  ;;  %v4502_v52 = vpack.c.bf16 %v4496_v46, %v4490_v48  ;;  %v7162_v14 = vld [vmem:[#allocation11 + $0x2d0] ss:$8 sps:$4 sm:$0xff]   ;;  %v7131_v44 = vld [vmem:[#allocation11 + $0x184] ss:$8 sps:$4 sm:$0xff]  }
 0x355   :  { %5145 = vmatprep.subr.bf16.mxu1 %v7095_v43  ;;  %v4270_v43 = vpop.f32.mrf.mxu0  ;;  %v7170_v46 = vld [vmem:[#allocation11 + $0x2b4] ss:$8 sps:$4 sm:$0xff]  }
 0x356   :  { %v4503_v19 = vpack.c.bf16 %v4497_v47, %v4491_v2  ;;  %v7129_v2 = vld [vmem:[#allocation11 + $0x180] ss:$8 sps:$4 sm:$0xff]  }
 0x357   :  { %v4272_v47 = vpop.f32.mrf.mxu0 }
 0x358   :  { %5128 = vmatprep.mubr.bf16.mxu0 %v4503_v19  ;;  %5146 = vmatpush1.bf16.msra.mxu1 %v7093_v11  ;;  %v7168_v11 = vld [vmem:[#allocation11 + $0x2b0] ss:$8 sps:$4 sm:$0xff]   ;;  %v2644_v19 = vrot.slane %v7610_v16, %v454_v37 }
 0x359   :  { %5129 = vmatmul.mubr.bf16.vlgmr.msra.gmra.mxu0 %v4502_v52  ;;  %5147 = vmatprep.subr.bf16.mxu1 %v7098_v49  ;;  %v4352_v48 = vpop.f32.mrf.mxu0  ;;  %v2648_v49 = vrot.slane %v7610_v16, %v458_v38 }
 0x35a   :  { %5183 = vmatpush1.bf16.msra.mxu0 %v7132_v50 }
 0x35b   :  { %5184 = vmatprep.subr.bf16.mxu0 %v7137_v53  ;;  %v4354_v50 = vpop.f32.mrf.mxu0  ;;  %v7173_v53 = vld [vmem:[#allocation11 + $0x2a4] ss:$8 sps:$4 sm:$0xff]  }
 0x35c   :  { %5148 = vmatpush1.bf16.msra.mxu1 %v7096_v54  ;;  %v4269_v54 = vadd.f32 %v4268_v41, %v2648_v49 }
 0x35d   :  { %5149 = vmatprep.subr.bf16.mxu1 %v7101_v55  ;;  %v7171_v55 = vld [vmem:[#allocation11 + $0x2a0] ss:$8 sps:$4 sm:$0xff]  }
 0x35e   :  { %5185 = vmatpush1.bf16.msra.mxu0 %v7135_v56  ;;  %v4267_v56 = vadd.f32 %v4266_v34, %v2644_v19  ;;  %v7187_v34 = vld [vmem:[#allocation14 + $0x20] sm:$0xff]  }
 0x35f   :  { %5186 = vmatprep.subr.bf16.mxu0 %v7140_v57 }
 0x360   :  { %5150 = vmatpush1.bf16.msra.mxu1 %v7099_v58  ;;  %v4271_v58 = vadd.f32 %v4270_v43, %v2644_v19 }
 0x361   :  { %5151 = vmatprep.subr.bf16.mxu1 %v7104_v59 }
 0x362   :  { %5187 = vmatpush1.bf16.msra.mxu0 %v7138_v60  ;;  %v4356_v60 = vpop.f32.mrf.mxu0 }
 0x363   :  { %5188 = vmatprep.subr.bf16.mxu0 %v7143_v61 }
 0x364   :  { %5152 = vmatpush1.bf16.msra.mxu1 %v7102_v62  ;;  %v7176_v62 = vld [vmem:[#allocation11 + $0x294] ss:$8 sps:$4 sm:$0xff]  }
 0x365   :  { %5153 = vmatprep.subr.bf16.mxu1 %v7107_v63  ;;  %v4273_v63 = vadd.f32 %v4272_v47, %v2648_v49 }
 0x366   :  { %5189 = vmatpush1.bf16.msra.mxu0 %v7141_v1 }
 0x367   :  { %5190 = vmatprep.subr.bf16.mxu0 %v7146_v4  ;;  %v7174_v4 = vld [vmem:[#allocation11 + $0x290] ss:$8 sps:$4 sm:$0xff]  }
 0x368   :  { %5154 = vmatpush1.bf16.msra.mxu1 %v7105_v5 }
 0x369   :  { %5155 = vmatprep.subr.bf16.mxu1 %v7110_v7 }
 0x36a   :  { %5191 = vmatpush1.bf16.msra.mxu0 %v7144_v8 }
 0x36b   :  { %5192 = vmatprep.subr.bf16.mxu0 %v7149_v10  ;;  %v4358_v10 = vpop.f32.mrf.mxu0 }
 0x36c   :  { %5156 = vmatpush2.bf16.msra.mxu1 %v7108_v12 }
 0x36d   :  { %5157 = vmatprep.subr.bf16.mxu1 %v7113_v15  ;;  %v7179_v15 = vld [vmem:[#allocation11 + $0x284] ss:$8 sps:$4 sm:$0xff]  }
 0x36e   :  { %5193 = vmatpush1.bf16.msra.mxu0 %v7147_v17 }
 0x36f   :  { %5194 = vmatprep.subr.bf16.mxu0 %v7152_v18  ;;  %v7177_v18 = vld [vmem:[#allocation11 + $0x280] ss:$8 sps:$4 sm:$0xff]  }
 0x370   :  { %5158 = vmatpush2.bf16.msra.mxu1 %v7111_v20 }
 0x371   :  { %5159 = vmatprep.subr.bf16.mxu1 %v7116_v51 }
 0x372   :  { %5195 = vmatpush1.bf16.msra.mxu0 %v7150_v6 }
 0x373   :  { %5196 = vmatprep.subr.bf16.mxu0 %v7155_v3 }
 0x374   :  { %5160 = vmatpush2.bf16.msra.mxu1 %v7114_v23 }
 0x375   :  { %5161 = vmatprep.subr.bf16.mxu1 %v7119_v25 }
 0x376   :  { %5197 = vmatpush1.bf16.msra.mxu0 %v7153_v26  ;;  %v7180_v26 = vld [vmem:[#allocation14 + $0x78] sm:$0xff]  }
 0x377   :  { %5198 = vmatprep.subr.bf16.mxu0 %v7158_v28  ;;  %v7181_v28 = vld [vmem:[#allocation14 + $0x38] sm:$0xff]  }
 0x378   :  { %5162 = vmatpush2.bf16.msra.mxu1 %v7117_v30  ;;  %v7182_v30 = vld [vmem:[#allocation14 + $0x70] sm:$0xff]  }
 0x379   :  { %5163 = vmatprep.subr.bf16.mxu1 %v7122_v31  ;;  %v7183_v31 = vld [vmem:[#allocation14 + $0x30] sm:$0xff]  }
 0x37a   :  { %5199 = vmatpush2.bf16.msra.mxu0 %v7156_v27  ;;  %v7184_v27 = vld [vmem:[#allocation14 + $0x68] sm:$0xff]  }
 0x37b   :  { %5200 = vmatprep.subr.bf16.mxu0 %v7161_v32  ;;  %v7185_v32 = vld [vmem:[#allocation14 + $0x28] sm:$0xff]  }
 0x37c   :  { %5164 = vmatpush2.bf16.msra.mxu1 %v7120_v33  ;;  %v7186_v33 = vld [vmem:[#allocation14 + $0x60] sm:$0xff]  }
 0x37d   :  { %5165 = vmatprep.subr.bf16.mxu1 %v7125_v35  ;;  %v7188_v35 = vld [vmem:[#allocation14 + $0x58] sm:$0xff]  }
 0x37e   :  { %5201 = vmatpush2.bf16.msra.mxu0 %v7159_v36  ;;  %v7189_v36 = vld [vmem:[#allocation14 + $0x18] sm:$0xff]  }
 0x37f   :  { %5202 = vmatprep.subr.bf16.mxu0 %v7164_v39 }
 0x380   :  { %5166 = vmatpush2.bf16.msra.mxu1 %v7123_v40 }
 0x381   :  { %5167 = vmatprep.subr.bf16.mxu1 %v7128_v42 }
 0x382   :  { %5203 = vmatpush2.bf16.msra.mxu0 %v7162_v14  ;;  %v2656_v14 = vrot.slane %v7610_v16, %v466_v9 }
 0x383   :  { %5204 = vmatprep.subr.bf16.mxu0 %v7167_v0 }
 0x384   :  { %5168 = vmatpush2.bf16.msra.mxu1 %v7126_v29  ;;  %v2652_v29 = vrot.slane %v7610_v16, %v462_v24 }
 0x385   :  { %5169 = vmatprep.subr.bf16.mxu1 %v7131_v44 }
 0x386   :  { %5205 = vmatpush2.bf16.msra.mxu0 %v7165_v45 }
 0x387   :  { %5206 = vmatprep.subr.bf16.mxu0 %v7170_v46 }
 0x388   :  { %5170 = vmatpush2.bf16.msra.mxu1 %v7129_v2 }
 0x389   :  { %6125 = vmatprep.subr.bf16.mxu1 %v7180_v26 }
 0x38a   :  { %5207 = vmatpush2.bf16.msra.mxu0 %v7168_v11 }
 0x38b   :  { %v4309_v52 = vpop.f32.mrf.mxu1  ;;  %5208 = vmatprep.subr.bf16.mxu0 %v7173_v53 }
 0x38c   :  { %v4310_v61 = vadd.f32 %v4309_v52, %v4267_v56 }
 0x38d   :  { %v4311_v57 = vpop.f32.mrf.mxu1  ;;  %v4438_v41 = vpop.f32.mrf.mxu0 }
 0x38e   :  { %v4312_v59 = vadd.f32 %v4311_v57, %v4269_v54  ;;  %5209 = vmatpush2.bf16.msra.mxu0 %v7171_v55  ;;  %v4353_v12 = vadd.f32 %v4352_v48, %v4310_v61 }
 0x38f   :  { %v4313_v38 = vpop.f32.mrf.mxu1  ;;  %5210 = vmatprep.subr.bf16.mxu0 %v7176_v62  ;;  %v4440_v0 = vpop.f32.mrf.mxu0  ;;  %v7191_v62 = vld [vmem:[#allocation14 + $0x10] sm:$0xff]  }
 0x390   :  { %v4314_v1 = vadd.f32 %v4313_v38, %v4271_v58  ;;  %v4355_v5 = vadd.f32 %v4354_v50, %v4312_v59  ;;  %v4492_v3 = vmax.f32 %v4353_v12, 0.0  ;;  %v7190_v38 = vld [vmem:[#allocation14 + $0x50] sm:$0xff]  }
 0x391   :  { %v4315_v37 = vpop.f32.mrf.mxu1  ;;  %v4442_v46 = vpop.f32.mrf.mxu0 }
 0x392   :  { %v4357_v7 = vadd.f32 %v4356_v60, %v4314_v1  ;;  %v4316_v8 = vadd.f32 %v4315_v37, %v4273_v63  ;;  %5211 = vmatpush2.bf16.msra.mxu0 %v7174_v4  ;;  %v4493_v51 = vmax.f32 %v4355_v5, 0.0  ;;  %v7192_v63 = vld [vmem:[#allocation14 + $0x48] sm:$0xff]   ;;  %v7194_v4 = vld [vmem:[#allocation14 + $0x40] sm:$0xff]  }
 0x393   :  { %5212 = vmatprep.subr.bf16.mxu0 %v7179_v15  ;;  %v4444_v50 = vpop.f32.mrf.mxu0  ;;  %v7193_v1 = vld [vmem:[#allocation14 + $0x8] sm:$0xff]   ;;  %v7195_v37 = vld [vmem:[#allocation14] sm:$0xff]   ;;  %v4604_v15 = vld [vmem:[#allocation13] sm:$0x3] }
 0x394   :  { %v4359_v17 = vadd.f32 %v4358_v10, %v4316_v8  ;;  %v4498_v20 = vmax.f32 %v4357_v7, 0.0 }
 0x396   :  { %v4499_v6 = vmax.f32 %v4359_v17, 0.0  ;;  %5213 = vmatpush2.bf16.msra.mxu0 %v7177_v18  ;;  %v4504_v25 = vpack.c.bf16 %v4498_v20, %v4492_v3  ;;  %v4613_v17 = vrot.slane %v4604_v15, %v7559_v22  ;;  %v4609_v18 = vrot.slane %v4604_v15, %v7556_v21 }
 0x398   :  { %v4505_v23 = vpack.c.bf16 %v4499_v6, %v4493_v51 }
 0x39a   :  { %5171 = vmatprep.mubr.bf16.mxu1 %v4505_v23 }
 0x39b   :  { %5172 = vmatmul.mubr.bf16.vlgmr.msra.gmra.mxu1 %v4504_v25 }
 0x39c   :  { %6126 = vmatpush3.bf16.msra.mxu1 %v7181_v28 }
 0x39d   :  { %6127 = vmatprep.subr.bf16.mxu1 %v7182_v30 }
 0x3a0   :  { %6128 = vmatpush3.bf16.msra.mxu1 %v7183_v31 }
 0x3a1   :  { %6129 = vmatprep.subr.bf16.mxu1 %v7184_v27 }
 0x3a4   :  { %6130 = vmatpush3.bf16.msra.mxu1 %v7185_v32 }
 0x3a5   :  { %6131 = vmatprep.subr.bf16.mxu1 %v7186_v33 }
 0x3a8   :  { %6132 = vmatpush3.bf16.msra.mxu1 %v7187_v34 }
 0x3a9   :  { %6133 = vmatprep.subr.bf16.mxu1 %v7188_v35 }
 0x3ac   :  { %6134 = vmatpush3.bf16.msra.mxu1 %v7189_v36 }
 0x3ad   :  { %6135 = vmatprep.subr.bf16.mxu1 %v7190_v38 }
 0x3b0   :  { %6136 = vmatpush3.bf16.msra.mxu1 %v7191_v62 }
 0x3b1   :  { %6137 = vmatprep.subr.bf16.mxu1 %v7192_v63 }
 0x3b4   :  { %6138 = vmatpush3.bf16.msra.mxu1 %v7193_v1 }
 0x3b5   :  { %6139 = vmatprep.subr.bf16.mxu1 %v7194_v4 }
 0x3b8   :  { %6140 = vmatpush3.bf16.msra.mxu1 %v7195_v37 }
 0x3cb   :  { %v4395_v39 = vpop.f32.mrf.mxu1 }
 0x3cc   :  { %v4396_v2 = vadd.f32 %v4395_v39, %v2652_v29 }
 0x3cd   :  { %v4397_v40 = vpop.f32.mrf.mxu1 }
 0x3ce   :  { %v4398_v44 = vadd.f32 %v4397_v40, %v2656_v14  ;;  %v4439_v52 = vadd.f32 %v4438_v41, %v4396_v2 }
 0x3cf   :  { %v4399_v42 = vpop.f32.mrf.mxu1 }
 0x3d0   :  { %v4400_v45 = vadd.f32 %v4399_v42, %v2652_v29  ;;  %v4441_v49 = vadd.f32 %v4440_v0, %v4398_v44  ;;  %v6108_v44 = vld [vmem:[#allocation16] ss:$0 sm:$0xff] }
 0x3d1   :  { %v4401_v43 = vpop.f32.mrf.mxu1 }
 0x3d2   :  { %v4402_v11 = vadd.f32 %v4401_v43, %v2656_v14  ;;  %v4443_v19 = vadd.f32 %v4442_v46, %v4400_v45 }
 0x3d4   :  { %v4445_v55 = vadd.f32 %v4444_v50, %v4402_v11 }
 0x40b   :  { %v4481_v47 = vpop.f32.mrf.mxu1 }
 0x40c   :  { %v4482_v56 = vadd.f32 %v4481_v47, %v4439_v52 }
 0x40d   :  { %v4483_v48 = vpop.f32.mrf.mxu1 }
 0x40e   :  { %v4484_v54 = vadd.f32 %v4483_v48, %v4441_v49  ;;  %v4494_v59 = vmax.f32 %v4482_v56, 0.0 }
 0x40f   :  { %v4485_v53 = vpop.f32.mrf.mxu1 }
 0x410   :  { %v4486_v9 = vadd.f32 %v4485_v53, %v4443_v19  ;;  %v4495_v16 = vmax.f32 %v4484_v54, 0.0 }
 0x411   :  { %v4487_v13 = vpop.f32.mrf.mxu1 }
 0x412   :  { %v4488_v57 = vadd.f32 %v4487_v13, %v4445_v55  ;;  %v4500_v24 = vmax.f32 %v4486_v9, 0.0 }
 0x414   :  { %v4501_v58 = vmax.f32 %v4488_v57, 0.0  ;;  %v4506_v61 = vpack.c.bf16 %v4500_v24, %v4494_v59 }
 0x416   :  { %v4507_v60 = vpack.c.bf16 %v4501_v58, %v4495_v16 }
 0x418   :  { %5214 = vmatprep.mubr.bf16.mxu0 %v4507_v60 }
 0x419   :  { %5215 = vmatmul.mubr.bf16.vlgmr.msra.gmra.mxu0 %v4506_v61  ;;  %v5130_v5 = vpop.f32.mrf.mxu0 }
 0x41a   :  { %v5131_v25 = vadd.f32 %v5130_v5, %v4609_v18 }
 0x41b   :  { %v5132_v7 = vpop.f32.mrf.mxu0 }
 0x41c   :  { %v5133_v3 = vadd.f32 %v5132_v7, %v4613_v17 }
 0x41d   :  { %v5134_v10 = vpop.f32.mrf.mxu0 }
 0x41e   :  { %v5135_v23 = vadd.f32 %v5134_v10, %v4609_v18 }
 0x41f   :  { %v5136_v20 = vpop.f32.mrf.mxu0 }
 0x420   :  { %v5137_v30 = vadd.f32 %v5136_v20, %v4613_v17 }
 0x45b   :  { %v5173_v8 = vpop.f32.mrf.mxu1 }
 0x45c   :  { %v5174_v32 = vadd.f32 %v5173_v8, %v5131_v25 }
 0x45d   :  { %v5175_v12 = vpop.f32.mrf.mxu1 }
 0x45e   :  { %v5176_v31 = vadd.f32 %v5175_v12, %v5133_v3 }
 0x45f   :  { %v5177_v51 = vpop.f32.mrf.mxu1 }
 0x460   :  { %v5178_v27 = vadd.f32 %v5177_v51, %v5135_v23 }
 0x461   :  { %v5179_v26 = vpop.f32.mrf.mxu1 }
 0x462   :  { %v5180_v34 = vadd.f32 %v5179_v26, %v5137_v30 }
 0x4d9   :  { %v5216_v6 = vpop.f32.mrf.mxu0 }
 0x4da   :  { %v5217_v39 = vadd.f32 %v5216_v6, %v5174_v32 }
 0x4db   :  { %v5218_v28 = vpop.f32.mrf.mxu0 }
 0x4dc   :  { %v5219_v35 = vadd.f32 %v5218_v28, %v5176_v31  ;;  %v5225_v14 = vmax.f32 %v5217_v39, 0.0 }
 0x4dd   :  { %v5220_v33 = vpop.f32.mrf.mxu0 }
 0x4de   :  { %v5221_v36 = vadd.f32 %v5220_v33, %v5178_v27  ;;  %v5226_v41 = vmax.f32 %v5219_v35, 0.0 }
 0x4df   :  { %v5222_v22 = vpop.f32.mrf.mxu0 }
 0x4e0   :  { %v5223_v40 = vadd.f32 %v5222_v22, %v5180_v34  ;;  %v5227_v21 = vmax.f32 %v5221_v36, 0.0 }
 0x4e2   :  { %v5228_v42 = vmax.f32 %v5223_v40, 0.0  ;;  %v5229_v29 = vpack.c.bf16 %v5227_v21, %v5225_v14 }
 0x4e4   :  { %v5230_v0 = vpack.c.bf16 %v5228_v42, %v5226_v41 }
 0x4e6   :  { %5398 = vmatprep.mubr.bf16.mxu1 %v5230_v0 }
 0x4e7   :  { %5399 = vmatmul.mubr.bf16.vlgmr.msra.gmra.mxu1 %v5229_v29 }
 0x5a7   :  { %v6141_v43 = vpop.f32.mrf.mxu1 }
 0x5a9   :  { %v6142_v45 = vpop.f32.mrf.mxu1 }
 0x5aa   :  { %v6143_v46 = vadd.f32 %v6142_v45, %v6141_v43 }
 0x5ab   :  { %v6144_v2 = vpop.f32.mrf.mxu1 }
 0x5ac   :  { %v5401_v47 = vadd.f32 %v6143_v46, %v6108_v44 }
 0x5ad   :  { %v6145_v11 = vpop.f32.mrf.mxu1 }
 0x5ae   :  { %5407 = vst [vmem:[#allocation17] sm:$0xff] %v5401_v47  ;;  %v6146_v48 = vadd.f32 %v6145_v11, %v6144_v2 }
 0x5b0   :  { %v5404_v49 = vadd.f32 %v6146_v48, %v6108_v44 }
 0x5b2   :  { %5408 = vst [vmem:[#allocation17 + $0x8] sm:$0xff] %v5404_v49 }
 0x5b3   :  { %7405 = shalt.err (!%p7402_p7)
}
 0x5b4   :  { %5420 = dma.vmem_to_hbm [thread:$0]  %s5415_s8, 256, %s7646_s9, [#allocation4], %s7431_s1, %s7431_s1, %s7432_s24  }
 0x5b5   :  { %7424 = dma.done.wait [#allocation4], 256  }
 0x5b6   :  { %7425 = vsyncadd [#allocation4], 4294967040 }
 0x5b7   :  { %5424 = vsyncpa [#allocation3], 1 }
 0x5b8   :  { %5425 = vsyncpa [#allocation6], 1 }
 0x5b9   :  { %5426 = vsyncpa [#allocation9], 1 }
 0x5ba   :  { %5427 = vsyncpa [#allocation12], 1 }
 0x5bb   :  { %5428 = vsyncpa [#allocation15], 1 }
 0x5bc   :  { %5429 = vsyncpa [#allocation4], 1 }

</bundles_post_ra>
